<compile_context>
chip_gen: v5e
topology: v5e:2x2
jax: 0.10.0
libtpu: 0.0.40
codegen_flags: <defaults>
</compile_context>

<pallas_src>
import numpy as np
import jax
import jax.numpy as jnp
from jax import lax
from jax.experimental import pallas as pl
from jax.experimental.pallas import tpu as pltpu

INPUT_SIZE = 140                    # cv4_out = INPUT_SIZE - 12 = 128 (lane friendly)
BATCH = 8
HIDDEN = 1080                       # logical Linear width (PyTorch module)
HIDDEN_PAD = 1152                   # 9 * 128: lane-dense, tileable
CV4_OUT = INPUT_SIZE - 12
TK = 384                            # feature/reduction tile (1152 = 3 * 384)
KB = HIDDEN_PAD // TK


# ----------------------------------------------------------------------------
# Deterministic parameter construction (PyTorch-style uniform init), with
# BatchNorm folded into the preceding Conv1d.
# ----------------------------------------------------------------------------
def _fold_bn(w, b, gamma, beta, mean, var, eps=1e-5):
    scale = gamma / np.sqrt(var + eps)
    w_f = w * scale[:, None, None]
    b_f = scale * (b - mean) + beta
    return w_f.astype(np.float32), b_f.astype(np.float32)


def make_params(seed=0):
    rng = np.random.RandomState(seed)

    def conv(co, ci, k):
        s = 1.0 / np.sqrt(ci * k)
        w = rng.uniform(-s, s, size=(co, ci, k)).astype(np.float32)
        b = rng.uniform(-s, s, size=(co,)).astype(np.float32)
        return w, b

    def bn(c):
        gamma = rng.uniform(0.5, 1.5, size=(c,)).astype(np.float32)
        beta = rng.uniform(-0.1, 0.1, size=(c,)).astype(np.float32)
        mean = rng.uniform(-0.1, 0.1, size=(c,)).astype(np.float32)
        var = rng.uniform(0.5, 1.5, size=(c,)).astype(np.float32)
        return gamma, beta, mean, var

    params = {}
    conv_specs = [(3, 1, 3), (5, 3, 3), (3, 5, 5), (1, 3, 5)]   # (co, ci, k)
    for i, (co, ci, k) in enumerate(conv_specs, start=1):
        w, b = conv(co, ci, k)
        g, be, m, v = bn(co)
        wf, bf = _fold_bn(w, b, g, be, m, v)
        params[f"w{i}"], params[f"b{i}"] = wf, bf

    def linear(in_f, out_f):
        s = 1.0 / np.sqrt(in_f)
        W = rng.uniform(-s, s, size=(out_f, in_f)).astype(np.float32)
        b = rng.uniform(-s, s, size=(out_f,)).astype(np.float32)
        return W, b

    params["W5a"], params["b5a"] = linear(CV4_OUT, HIDDEN)
    params["W5b"], params["b5b"] = linear(HIDDEN, HIDDEN)
    return params


# ----------------------------------------------------------------------------
# Fused Pallas kernel.
#   step 0      : conv1..conv4 (valid conv + folded BN + ReLU, VPU) -> flat
#                 scratch (bf16), output accumulator initialised with b5b.
#   every step k: z1_k = flat @ w5a[:, kTK:(k+1)TK] + b5a_k        (MXU)
#                 out  += bf16(z1_k) @ w5b[kTK:(k+1)TK, :]         (MXU)
# The tiny conv/BN parameters are baked in as trace-time constants; the big
# Linear weights stream through the BlockSpec pipeline in bf16.
# ----------------------------------------------------------------------------
def make_rcnn_kernel(params):
    w1, b1 = params["w1"], params["b1"]
    w2, b2 = params["w2"], params["b2"]
    w3, b3 = params["w3"], params["b3"]
    w4, b4 = params["w4"], params["b4"]

    def _conv_bn_relu(xs, w, b):
        # xs: list of per-input-channel arrays, each (N, L_in); valid conv.
        co, ci, kk = w.shape
        n = xs[0].shape[0]
        l_out = xs[0].shape[1] - kk + 1
        # Hoist the shifted slices: one per (input channel, tap), reused across
        # all output channels (avoids co*ci*k re-slices / XLU lane shifts).
        shifted = [[xs[i][:, t:t + l_out] for t in range(kk)] for i in range(ci)]
        outs = []
        for o in range(co):
            acc = jnp.full((n, l_out), float(b[o]), dtype=jnp.float32)
            for i in range(ci):
                for t in range(kk):
                    acc = acc + float(w[o, i, t]) * shifted[i][t]
            outs.append(jnp.maximum(acc, 0.0))          # ReLU
        return outs

    def kernel(x_ref, w5a_ref, b5a_ref, w5b_ref, b5b_ref, out_ref, flat_ref):
        step = pl.program_id(0)

        @pl.when(step == 0)
        def _():
            x = x_ref[...]                               # (N, L), C=1
            h = _conv_bn_relu([x], w1, b1)               # layer_1 (+AvgPool(1)=id)
            h = _conv_bn_relu(h, w2, b2)                 # layer_2 (+AvgPool(1)=id)
            h = _conv_bn_relu(h, w3, b3)                 # layer_3
            h = _conv_bn_relu(h, w4, b4)                 # layer_4 (Dropout=id)
            flat_ref[...] = h[0].astype(jnp.bfloat16)    # x.view(N, -1), (N, 128)
            # Initialise the resident output accumulator with the final bias.
            out_ref[...] = jnp.broadcast_to(b5b_ref[...], out_ref.shape)

        # layer_5: Linear(cv4_out,1080) then Linear(1080,1080), tiled over the
        # padded 1152-wide middle axis; f32 accumulation on the MXU.
        z1_k = jnp.dot(flat_ref[...], w5a_ref[...],
                       preferred_element_type=jnp.float32) + b5a_ref[...]
        out_ref[...] += jnp.dot(z1_k.astype(jnp.bfloat16), w5b_ref[...],
                                preferred_element_type=jnp.float32)

    return kernel


def rcnn_forward(x, params):
    n, l = x.shape
    assert l == INPUT_SIZE and HIDDEN_PAD % TK == 0

    # Zero-pad 1080 -> 1152 and store the big Linear weights in bf16.
    w5a = np.zeros((CV4_OUT, HIDDEN_PAD), np.float32)
    w5a[:, :HIDDEN] = params["W5a"].T
    b5a = np.zeros((1, HIDDEN_PAD), np.float32)
    b5a[:, :HIDDEN] = params["b5a"]
    w5b = np.zeros((HIDDEN_PAD, HIDDEN_PAD), np.float32)
    w5b[:HIDDEN, :HIDDEN] = params["W5b"].T
    b5b = np.zeros((1, HIDDEN_PAD), np.float32)
    b5b[:, :HIDDEN] = params["b5b"]

    w5a = jnp.asarray(w5a, dtype=jnp.bfloat16)
    w5b = jnp.asarray(w5b, dtype=jnp.bfloat16)
    b5a = jnp.asarray(b5a)
    b5b = jnp.asarray(b5b)

    kernel = make_rcnn_kernel(params)

    out_pad = pl.pallas_call(
        kernel,
        out_shape=jax.ShapeDtypeStruct((n, HIDDEN_PAD), jnp.float32),
        grid=(KB,),
        in_specs=[
            pl.BlockSpec((n, l), lambda k: (0, 0)),              # x, fetched once
            pl.BlockSpec((CV4_OUT, TK), lambda k: (0, k)),       # w5a column tile
            pl.BlockSpec((1, TK), lambda k: (0, k)),             # b5a tile
            pl.BlockSpec((TK, HIDDEN_PAD), lambda k: (k, 0)),    # w5b row tile
            pl.BlockSpec((1, HIDDEN_PAD), lambda k: (0, 0)),     # b5b, fetched once
        ],
        out_specs=pl.BlockSpec((n, HIDDEN_PAD), lambda k: (0, 0)),
        scratch_shapes=[pltpu.VMEM((n, CV4_OUT), jnp.bfloat16)],  # flat activations
        compiler_params=pltpu.CompilerParams(
            dimension_semantics=("arbitrary",),                  # reduction axis
        ),
    )(x, w5a, b5a, w5b, b5b)
    return out_pad[:, :HIDDEN]


# ----------------------------------------------------------------------------
# Pure-JAX (f32) reference for validation.
# ----------------------------------------------------------------------------
def reference(x, params):
    h = x[:, None, :]                                    # (N, 1, L)
    for i in range(1, 5):
        w = jnp.asarray(params[f"w{i}"])
        b = jnp.asarray(params[f"b{i}"])
        h = lax.conv_general_dilated(
            h, w, window_strides=(1,), padding="VALID",
            dimension_numbers=("NCH", "OIH", "NCH"),
            precision=lax.Precision.HIGHEST)
        h = jax.nn.relu(h + b[None, :, None])
    flat = h.reshape(h.shape[0], -1)
    z1 = jnp.dot(flat, jnp.asarray(params["W5a"]).T,
                 precision=lax.Precision.HIGHEST) + jnp.asarray(params["b5a"])
    z2 = jnp.dot(z1, jnp.asarray(params["W5b"]).T,
                 precision=lax.Precision.HIGHEST) + jnp.asarray(params["b5b"])
    return z2


if __name__ == "__main__":
    params = make_params(seed=0)
    key = jax.random.PRNGKey(0)
    x = jax.random.normal(key, (BATCH, INPUT_SIZE), dtype=jnp.float32)

    out = rcnn_forward(x, params)
    out = jax.block_until_ready(out)
    assert out.shape == (BATCH, HIDDEN) and out.dtype == jnp.float32

    ref = jax.block_until_ready(reference(x, params))
    # bf16 Linear weights / activations vs f32-HIGHEST reference.
    np.testing.assert_allclose(np.asarray(out), np.asarray(ref),
                               rtol=2e-2, atol=1e-2)
    print("KERNEL_OK")
</pallas_src>

<mosaic_0001>
module attributes {stable_mosaic.version = 11 : i64} {
  func.func @kernel(%arg0: i32, %arg1: memref<8x140xf32, #tpu.memory_space<vmem>>, %arg2: memref<128x384xbf16, #tpu.memory_space<vmem>>, %arg3: memref<1x384xf32, #tpu.memory_space<vmem>>, %arg4: memref<384x1152xbf16, #tpu.memory_space<vmem>>, %arg5: memref<1x1152xf32, #tpu.memory_space<vmem>>, %arg6: memref<8x1152xf32, #tpu.memory_space<vmem>>, %arg7: memref<8x128xbf16, #tpu.memory_space<vmem>>) attributes {dimension_semantics = [#tpu.dimension_semantics<arbitrary>], iteration_bounds = array<i64: 3>, scalar_prefetch = 0 : i64, scratch_operands = 1 : i64, tpu.core_type = #tpu.core_type<tc>, window_params = [{pipeline_mode = #tpu.pipeline_mode<synchronous>, transform_indices = @transform_0, window_bounds = array<i64: 8, 140>}, {transform_indices = @transform_1, window_bounds = array<i64: 128, 384>}, {transform_indices = @transform_2, window_bounds = array<i64: 1, 384>}, {transform_indices = @transform_3, window_bounds = array<i64: 384, 1152>}, {pipeline_mode = #tpu.pipeline_mode<synchronous>, transform_indices = @transform_4, window_bounds = array<i64: 1, 1152>}, {pipeline_mode = #tpu.pipeline_mode<synchronous>, transform_indices = @transform_5, window_bounds = array<i64: 8, 1152>}]} {
    %c0_i32 = arith.constant 0 : i32
    %0 = arith.cmpi eq, %arg0, %c0_i32 : i32
    %1 = arith.extui %0 : i1 to i32
    %c0_i32_0 = arith.constant 0 : i32
    %2 = arith.cmpi ne, %1, %c0_i32_0 : i32
    scf.if %2 {
      %c0_13 = arith.constant 0 : index
      %c0_14 = arith.constant 0 : index
      %15 = vector.load %arg1[%c0_13, %c0_14] : memref<8x140xf32, #tpu.memory_space<vmem>>, vector<8x140xf32>
      %16 = vector.extract_strided_slice %15 {offsets = [0, 0], sizes = [8, 138], strides = [1, 1]} : vector<8x140xf32> to vector<8x138xf32>
      %17 = vector.extract_strided_slice %15 {offsets = [0, 1], sizes = [8, 138], strides = [1, 1]} : vector<8x140xf32> to vector<8x138xf32>
      %18 = vector.extract_strided_slice %15 {offsets = [0, 2], sizes = [8, 138], strides = [1, 1]} : vector<8x140xf32> to vector<8x138xf32>
      %cst_15 = arith.constant -0.26081866 : f32
      %19 = vector.broadcast %cst_15 : f32 to vector<8x138xf32>
      %cst_16 = arith.constant 0.0528160557 : f32
      %20 = vector.broadcast %cst_16 : f32 to vector<8x138xf32>
      %21 = arith.mulf %20, %16 : vector<8x138xf32>
      %22 = arith.addf %19, %21 : vector<8x138xf32>
      %cst_17 = arith.constant 0.232834205 : f32
      %23 = vector.broadcast %cst_17 : f32 to vector<8x138xf32>
      %24 = arith.mulf %23, %17 : vector<8x138xf32>
      %25 = arith.addf %22, %24 : vector<8x138xf32>
      %cst_18 = arith.constant 0.111189641 : f32
      %26 = vector.broadcast %cst_18 : f32 to vector<8x138xf32>
      %27 = arith.mulf %26, %18 : vector<8x138xf32>
      %28 = arith.addf %25, %27 : vector<8x138xf32>
      %cst_19 = arith.constant 0.000000e+00 : f32
      %29 = vector.broadcast %cst_19 : f32 to vector<8x138xf32>
      %30 = arith.maximumf %28, %29 : vector<8x138xf32>
      %cst_20 = arith.constant 0.286196172 : f32
      %31 = vector.broadcast %cst_20 : f32 to vector<8x138xf32>
      %cst_21 = arith.constant 0.0753489956 : f32
      %32 = vector.broadcast %cst_21 : f32 to vector<8x138xf32>
      %33 = arith.mulf %32, %16 : vector<8x138xf32>
      %34 = arith.addf %31, %33 : vector<8x138xf32>
      %cst_22 = arith.constant -0.128166795 : f32
      %35 = vector.broadcast %cst_22 : f32 to vector<8x138xf32>
      %36 = arith.mulf %35, %17 : vector<8x138xf32>
      %37 = arith.addf %34, %36 : vector<8x138xf32>
      %cst_23 = arith.constant 0.244924113 : f32
      %38 = vector.broadcast %cst_23 : f32 to vector<8x138xf32>
      %39 = arith.mulf %38, %18 : vector<8x138xf32>
      %40 = arith.addf %37, %39 : vector<8x138xf32>
      %cst_24 = arith.constant 0.000000e+00 : f32
      %41 = vector.broadcast %cst_24 : f32 to vector<8x138xf32>
      %42 = arith.maximumf %40, %41 : vector<8x138xf32>
      %cst_25 = arith.constant 0.0350563377 : f32
      %43 = vector.broadcast %cst_25 : f32 to vector<8x138xf32>
      %cst_26 = arith.constant -0.0363672152 : f32
      %44 = vector.broadcast %cst_26 : f32 to vector<8x138xf32>
      %45 = arith.mulf %44, %16 : vector<8x138xf32>
      %46 = arith.addf %43, %45 : vector<8x138xf32>
      %cst_27 = arith.constant 0.228281632 : f32
      %47 = vector.broadcast %cst_27 : f32 to vector<8x138xf32>
      %48 = arith.mulf %47, %17 : vector<8x138xf32>
      %49 = arith.addf %46, %48 : vector<8x138xf32>
      %cst_28 = arith.constant 0.270170957 : f32
      %50 = vector.broadcast %cst_28 : f32 to vector<8x138xf32>
      %51 = arith.mulf %50, %18 : vector<8x138xf32>
      %52 = arith.addf %49, %51 : vector<8x138xf32>
      %cst_29 = arith.constant 0.000000e+00 : f32
      %53 = vector.broadcast %cst_29 : f32 to vector<8x138xf32>
      %54 = arith.maximumf %52, %53 : vector<8x138xf32>
      %55 = vector.extract_strided_slice %30 {offsets = [0, 0], sizes = [8, 136], strides = [1, 1]} : vector<8x138xf32> to vector<8x136xf32>
      %56 = vector.extract_strided_slice %30 {offsets = [0, 1], sizes = [8, 136], strides = [1, 1]} : vector<8x138xf32> to vector<8x136xf32>
      %57 = vector.extract_strided_slice %30 {offsets = [0, 2], sizes = [8, 136], strides = [1, 1]} : vector<8x138xf32> to vector<8x136xf32>
      %58 = vector.extract_strided_slice %42 {offsets = [0, 0], sizes = [8, 136], strides = [1, 1]} : vector<8x138xf32> to vector<8x136xf32>
      %59 = vector.extract_strided_slice %42 {offsets = [0, 1], sizes = [8, 136], strides = [1, 1]} : vector<8x138xf32> to vector<8x136xf32>
      %60 = vector.extract_strided_slice %42 {offsets = [0, 2], sizes = [8, 136], strides = [1, 1]} : vector<8x138xf32> to vector<8x136xf32>
      %61 = vector.extract_strided_slice %54 {offsets = [0, 0], sizes = [8, 136], strides = [1, 1]} : vector<8x138xf32> to vector<8x136xf32>
      %62 = vector.extract_strided_slice %54 {offsets = [0, 1], sizes = [8, 136], strides = [1, 1]} : vector<8x138xf32> to vector<8x136xf32>
      %63 = vector.extract_strided_slice %54 {offsets = [0, 2], sizes = [8, 136], strides = [1, 1]} : vector<8x138xf32> to vector<8x136xf32>
      %cst_30 = arith.constant -0.369178355 : f32
      %64 = vector.broadcast %cst_30 : f32 to vector<8x136xf32>
      %cst_31 = arith.constant -0.263791651 : f32
      %65 = vector.broadcast %cst_31 : f32 to vector<8x136xf32>
      %66 = arith.mulf %65, %55 : vector<8x136xf32>
      %67 = arith.addf %64, %66 : vector<8x136xf32>
      %cst_32 = arith.constant 0.0966924876 : f32
      %68 = vector.broadcast %cst_32 : f32 to vector<8x136xf32>
      %69 = arith.mulf %68, %56 : vector<8x136xf32>
      %70 = arith.addf %67, %69 : vector<8x136xf32>
      %cst_33 = arith.constant -0.24646087 : f32
      %71 = vector.broadcast %cst_33 : f32 to vector<8x136xf32>
      %72 = arith.mulf %71, %57 : vector<8x136xf32>
      %73 = arith.addf %70, %72 : vector<8x136xf32>
      %cst_34 = arith.constant 0.307288647 : f32
      %74 = vector.broadcast %cst_34 : f32 to vector<8x136xf32>
      %75 = arith.mulf %74, %58 : vector<8x136xf32>
      %76 = arith.addf %73, %75 : vector<8x136xf32>
      %cst_35 = arith.constant 0.0150982924 : f32
      %77 = vector.broadcast %cst_35 : f32 to vector<8x136xf32>
      %78 = arith.mulf %77, %59 : vector<8x136xf32>
      %79 = arith.addf %76, %78 : vector<8x136xf32>
      %cst_36 = arith.constant -0.0589729063 : f32
      %80 = vector.broadcast %cst_36 : f32 to vector<8x136xf32>
      %81 = arith.mulf %80, %60 : vector<8x136xf32>
      %82 = arith.addf %79, %81 : vector<8x136xf32>
      %cst_37 = arith.constant -0.162703961 : f32
      %83 = vector.broadcast %cst_37 : f32 to vector<8x136xf32>
      %84 = arith.mulf %83, %61 : vector<8x136xf32>
      %85 = arith.addf %82, %84 : vector<8x136xf32>
      %cst_38 = arith.constant 0.189509317 : f32
      %86 = vector.broadcast %cst_38 : f32 to vector<8x136xf32>
      %87 = arith.mulf %86, %62 : vector<8x136xf32>
      %88 = arith.addf %85, %87 : vector<8x136xf32>
      %cst_39 = arith.constant -0.0303023327 : f32
      %89 = vector.broadcast %cst_39 : f32 to vector<8x136xf32>
      %90 = arith.mulf %89, %63 : vector<8x136xf32>
      %91 = arith.addf %88, %90 : vector<8x136xf32>
      %cst_40 = arith.constant 0.000000e+00 : f32
      %92 = vector.broadcast %cst_40 : f32 to vector<8x136xf32>
      %93 = arith.maximumf %91, %92 : vector<8x136xf32>
      %cst_41 = arith.constant 0.180857182 : f32
      %94 = vector.broadcast %cst_41 : f32 to vector<8x136xf32>
      %cst_42 = arith.constant 0.0271888059 : f32
      %95 = vector.broadcast %cst_42 : f32 to vector<8x136xf32>
      %96 = arith.mulf %95, %55 : vector<8x136xf32>
      %97 = arith.addf %94, %96 : vector<8x136xf32>
      %cst_43 = arith.constant -0.191184804 : f32
      %98 = vector.broadcast %cst_43 : f32 to vector<8x136xf32>
      %99 = arith.mulf %98, %56 : vector<8x136xf32>
      %100 = arith.addf %97, %99 : vector<8x136xf32>
      %cst_44 = arith.constant 0.0467365794 : f32
      %101 = vector.broadcast %cst_44 : f32 to vector<8x136xf32>
      %102 = arith.mulf %101, %57 : vector<8x136xf32>
      %103 = arith.addf %100, %102 : vector<8x136xf32>
      %cst_45 = arith.constant 0.0445356257 : f32
      %104 = vector.broadcast %cst_45 : f32 to vector<8x136xf32>
      %105 = arith.mulf %104, %58 : vector<8x136xf32>
      %106 = arith.addf %103, %105 : vector<8x136xf32>
      %cst_46 = arith.constant 0.0464578718 : f32
      %107 = vector.broadcast %cst_46 : f32 to vector<8x136xf32>
      %108 = arith.mulf %107, %59 : vector<8x136xf32>
      %109 = arith.addf %106, %108 : vector<8x136xf32>
      %cst_47 = arith.constant 0.176301092 : f32
      %110 = vector.broadcast %cst_47 : f32 to vector<8x136xf32>
      %111 = arith.mulf %110, %60 : vector<8x136xf32>
      %112 = arith.addf %109, %111 : vector<8x136xf32>
      %cst_48 = arith.constant 7.223720e-02 : f32
      %113 = vector.broadcast %cst_48 : f32 to vector<8x136xf32>
      %114 = arith.mulf %113, %61 : vector<8x136xf32>
      %115 = arith.addf %112, %114 : vector<8x136xf32>
      %cst_49 = arith.constant -0.0558175035 : f32
      %116 = vector.broadcast %cst_49 : f32 to vector<8x136xf32>
      %117 = arith.mulf %116, %62 : vector<8x136xf32>
      %118 = arith.addf %115, %117 : vector<8x136xf32>
      %cst_50 = arith.constant -0.0250172038 : f32
      %119 = vector.broadcast %cst_50 : f32 to vector<8x136xf32>
      %120 = arith.mulf %119, %63 : vector<8x136xf32>
      %121 = arith.addf %118, %120 : vector<8x136xf32>
      %cst_51 = arith.constant 0.000000e+00 : f32
      %122 = vector.broadcast %cst_51 : f32 to vector<8x136xf32>
      %123 = arith.maximumf %121, %122 : vector<8x136xf32>
      %cst_52 = arith.constant -0.0356576256 : f32
      %124 = vector.broadcast %cst_52 : f32 to vector<8x136xf32>
      %cst_53 = arith.constant 0.0954564437 : f32
      %125 = vector.broadcast %cst_53 : f32 to vector<8x136xf32>
      %126 = arith.mulf %125, %55 : vector<8x136xf32>
      %127 = arith.addf %124, %126 : vector<8x136xf32>
      %cst_54 = arith.constant -0.212412387 : f32
      %128 = vector.broadcast %cst_54 : f32 to vector<8x136xf32>
      %129 = arith.mulf %128, %56 : vector<8x136xf32>
      %130 = arith.addf %127, %129 : vector<8x136xf32>
      %cst_55 = arith.constant 0.080548808 : f32
      %131 = vector.broadcast %cst_55 : f32 to vector<8x136xf32>
      %132 = arith.mulf %131, %57 : vector<8x136xf32>
      %133 = arith.addf %130, %132 : vector<8x136xf32>
      %cst_56 = arith.constant 0.0824185833 : f32
      %134 = vector.broadcast %cst_56 : f32 to vector<8x136xf32>
      %135 = arith.mulf %134, %58 : vector<8x136xf32>
      %136 = arith.addf %133, %135 : vector<8x136xf32>
      %cst_57 = arith.constant -0.139886066 : f32
      %137 = vector.broadcast %cst_57 : f32 to vector<8x136xf32>
      %138 = arith.mulf %137, %59 : vector<8x136xf32>
      %139 = arith.addf %136, %138 : vector<8x136xf32>
      %cst_58 = arith.constant -0.179229677 : f32
      %140 = vector.broadcast %cst_58 : f32 to vector<8x136xf32>
      %141 = arith.mulf %140, %60 : vector<8x136xf32>
      %142 = arith.addf %139, %141 : vector<8x136xf32>
      %cst_59 = arith.constant -0.0891486406 : f32
      %143 = vector.broadcast %cst_59 : f32 to vector<8x136xf32>
      %144 = arith.mulf %143, %61 : vector<8x136xf32>
      %145 = arith.addf %142, %144 : vector<8x136xf32>
      %cst_60 = arith.constant -0.0658280924 : f32
      %146 = vector.broadcast %cst_60 : f32 to vector<8x136xf32>
      %147 = arith.mulf %146, %62 : vector<8x136xf32>
      %148 = arith.addf %145, %147 : vector<8x136xf32>
      %cst_61 = arith.constant 0.0339052416 : f32
      %149 = vector.broadcast %cst_61 : f32 to vector<8x136xf32>
      %150 = arith.mulf %149, %63 : vector<8x136xf32>
      %151 = arith.addf %148, %150 : vector<8x136xf32>
      %cst_62 = arith.constant 0.000000e+00 : f32
      %152 = vector.broadcast %cst_62 : f32 to vector<8x136xf32>
      %153 = arith.maximumf %151, %152 : vector<8x136xf32>
      %cst_63 = arith.constant 0.2241925 : f32
      %154 = vector.broadcast %cst_63 : f32 to vector<8x136xf32>
      %cst_64 = arith.constant -0.0319376737 : f32
      %155 = vector.broadcast %cst_64 : f32 to vector<8x136xf32>
      %156 = arith.mulf %155, %55 : vector<8x136xf32>
      %157 = arith.addf %154, %156 : vector<8x136xf32>
      %cst_65 = arith.constant 0.254037619 : f32
      %158 = vector.broadcast %cst_65 : f32 to vector<8x136xf32>
      %159 = arith.mulf %158, %56 : vector<8x136xf32>
      %160 = arith.addf %157, %159 : vector<8x136xf32>
      %cst_66 = arith.constant -0.207004502 : f32
      %161 = vector.broadcast %cst_66 : f32 to vector<8x136xf32>
      %162 = arith.mulf %161, %57 : vector<8x136xf32>
      %163 = arith.addf %160, %162 : vector<8x136xf32>
      %cst_67 = arith.constant -0.151433676 : f32
      %164 = vector.broadcast %cst_67 : f32 to vector<8x136xf32>
      %165 = arith.mulf %164, %58 : vector<8x136xf32>
      %166 = arith.addf %163, %165 : vector<8x136xf32>
      %cst_68 = arith.constant -0.176176757 : f32
      %167 = vector.broadcast %cst_68 : f32 to vector<8x136xf32>
      %168 = arith.mulf %167, %59 : vector<8x136xf32>
      %169 = arith.addf %166, %168 : vector<8x136xf32>
      %cst_69 = arith.constant 0.079642415 : f32
      %170 = vector.broadcast %cst_69 : f32 to vector<8x136xf32>
      %171 = arith.mulf %170, %60 : vector<8x136xf32>
      %172 = arith.addf %169, %171 : vector<8x136xf32>
      %cst_70 = arith.constant -0.128330395 : f32
      %173 = vector.broadcast %cst_70 : f32 to vector<8x136xf32>
      %174 = arith.mulf %173, %61 : vector<8x136xf32>
      %175 = arith.addf %172, %174 : vector<8x136xf32>
      %cst_71 = arith.constant -0.0175241381 : f32
      %176 = vector.broadcast %cst_71 : f32 to vector<8x136xf32>
      %177 = arith.mulf %176, %62 : vector<8x136xf32>
      %178 = arith.addf %175, %177 : vector<8x136xf32>
      %cst_72 = arith.constant -0.13294223 : f32
      %179 = vector.broadcast %cst_72 : f32 to vector<8x136xf32>
      %180 = arith.mulf %179, %63 : vector<8x136xf32>
      %181 = arith.addf %178, %180 : vector<8x136xf32>
      %cst_73 = arith.constant 0.000000e+00 : f32
      %182 = vector.broadcast %cst_73 : f32 to vector<8x136xf32>
      %183 = arith.maximumf %181, %182 : vector<8x136xf32>
      %cst_74 = arith.constant 7.798660e-02 : f32
      %184 = vector.broadcast %cst_74 : f32 to vector<8x136xf32>
      %cst_75 = arith.constant -0.164121091 : f32
      %185 = vector.broadcast %cst_75 : f32 to vector<8x136xf32>
      %186 = arith.mulf %185, %55 : vector<8x136xf32>
      %187 = arith.addf %184, %186 : vector<8x136xf32>
      %cst_76 = arith.constant -0.187507212 : f32
      %188 = vector.broadcast %cst_76 : f32 to vector<8x136xf32>
      %189 = arith.mulf %188, %56 : vector<8x136xf32>
      %190 = arith.addf %187, %189 : vector<8x136xf32>
      %cst_77 = arith.constant 0.0752337128 : f32
      %191 = vector.broadcast %cst_77 : f32 to vector<8x136xf32>
      %192 = arith.mulf %191, %57 : vector<8x136xf32>
      %193 = arith.addf %190, %192 : vector<8x136xf32>
      %cst_78 = arith.constant -0.174124673 : f32
      %194 = vector.broadcast %cst_78 : f32 to vector<8x136xf32>
      %195 = arith.mulf %194, %58 : vector<8x136xf32>
      %196 = arith.addf %193, %195 : vector<8x136xf32>
      %cst_79 = arith.constant -0.146019921 : f32
      %197 = vector.broadcast %cst_79 : f32 to vector<8x136xf32>
      %198 = arith.mulf %197, %59 : vector<8x136xf32>
      %199 = arith.addf %196, %198 : vector<8x136xf32>
      %cst_80 = arith.constant -0.063176088 : f32
      %200 = vector.broadcast %cst_80 : f32 to vector<8x136xf32>
      %201 = arith.mulf %200, %60 : vector<8x136xf32>
      %202 = arith.addf %199, %201 : vector<8x136xf32>
      %cst_81 = arith.constant 0.154478192 : f32
      %203 = vector.broadcast %cst_81 : f32 to vector<8x136xf32>
      %204 = arith.mulf %203, %61 : vector<8x136xf32>
      %205 = arith.addf %202, %204 : vector<8x136xf32>
      %cst_82 = arith.constant -0.193895251 : f32
      %206 = vector.broadcast %cst_82 : f32 to vector<8x136xf32>
      %207 = arith.mulf %206, %62 : vector<8x136xf32>
      %208 = arith.addf %205, %207 : vector<8x136xf32>
      %cst_83 = arith.constant 0.162636191 : f32
      %209 = vector.broadcast %cst_83 : f32 to vector<8x136xf32>
      %210 = arith.mulf %209, %63 : vector<8x136xf32>
      %211 = arith.addf %208, %210 : vector<8x136xf32>
      %cst_84 = arith.constant 0.000000e+00 : f32
      %212 = vector.broadcast %cst_84 : f32 to vector<8x136xf32>
      %213 = arith.maximumf %211, %212 : vector<8x136xf32>
      %214 = vector.extract_strided_slice %93 {offsets = [0, 0], sizes = [8, 132], strides = [1, 1]} : vector<8x136xf32> to vector<8x132xf32>
      %215 = vector.extract_strided_slice %93 {offsets = [0, 1], sizes = [8, 132], strides = [1, 1]} : vector<8x136xf32> to vector<8x132xf32>
      %216 = vector.extract_strided_slice %93 {offsets = [0, 2], sizes = [8, 132], strides = [1, 1]} : vector<8x136xf32> to vector<8x132xf32>
      %217 = vector.extract_strided_slice %93 {offsets = [0, 3], sizes = [8, 132], strides = [1, 1]} : vector<8x136xf32> to vector<8x132xf32>
      %218 = vector.extract_strided_slice %93 {offsets = [0, 4], sizes = [8, 132], strides = [1, 1]} : vector<8x136xf32> to vector<8x132xf32>
      %219 = vector.extract_strided_slice %123 {offsets = [0, 0], sizes = [8, 132], strides = [1, 1]} : vector<8x136xf32> to vector<8x132xf32>
      %220 = vector.extract_strided_slice %123 {offsets = [0, 1], sizes = [8, 132], strides = [1, 1]} : vector<8x136xf32> to vector<8x132xf32>
      %221 = vector.extract_strided_slice %123 {offsets = [0, 2], sizes = [8, 132], strides = [1, 1]} : vector<8x136xf32> to vector<8x132xf32>
      %222 = vector.extract_strided_slice %123 {offsets = [0, 3], sizes = [8, 132], strides = [1, 1]} : vector<8x136xf32> to vector<8x132xf32>
      %223 = vector.extract_strided_slice %123 {offsets = [0, 4], sizes = [8, 132], strides = [1, 1]} : vector<8x136xf32> to vector<8x132xf32>
      %224 = vector.extract_strided_slice %153 {offsets = [0, 0], sizes = [8, 132], strides = [1, 1]} : vector<8x136xf32> to vector<8x132xf32>
      %225 = vector.extract_strided_slice %153 {offsets = [0, 1], sizes = [8, 132], strides = [1, 1]} : vector<8x136xf32> to vector<8x132xf32>
      %226 = vector.extract_strided_slice %153 {offsets = [0, 2], sizes = [8, 132], strides = [1, 1]} : vector<8x136xf32> to vector<8x132xf32>
      %227 = vector.extract_strided_slice %153 {offsets = [0, 3], sizes = [8, 132], strides = [1, 1]} : vector<8x136xf32> to vector<8x132xf32>
      %228 = vector.extract_strided_slice %153 {offsets = [0, 4], sizes = [8, 132], strides = [1, 1]} : vector<8x136xf32> to vector<8x132xf32>
      %229 = vector.extract_strided_slice %183 {offsets = [0, 0], sizes = [8, 132], strides = [1, 1]} : vector<8x136xf32> to vector<8x132xf32>
      %230 = vector.extract_strided_slice %183 {offsets = [0, 1], sizes = [8, 132], strides = [1, 1]} : vector<8x136xf32> to vector<8x132xf32>
      %231 = vector.extract_strided_slice %183 {offsets = [0, 2], sizes = [8, 132], strides = [1, 1]} : vector<8x136xf32> to vector<8x132xf32>
      %232 = vector.extract_strided_slice %183 {offsets = [0, 3], sizes = [8, 132], strides = [1, 1]} : vector<8x136xf32> to vector<8x132xf32>
      %233 = vector.extract_strided_slice %183 {offsets = [0, 4], sizes = [8, 132], strides = [1, 1]} : vector<8x136xf32> to vector<8x132xf32>
      %234 = vector.extract_strided_slice %213 {offsets = [0, 0], sizes = [8, 132], strides = [1, 1]} : vector<8x136xf32> to vector<8x132xf32>
      %235 = vector.extract_strided_slice %213 {offsets = [0, 1], sizes = [8, 132], strides = [1, 1]} : vector<8x136xf32> to vector<8x132xf32>
      %236 = vector.extract_strided_slice %213 {offsets = [0, 2], sizes = [8, 132], strides = [1, 1]} : vector<8x136xf32> to vector<8x132xf32>
      %237 = vector.extract_strided_slice %213 {offsets = [0, 3], sizes = [8, 132], strides = [1, 1]} : vector<8x136xf32> to vector<8x132xf32>
      %238 = vector.extract_strided_slice %213 {offsets = [0, 4], sizes = [8, 132], strides = [1, 1]} : vector<8x136xf32> to vector<8x132xf32>
      %cst_85 = arith.constant -0.169058979 : f32
      %239 = vector.broadcast %cst_85 : f32 to vector<8x132xf32>
      %cst_86 = arith.constant -0.0556806475 : f32
      %240 = vector.broadcast %cst_86 : f32 to vector<8x132xf32>
      %241 = arith.mulf %240, %214 : vector<8x132xf32>
      %242 = arith.addf %239, %241 : vector<8x132xf32>
      %cst_87 = arith.constant -0.0837636291 : f32
      %243 = vector.broadcast %cst_87 : f32 to vector<8x132xf32>
      %244 = arith.mulf %243, %215 : vector<8x132xf32>
      %245 = arith.addf %242, %244 : vector<8x132xf32>
      %cst_88 = arith.constant 0.0228738654 : f32
      %246 = vector.broadcast %cst_88 : f32 to vector<8x132xf32>
      %247 = arith.mulf %246, %216 : vector<8x132xf32>
      %248 = arith.addf %245, %247 : vector<8x132xf32>
      %cst_89 = arith.constant -0.126882702 : f32
      %249 = vector.broadcast %cst_89 : f32 to vector<8x132xf32>
      %250 = arith.mulf %249, %217 : vector<8x132xf32>
      %251 = arith.addf %248, %250 : vector<8x132xf32>
      %cst_90 = arith.constant 0.0869711562 : f32
      %252 = vector.broadcast %cst_90 : f32 to vector<8x132xf32>
      %253 = arith.mulf %252, %218 : vector<8x132xf32>
      %254 = arith.addf %251, %253 : vector<8x132xf32>
      %cst_91 = arith.constant -0.130957618 : f32
      %255 = vector.broadcast %cst_91 : f32 to vector<8x132xf32>
      %256 = arith.mulf %255, %219 : vector<8x132xf32>
      %257 = arith.addf %254, %256 : vector<8x132xf32>
      %cst_92 = arith.constant 0.0470143743 : f32
      %258 = vector.broadcast %cst_92 : f32 to vector<8x132xf32>
      %259 = arith.mulf %258, %220 : vector<8x132xf32>
      %260 = arith.addf %257, %259 : vector<8x132xf32>
      %cst_93 = arith.constant -0.0608094782 : f32
      %261 = vector.broadcast %cst_93 : f32 to vector<8x132xf32>
      %262 = arith.mulf %261, %221 : vector<8x132xf32>
      %263 = arith.addf %260, %262 : vector<8x132xf32>
      %cst_94 = arith.constant 0.0621848739 : f32
      %264 = vector.broadcast %cst_94 : f32 to vector<8x132xf32>
      %265 = arith.mulf %264, %222 : vector<8x132xf32>
      %266 = arith.addf %263, %265 : vector<8x132xf32>
      %cst_95 = arith.constant 0.122201815 : f32
      %267 = vector.broadcast %cst_95 : f32 to vector<8x132xf32>
      %268 = arith.mulf %267, %223 : vector<8x132xf32>
      %269 = arith.addf %266, %268 : vector<8x132xf32>
      %cst_96 = arith.constant -0.0664292127 : f32
      %270 = vector.broadcast %cst_96 : f32 to vector<8x132xf32>
      %271 = arith.mulf %270, %224 : vector<8x132xf32>
      %272 = arith.addf %269, %271 : vector<8x132xf32>
      %cst_97 = arith.constant 0.0201358609 : f32
      %273 = vector.broadcast %cst_97 : f32 to vector<8x132xf32>
      %274 = arith.mulf %273, %225 : vector<8x132xf32>
      %275 = arith.addf %272, %274 : vector<8x132xf32>
      %cst_98 = arith.constant 0.0243357196 : f32
      %276 = vector.broadcast %cst_98 : f32 to vector<8x132xf32>
      %277 = arith.mulf %276, %226 : vector<8x132xf32>
      %278 = arith.addf %275, %277 : vector<8x132xf32>
      %cst_99 = arith.constant 0.0191032737 : f32
      %279 = vector.broadcast %cst_99 : f32 to vector<8x132xf32>
      %280 = arith.mulf %279, %227 : vector<8x132xf32>
      %281 = arith.addf %278, %280 : vector<8x132xf32>
      %cst_100 = arith.constant -0.0732167214 : f32
      %282 = vector.broadcast %cst_100 : f32 to vector<8x132xf32>
      %283 = arith.mulf %282, %228 : vector<8x132xf32>
      %284 = arith.addf %281, %283 : vector<8x132xf32>
      %cst_101 = arith.constant 0.11970602 : f32
      %285 = vector.broadcast %cst_101 : f32 to vector<8x132xf32>
      %286 = arith.mulf %285, %229 : vector<8x132xf32>
      %287 = arith.addf %284, %286 : vector<8x132xf32>
      %cst_102 = arith.constant -0.0139799537 : f32
      %288 = vector.broadcast %cst_102 : f32 to vector<8x132xf32>
      %289 = arith.mulf %288, %230 : vector<8x132xf32>
      %290 = arith.addf %287, %289 : vector<8x132xf32>
      %cst_103 = arith.constant 0.0915898308 : f32
      %291 = vector.broadcast %cst_103 : f32 to vector<8x132xf32>
      %292 = arith.mulf %291, %231 : vector<8x132xf32>
      %293 = arith.addf %290, %292 : vector<8x132xf32>
      %cst_104 = arith.constant 0.0527419597 : f32
      %294 = vector.broadcast %cst_104 : f32 to vector<8x132xf32>
      %295 = arith.mulf %294, %232 : vector<8x132xf32>
      %296 = arith.addf %293, %295 : vector<8x132xf32>
      %cst_105 = arith.constant -0.0535573065 : f32
      %297 = vector.broadcast %cst_105 : f32 to vector<8x132xf32>
      %298 = arith.mulf %297, %233 : vector<8x132xf32>
      %299 = arith.addf %296, %298 : vector<8x132xf32>
      %cst_106 = arith.constant 0.0829675793 : f32
      %300 = vector.broadcast %cst_106 : f32 to vector<8x132xf32>
      %301 = arith.mulf %300, %234 : vector<8x132xf32>
      %302 = arith.addf %299, %301 : vector<8x132xf32>
      %cst_107 = arith.constant -0.0273636933 : f32
      %303 = vector.broadcast %cst_107 : f32 to vector<8x132xf32>
      %304 = arith.mulf %303, %235 : vector<8x132xf32>
      %305 = arith.addf %302, %304 : vector<8x132xf32>
      %cst_108 = arith.constant 0.100762993 : f32
      %306 = vector.broadcast %cst_108 : f32 to vector<8x132xf32>
      %307 = arith.mulf %306, %236 : vector<8x132xf32>
      %308 = arith.addf %305, %307 : vector<8x132xf32>
      %cst_109 = arith.constant 2.148840e-02 : f32
      %309 = vector.broadcast %cst_109 : f32 to vector<8x132xf32>
      %310 = arith.mulf %309, %237 : vector<8x132xf32>
      %311 = arith.addf %308, %310 : vector<8x132xf32>
      %cst_110 = arith.constant 0.100930147 : f32
      %312 = vector.broadcast %cst_110 : f32 to vector<8x132xf32>
      %313 = arith.mulf %312, %238 : vector<8x132xf32>
      %314 = arith.addf %311, %313 : vector<8x132xf32>
      %cst_111 = arith.constant 0.000000e+00 : f32
      %315 = vector.broadcast %cst_111 : f32 to vector<8x132xf32>
      %316 = arith.maximumf %314, %315 : vector<8x132xf32>
      %cst_112 = arith.constant 0.0200516079 : f32
      %317 = vector.broadcast %cst_112 : f32 to vector<8x132xf32>
      %cst_113 = arith.constant 0.0384745039 : f32
      %318 = vector.broadcast %cst_113 : f32 to vector<8x132xf32>
      %319 = arith.mulf %318, %214 : vector<8x132xf32>
      %320 = arith.addf %317, %319 : vector<8x132xf32>
      %cst_114 = arith.constant 0.0450136364 : f32
      %321 = vector.broadcast %cst_114 : f32 to vector<8x132xf32>
      %322 = arith.mulf %321, %215 : vector<8x132xf32>
      %323 = arith.addf %320, %322 : vector<8x132xf32>
      %cst_115 = arith.constant 2.64657545E-4 : f32
      %324 = vector.broadcast %cst_115 : f32 to vector<8x132xf32>
      %325 = arith.mulf %324, %216 : vector<8x132xf32>
      %326 = arith.addf %323, %325 : vector<8x132xf32>
      %cst_116 = arith.constant 0.0911413654 : f32
      %327 = vector.broadcast %cst_116 : f32 to vector<8x132xf32>
      %328 = arith.mulf %327, %217 : vector<8x132xf32>
      %329 = arith.addf %326, %328 : vector<8x132xf32>
      %cst_117 = arith.constant 0.0287742484 : f32
      %330 = vector.broadcast %cst_117 : f32 to vector<8x132xf32>
      %331 = arith.mulf %330, %218 : vector<8x132xf32>
      %332 = arith.addf %329, %331 : vector<8x132xf32>
      %cst_118 = arith.constant -0.0152164083 : f32
      %333 = vector.broadcast %cst_118 : f32 to vector<8x132xf32>
      %334 = arith.mulf %333, %219 : vector<8x132xf32>
      %335 = arith.addf %332, %334 : vector<8x132xf32>
      %cst_119 = arith.constant 0.0212610625 : f32
      %336 = vector.broadcast %cst_119 : f32 to vector<8x132xf32>
      %337 = arith.mulf %336, %220 : vector<8x132xf32>
      %338 = arith.addf %335, %337 : vector<8x132xf32>
      %cst_120 = arith.constant -0.0960819125 : f32
      %339 = vector.broadcast %cst_120 : f32 to vector<8x132xf32>
      %340 = arith.mulf %339, %221 : vector<8x132xf32>
      %341 = arith.addf %338, %340 : vector<8x132xf32>
      %cst_121 = arith.constant -0.0396522507 : f32
      %342 = vector.broadcast %cst_121 : f32 to vector<8x132xf32>
      %343 = arith.mulf %342, %222 : vector<8x132xf32>
      %344 = arith.addf %341, %343 : vector<8x132xf32>
      %cst_122 = arith.constant 0.0320082381 : f32
      %345 = vector.broadcast %cst_122 : f32 to vector<8x132xf32>
      %346 = arith.mulf %345, %223 : vector<8x132xf32>
      %347 = arith.addf %344, %346 : vector<8x132xf32>
      %cst_123 = arith.constant -0.0419497937 : f32
      %348 = vector.broadcast %cst_123 : f32 to vector<8x132xf32>
      %349 = arith.mulf %348, %224 : vector<8x132xf32>
      %350 = arith.addf %347, %349 : vector<8x132xf32>
      %cst_124 = arith.constant 0.0235835854 : f32
      %351 = vector.broadcast %cst_124 : f32 to vector<8x132xf32>
      %352 = arith.mulf %351, %225 : vector<8x132xf32>
      %353 = arith.addf %350, %352 : vector<8x132xf32>
      %cst_125 = arith.constant -0.0142344898 : f32
      %354 = vector.broadcast %cst_125 : f32 to vector<8x132xf32>
      %355 = arith.mulf %354, %226 : vector<8x132xf32>
      %356 = arith.addf %353, %355 : vector<8x132xf32>
      %cst_126 = arith.constant -0.0728449598 : f32
      %357 = vector.broadcast %cst_126 : f32 to vector<8x132xf32>
      %358 = arith.mulf %357, %227 : vector<8x132xf32>
      %359 = arith.addf %356, %358 : vector<8x132xf32>
      %cst_127 = arith.constant -0.040310204 : f32
      %360 = vector.broadcast %cst_127 : f32 to vector<8x132xf32>
      %361 = arith.mulf %360, %228 : vector<8x132xf32>
      %362 = arith.addf %359, %361 : vector<8x132xf32>
      %cst_128 = arith.constant 0.0139814215 : f32
      %363 = vector.broadcast %cst_128 : f32 to vector<8x132xf32>
      %364 = arith.mulf %363, %229 : vector<8x132xf32>
      %365 = arith.addf %362, %364 : vector<8x132xf32>
      %cst_129 = arith.constant 0.0181595366 : f32
      %366 = vector.broadcast %cst_129 : f32 to vector<8x132xf32>
      %367 = arith.mulf %366, %230 : vector<8x132xf32>
      %368 = arith.addf %365, %367 : vector<8x132xf32>
      %cst_130 = arith.constant 0.0148527687 : f32
      %369 = vector.broadcast %cst_130 : f32 to vector<8x132xf32>
      %370 = arith.mulf %369, %231 : vector<8x132xf32>
      %371 = arith.addf %368, %370 : vector<8x132xf32>
      %cst_131 = arith.constant 0.0306148492 : f32
      %372 = vector.broadcast %cst_131 : f32 to vector<8x132xf32>
      %373 = arith.mulf %372, %232 : vector<8x132xf32>
      %374 = arith.addf %371, %373 : vector<8x132xf32>
      %cst_132 = arith.constant 0.0303955209 : f32
      %375 = vector.broadcast %cst_132 : f32 to vector<8x132xf32>
      %376 = arith.mulf %375, %233 : vector<8x132xf32>
      %377 = arith.addf %374, %376 : vector<8x132xf32>
      %cst_133 = arith.constant -0.0137049807 : f32
      %378 = vector.broadcast %cst_133 : f32 to vector<8x132xf32>
      %379 = arith.mulf %378, %234 : vector<8x132xf32>
      %380 = arith.addf %377, %379 : vector<8x132xf32>
      %cst_134 = arith.constant 7.924380e-02 : f32
      %381 = vector.broadcast %cst_134 : f32 to vector<8x132xf32>
      %382 = arith.mulf %381, %235 : vector<8x132xf32>
      %383 = arith.addf %380, %382 : vector<8x132xf32>
      %cst_135 = arith.constant -0.0264657419 : f32
      %384 = vector.broadcast %cst_135 : f32 to vector<8x132xf32>
      %385 = arith.mulf %384, %236 : vector<8x132xf32>
      %386 = arith.addf %383, %385 : vector<8x132xf32>
      %cst_136 = arith.constant -0.012816417 : f32
      %387 = vector.broadcast %cst_136 : f32 to vector<8x132xf32>
      %388 = arith.mulf %387, %237 : vector<8x132xf32>
      %389 = arith.addf %386, %388 : vector<8x132xf32>
      %cst_137 = arith.constant 0.0783199072 : f32
      %390 = vector.broadcast %cst_137 : f32 to vector<8x132xf32>
      %391 = arith.mulf %390, %238 : vector<8x132xf32>
      %392 = arith.addf %389, %391 : vector<8x132xf32>
      %cst_138 = arith.constant 0.000000e+00 : f32
      %393 = vector.broadcast %cst_138 : f32 to vector<8x132xf32>
      %394 = arith.maximumf %392, %393 : vector<8x132xf32>
      %cst_139 = arith.constant -0.0818595886 : f32
      %395 = vector.broadcast %cst_139 : f32 to vector<8x132xf32>
      %cst_140 = arith.constant 0.184454754 : f32
      %396 = vector.broadcast %cst_140 : f32 to vector<8x132xf32>
      %397 = arith.mulf %396, %214 : vector<8x132xf32>
      %398 = arith.addf %395, %397 : vector<8x132xf32>
      %cst_141 = arith.constant 0.12282481 : f32
      %399 = vector.broadcast %cst_141 : f32 to vector<8x132xf32>
      %400 = arith.mulf %399, %215 : vector<8x132xf32>
      %401 = arith.addf %398, %400 : vector<8x132xf32>
      %cst_142 = arith.constant -0.240827888 : f32
      %402 = vector.broadcast %cst_142 : f32 to vector<8x132xf32>
      %403 = arith.mulf %402, %216 : vector<8x132xf32>
      %404 = arith.addf %401, %403 : vector<8x132xf32>
      %cst_143 = arith.constant 0.252701133 : f32
      %405 = vector.broadcast %cst_143 : f32 to vector<8x132xf32>
      %406 = arith.mulf %405, %217 : vector<8x132xf32>
      %407 = arith.addf %404, %406 : vector<8x132xf32>
      %cst_144 = arith.constant 0.129061401 : f32
      %408 = vector.broadcast %cst_144 : f32 to vector<8x132xf32>
      %409 = arith.mulf %408, %218 : vector<8x132xf32>
      %410 = arith.addf %407, %409 : vector<8x132xf32>
      %cst_145 = arith.constant 0.300511122 : f32
      %411 = vector.broadcast %cst_145 : f32 to vector<8x132xf32>
      %412 = arith.mulf %411, %219 : vector<8x132xf32>
      %413 = arith.addf %410, %412 : vector<8x132xf32>
      %cst_146 = arith.constant -0.211176336 : f32
      %414 = vector.broadcast %cst_146 : f32 to vector<8x132xf32>
      %415 = arith.mulf %414, %220 : vector<8x132xf32>
      %416 = arith.addf %413, %415 : vector<8x132xf32>
      %cst_147 = arith.constant 0.221763343 : f32
      %417 = vector.broadcast %cst_147 : f32 to vector<8x132xf32>
      %418 = arith.mulf %417, %221 : vector<8x132xf32>
      %419 = arith.addf %416, %418 : vector<8x132xf32>
      %cst_148 = arith.constant -0.203318104 : f32
      %420 = vector.broadcast %cst_148 : f32 to vector<8x132xf32>
      %421 = arith.mulf %420, %222 : vector<8x132xf32>
      %422 = arith.addf %419, %421 : vector<8x132xf32>
      %cst_149 = arith.constant 6.961440e-02 : f32
      %423 = vector.broadcast %cst_149 : f32 to vector<8x132xf32>
      %424 = arith.mulf %423, %223 : vector<8x132xf32>
      %425 = arith.addf %422, %424 : vector<8x132xf32>
      %cst_150 = arith.constant -0.226615131 : f32
      %426 = vector.broadcast %cst_150 : f32 to vector<8x132xf32>
      %427 = arith.mulf %426, %224 : vector<8x132xf32>
      %428 = arith.addf %425, %427 : vector<8x132xf32>
      %cst_151 = arith.constant 0.209644139 : f32
      %429 = vector.broadcast %cst_151 : f32 to vector<8x132xf32>
      %430 = arith.mulf %429, %225 : vector<8x132xf32>
      %431 = arith.addf %428, %430 : vector<8x132xf32>
      %cst_152 = arith.constant 0.185132444 : f32
      %432 = vector.broadcast %cst_152 : f32 to vector<8x132xf32>
      %433 = arith.mulf %432, %226 : vector<8x132xf32>
      %434 = arith.addf %431, %433 : vector<8x132xf32>
      %cst_153 = arith.constant 0.0416270755 : f32
      %435 = vector.broadcast %cst_153 : f32 to vector<8x132xf32>
      %436 = arith.mulf %435, %227 : vector<8x132xf32>
      %437 = arith.addf %434, %436 : vector<8x132xf32>
      %cst_154 = arith.constant -0.0559138432 : f32
      %438 = vector.broadcast %cst_154 : f32 to vector<8x132xf32>
      %439 = arith.mulf %438, %228 : vector<8x132xf32>
      %440 = arith.addf %437, %439 : vector<8x132xf32>
      %cst_155 = arith.constant -0.25953871 : f32
      %441 = vector.broadcast %cst_155 : f32 to vector<8x132xf32>
      %442 = arith.mulf %441, %229 : vector<8x132xf32>
      %443 = arith.addf %440, %442 : vector<8x132xf32>
      %cst_156 = arith.constant 0.11893335 : f32
      %444 = vector.broadcast %cst_156 : f32 to vector<8x132xf32>
      %445 = arith.mulf %444, %230 : vector<8x132xf32>
      %446 = arith.addf %443, %445 : vector<8x132xf32>
      %cst_157 = arith.constant -0.0279864185 : f32
      %447 = vector.broadcast %cst_157 : f32 to vector<8x132xf32>
      %448 = arith.mulf %447, %231 : vector<8x132xf32>
      %449 = arith.addf %446, %448 : vector<8x132xf32>
      %cst_158 = arith.constant 0.133768827 : f32
      %450 = vector.broadcast %cst_158 : f32 to vector<8x132xf32>
      %451 = arith.mulf %450, %232 : vector<8x132xf32>
      %452 = arith.addf %449, %451 : vector<8x132xf32>
      %cst_159 = arith.constant 0.2207129 : f32
      %453 = vector.broadcast %cst_159 : f32 to vector<8x132xf32>
      %454 = arith.mulf %453, %233 : vector<8x132xf32>
      %455 = arith.addf %452, %454 : vector<8x132xf32>
      %cst_160 = arith.constant 0.286459565 : f32
      %456 = vector.broadcast %cst_160 : f32 to vector<8x132xf32>
      %457 = arith.mulf %456, %234 : vector<8x132xf32>
      %458 = arith.addf %455, %457 : vector<8x132xf32>
      %cst_161 = arith.constant 0.214339986 : f32
      %459 = vector.broadcast %cst_161 : f32 to vector<8x132xf32>
      %460 = arith.mulf %459, %235 : vector<8x132xf32>
      %461 = arith.addf %458, %460 : vector<8x132xf32>
      %cst_162 = arith.constant -2.941490e-01 : f32
      %462 = vector.broadcast %cst_162 : f32 to vector<8x132xf32>
      %463 = arith.mulf %462, %236 : vector<8x132xf32>
      %464 = arith.addf %461, %463 : vector<8x132xf32>
      %cst_163 = arith.constant -0.0843508095 : f32
      %465 = vector.broadcast %cst_163 : f32 to vector<8x132xf32>
      %466 = arith.mulf %465, %237 : vector<8x132xf32>
      %467 = arith.addf %464, %466 : vector<8x132xf32>
      %cst_164 = arith.constant 0.13854894 : f32
      %468 = vector.broadcast %cst_164 : f32 to vector<8x132xf32>
      %469 = arith.mulf %468, %238 : vector<8x132xf32>
      %470 = arith.addf %467, %469 : vector<8x132xf32>
      %cst_165 = arith.constant 0.000000e+00 : f32
      %471 = vector.broadcast %cst_165 : f32 to vector<8x132xf32>
      %472 = arith.maximumf %470, %471 : vector<8x132xf32>
      %473 = vector.extract_strided_slice %316 {offsets = [0, 0], sizes = [8, 128], strides = [1, 1]} : vector<8x132xf32> to vector<8x128xf32>
      %474 = vector.extract_strided_slice %316 {offsets = [0, 1], sizes = [8, 128], strides = [1, 1]} : vector<8x132xf32> to vector<8x128xf32>
      %475 = vector.extract_strided_slice %316 {offsets = [0, 2], sizes = [8, 128], strides = [1, 1]} : vector<8x132xf32> to vector<8x128xf32>
      %476 = vector.extract_strided_slice %316 {offsets = [0, 3], sizes = [8, 128], strides = [1, 1]} : vector<8x132xf32> to vector<8x128xf32>
      %477 = vector.extract_strided_slice %316 {offsets = [0, 4], sizes = [8, 128], strides = [1, 1]} : vector<8x132xf32> to vector<8x128xf32>
      %478 = vector.extract_strided_slice %394 {offsets = [0, 0], sizes = [8, 128], strides = [1, 1]} : vector<8x132xf32> to vector<8x128xf32>
      %479 = vector.extract_strided_slice %394 {offsets = [0, 1], sizes = [8, 128], strides = [1, 1]} : vector<8x132xf32> to vector<8x128xf32>
      %480 = vector.extract_strided_slice %394 {offsets = [0, 2], sizes = [8, 128], strides = [1, 1]} : vector<8x132xf32> to vector<8x128xf32>
      %481 = vector.extract_strided_slice %394 {offsets = [0, 3], sizes = [8, 128], strides = [1, 1]} : vector<8x132xf32> to vector<8x128xf32>
      %482 = vector.extract_strided_slice %394 {offsets = [0, 4], sizes = [8, 128], strides = [1, 1]} : vector<8x132xf32> to vector<8x128xf32>
      %483 = vector.extract_strided_slice %472 {offsets = [0, 0], sizes = [8, 128], strides = [1, 1]} : vector<8x132xf32> to vector<8x128xf32>
      %484 = vector.extract_strided_slice %472 {offsets = [0, 1], sizes = [8, 128], strides = [1, 1]} : vector<8x132xf32> to vector<8x128xf32>
      %485 = vector.extract_strided_slice %472 {offsets = [0, 2], sizes = [8, 128], strides = [1, 1]} : vector<8x132xf32> to vector<8x128xf32>
      %486 = vector.extract_strided_slice %472 {offsets = [0, 3], sizes = [8, 128], strides = [1, 1]} : vector<8x132xf32> to vector<8x128xf32>
      %487 = vector.extract_strided_slice %472 {offsets = [0, 4], sizes = [8, 128], strides = [1, 1]} : vector<8x132xf32> to vector<8x128xf32>
      %cst_166 = arith.constant 0.029995054 : f32
      %488 = vector.broadcast %cst_166 : f32 to vector<8x128xf32>
      %cst_167 = arith.constant 0.220802486 : f32
      %489 = vector.broadcast %cst_167 : f32 to vector<8x128xf32>
      %490 = arith.mulf %489, %473 : vector<8x128xf32>
      %491 = arith.addf %488, %490 : vector<8x128xf32>
      %cst_168 = arith.constant 0.0579529144 : f32
      %492 = vector.broadcast %cst_168 : f32 to vector<8x128xf32>
      %493 = arith.mulf %492, %474 : vector<8x128xf32>
      %494 = arith.addf %491, %493 : vector<8x128xf32>
      %cst_169 = arith.constant 0.0181196649 : f32
      %495 = vector.broadcast %cst_169 : f32 to vector<8x128xf32>
      %496 = arith.mulf %495, %475 : vector<8x128xf32>
      %497 = arith.addf %494, %496 : vector<8x128xf32>
      %cst_170 = arith.constant 0.0457201898 : f32
      %498 = vector.broadcast %cst_170 : f32 to vector<8x128xf32>
      %499 = arith.mulf %498, %476 : vector<8x128xf32>
      %500 = arith.addf %497, %499 : vector<8x128xf32>
      %cst_171 = arith.constant 0.117019527 : f32
      %501 = vector.broadcast %cst_171 : f32 to vector<8x128xf32>
      %502 = arith.mulf %501, %477 : vector<8x128xf32>
      %503 = arith.addf %500, %502 : vector<8x128xf32>
      %cst_172 = arith.constant -0.0956279933 : f32
      %504 = vector.broadcast %cst_172 : f32 to vector<8x128xf32>
      %505 = arith.mulf %504, %478 : vector<8x128xf32>
      %506 = arith.addf %503, %505 : vector<8x128xf32>
      %cst_173 = arith.constant -0.0517556854 : f32
      %507 = vector.broadcast %cst_173 : f32 to vector<8x128xf32>
      %508 = arith.mulf %507, %479 : vector<8x128xf32>
      %509 = arith.addf %506, %508 : vector<8x128xf32>
      %cst_174 = arith.constant -0.147547573 : f32
      %510 = vector.broadcast %cst_174 : f32 to vector<8x128xf32>
      %511 = arith.mulf %510, %480 : vector<8x128xf32>
      %512 = arith.addf %509, %511 : vector<8x128xf32>
      %cst_175 = arith.constant -0.159574226 : f32
      %513 = vector.broadcast %cst_175 : f32 to vector<8x128xf32>
      %514 = arith.mulf %513, %481 : vector<8x128xf32>
      %515 = arith.addf %512, %514 : vector<8x128xf32>
      %cst_176 = arith.constant 0.225968152 : f32
      %516 = vector.broadcast %cst_176 : f32 to vector<8x128xf32>
      %517 = arith.mulf %516, %482 : vector<8x128xf32>
      %518 = arith.addf %515, %517 : vector<8x128xf32>
      %cst_177 = arith.constant 0.121814162 : f32
      %519 = vector.broadcast %cst_177 : f32 to vector<8x128xf32>
      %520 = arith.mulf %519, %483 : vector<8x128xf32>
      %521 = arith.addf %518, %520 : vector<8x128xf32>
      %cst_178 = arith.constant -0.00485179806 : f32
      %522 = vector.broadcast %cst_178 : f32 to vector<8x128xf32>
      %523 = arith.mulf %522, %484 : vector<8x128xf32>
      %524 = arith.addf %521, %523 : vector<8x128xf32>
      %cst_179 = arith.constant -0.138612598 : f32
      %525 = vector.broadcast %cst_179 : f32 to vector<8x128xf32>
      %526 = arith.mulf %525, %485 : vector<8x128xf32>
      %527 = arith.addf %524, %526 : vector<8x128xf32>
      %cst_180 = arith.constant -0.124912374 : f32
      %528 = vector.broadcast %cst_180 : f32 to vector<8x128xf32>
      %529 = arith.mulf %528, %486 : vector<8x128xf32>
      %530 = arith.addf %527, %529 : vector<8x128xf32>
      %cst_181 = arith.constant -0.224746928 : f32
      %531 = vector.broadcast %cst_181 : f32 to vector<8x128xf32>
      %532 = arith.mulf %531, %487 : vector<8x128xf32>
      %533 = arith.addf %530, %532 : vector<8x128xf32>
      %cst_182 = arith.constant 0.000000e+00 : f32
      %534 = vector.broadcast %cst_182 : f32 to vector<8x128xf32>
      %535 = arith.maximumf %533, %534 : vector<8x128xf32>
      %536 = arith.truncf %535 : vector<8x128xf32> to vector<8x128xbf16>
      %c0_183 = arith.constant 0 : index
      %c0_184 = arith.constant 0 : index
      %537 = vector.load %arg7[%c0_183, %c0_184] : memref<8x128xbf16, #tpu.memory_space<vmem>>, vector<8x128xbf16>
      tpu.vector_store %arg7[%c0_183, %c0_184], %536 {strides = array<i32>} : memref<8x128xbf16, #tpu.memory_space<vmem>>, vector<8x128xbf16>,
      %c0_185 = arith.constant 0 : index
      %c0_186 = arith.constant 0 : index
      %538 = vector.load %arg5[%c0_185, %c0_186] : memref<1x1152xf32, #tpu.memory_space<vmem>>, vector<1x1152xf32>
      %539 = vector.shape_cast %538 : vector<1x1152xf32> to vector<1x1152xf32>
      %540 = vector.broadcast %539 : vector<1x1152xf32> to vector<8x1152xf32>
      %c0_187 = arith.constant 0 : index
      %c0_188 = arith.constant 0 : index
      %541 = vector.load %arg6[%c0_187, %c0_188] : memref<8x1152xf32, #tpu.memory_space<vmem>>, vector<8x1152xf32>
      tpu.vector_store %arg6[%c0_187, %c0_188], %540 {strides = array<i32>} : memref<8x1152xf32, #tpu.memory_space<vmem>>, vector<8x1152xf32>,
    } else {
    }
    %c0 = arith.constant 0 : index
    %c0_1 = arith.constant 0 : index
    %3 = vector.load %arg7[%c0, %c0_1] : memref<8x128xbf16, #tpu.memory_space<vmem>>, vector<8x128xbf16>
    %c0_2 = arith.constant 0 : index
    %c0_3 = arith.constant 0 : index
    %4 = vector.load %arg2[%c0_2, %c0_3] : memref<128x384xbf16, #tpu.memory_space<vmem>>, vector<128x384xbf16>
    %cst = arith.constant dense<0.000000e+00> : vector<8x384xf32>
    %5 = tpu.matmul %3, %4, %cst {dimension_numbers = #tpu.dot_dimension_numbers<[1], [0], [0], [1], [0, 0, 1, 1], [], []>} : vector<8x128xbf16>, vector<128x384xbf16>, vector<8x384xf32> -> vector<8x384xf32>
    %c0_4 = arith.constant 0 : index
    %c0_5 = arith.constant 0 : index
    %6 = vector.load %arg3[%c0_4, %c0_5] : memref<1x384xf32, #tpu.memory_space<vmem>>, vector<1x384xf32>
    %7 = vector.broadcast %6 : vector<1x384xf32> to vector<8x384xf32>
    %8 = arith.addf %5, %7 : vector<8x384xf32>
    %c0_6 = arith.constant 0 : index
    %c0_7 = arith.constant 0 : index
    %9 = vector.load %arg6[%c0_6, %c0_7] : memref<8x1152xf32, #tpu.memory_space<vmem>>, vector<8x1152xf32>
    %10 = arith.truncf %8 : vector<8x384xf32> to vector<8x384xbf16>
    %c0_8 = arith.constant 0 : index
    %c0_9 = arith.constant 0 : index
    %11 = vector.load %arg4[%c0_8, %c0_9] : memref<384x1152xbf16, #tpu.memory_space<vmem>>, vector<384x1152xbf16>
    %cst_10 = arith.constant dense<0.000000e+00> : vector<8x1152xf32>
    %12 = tpu.matmul %10, %11, %cst_10 {dimension_numbers = #tpu.dot_dimension_numbers<[1], [0], [0], [1], [0, 0, 1, 1], [], []>} : vector<8x384xbf16>, vector<384x1152xbf16>, vector<8x1152xf32> -> vector<8x1152xf32>
    %13 = arith.addf %9, %12 : vector<8x1152xf32>
    %c0_11 = arith.constant 0 : index
    %c0_12 = arith.constant 0 : index
    %14 = vector.load %arg6[%c0_11, %c0_12] : memref<8x1152xf32, #tpu.memory_space<vmem>>, vector<8x1152xf32>
    tpu.vector_store %arg6[%c0_11, %c0_12], %13 {strides = array<i32>} : memref<8x1152xf32, #tpu.memory_space<vmem>>, vector<8x1152xf32>,
    return
  }
  func.func @transform_0(%arg0: i32) -> (i32, i32) {
    %c0_i32 = arith.constant 0 : i32
    %c0_i32_0 = arith.constant 0 : i32
    %c0_i32_1 = arith.constant 0 : i32
    return %c0_i32, %c0_i32_0 : i32, i32
  }
  func.func @transform_1(%arg0: i32) -> (i32, i32) {
    %c0_i32 = arith.constant 0 : i32
    %c0_i32_0 = arith.constant 0 : i32
    return %c0_i32, %arg0 : i32, i32
  }
  func.func @transform_2(%arg0: i32) -> (i32, i32) {
    %c0_i32 = arith.constant 0 : i32
    %c0_i32_0 = arith.constant 0 : i32
    return %c0_i32, %arg0 : i32, i32
  }
  func.func @transform_3(%arg0: i32) -> (i32, i32) {
    %c0_i32 = arith.constant 0 : i32
    %c0_i32_0 = arith.constant 0 : i32
    return %arg0, %c0_i32 : i32, i32
  }
  func.func @transform_4(%arg0: i32) -> (i32, i32) {
    %c0_i32 = arith.constant 0 : i32
    %c0_i32_0 = arith.constant 0 : i32
    %c0_i32_1 = arith.constant 0 : i32
    return %c0_i32, %c0_i32_0 : i32, i32
  }
  func.func @transform_5(%arg0: i32) -> (i32, i32) {
    %c0_i32 = arith.constant 0 : i32
    %c0_i32_0 = arith.constant 0 : i32
    %c0_i32_1 = arith.constant 0 : i32
    return %c0_i32, %c0_i32_0 : i32, i32
  }
}

</mosaic_0001>

<bundles_post_ra>
// kernel: tpu_custom_call.1
= control target key start
LH: loop header
LB: loop body
LE: loop exit
PB: predicated region body
PF: predicated region fallthrough
CT: control target
= control target key end

     0   :  { %s7097_s0 = inlined_call_operand.hbm [shape: f32[8,140], index: 0, kind: input, shape index: {}]   ;;  %s7098_s1 = inlined_call_operand.hbm [shape: bf16[128,1152], index: 1, kind: input, shape index: {}]   ;;  %s7099_s2 = inlined_call_operand.hbm [shape: f32[1,1152], index: 2, kind: input, shape index: {}]   ;;  %s7100_s3 = inlined_call_operand.hbm [shape: bf16[1152,1152], index: 3, kind: input, shape index: {}]   ;;  %s7101_s4 = inlined_call_operand.hbm [shape: f32[1,1152], index: 4, kind: input, shape index: {}]   ;;  %s7102_s5 = inlined_call_operand.hbm [shape: f32[8,1152], index: 5, kind: output, shape index: {}]  }
   0x1   :  { %7104 = sst [smem:[#allocation19_spill]] %s7098_s1 }
   0x2   :  { %7105 = sst [smem:[#allocation20_spill]] %s7101_s4 }
   0x3   :  { %10 = vsyncpa [#allocation4], 0 }
   0x4   :  { %11 = vsyncpa [#allocation7], 0 }
   0x5   :  { %13 = vsyncpa [#allocation7 + $0x1], 0 }
   0x6   :  { %14 = vsyncpa [#allocation10], 0 }
   0x7   :  { %16 = vsyncpa [#allocation10 + $0x1], 0 }
   0x8   :  { %17 = vsyncpa [#allocation5], 0  ;;  %s5565_s18 = smov 0   ;;  %s5567_s19 = smov 0  }
   0x9   :  { %s5569_s20 = smov 0   ;;  %s5571_s21 = smov 0  }
   0xa LB: > { %s5584_s22 = sadd.s32 4294967295, %s5522_s21   ;;  %s5587_s23 = sadd.s32 1, %s5522_s21   ;;  %s5522_s21 = sphi %s5571_s21, %s7119_s21   ;;  %s5518_s20 = sphi %s5569_s20, %s7118_s20   ;;  %s5514_s19 = sphi %s5567_s19, %s7117_s19   ;;  %s5510_s18 = sphi %s5565_s18, %s7116_s18  }
   0xb   : > { %s48_s24 = ssub.s32 %s5522_s21, %s5587_s23  ;;  %s51_s25 = sadd.s32 1, %s5518_s20 }
   0xc   : > { %p49_p0 = scmp.eq.s32.totalorder %s48_s24, 0  ;;  %p58_p1 = scmp.ne.s32.totalorder %s5518_s20, %s5514_s19 }
   0xd   : > { %p59_p2 = scmp.eq.s32.totalorder %s5522_s21, 0  ;;  %p64_p3 = scmp.ne.s32.totalorder %s5514_s19, %s5510_s18 }
   0xe   : > { %s5597_s26 = scalar_select %p49_p0, %s5518_s20, %s51_s25  }
   0xf   : > { %p5599_p4 = por %p59_p2, %p58_p1  ;;  %p65_p5 = scmp.eq.s32.totalorder %s5584_s22, 0 }
  0x10   : > { %7106 = sst [smem:[#allocation18_spill]] %s5597_s26  ;;  %p3985_p6 = scmp.ge.s32.totalorder %s5522_s21, 1 }
  0x11   : > { %p169_p7 = scmp.lt.s32.totalorder %s5522_s21, 4  ;;  %p5608_p8 = por %p65_p5, %p64_p3 }
  0x12   : > { %p3986_p9 = scmp.ne.s32.totalorder %s5584_s22, 0  ;;  %s7110_s4 = sld [smem:[#allocation20_spill]] }
  0x13   : > { %p5613_p10 = pnand %p3985_p6, %p169_p7  ;;  %s5524_s8 = smov [#allocation11]  }
  0x14   : > { %s195_s9 = sshll.u32 %s5524_s8, 4  ;;  %p5244_p13 = scmp.lt.s32.totalorder %s5522_s21, 3  ;;  %s196_s9 = int_to_ptr.vmem [resolvable:$true] %s195_s9 }
  0x15   : > { %p5225_p11 = pneg %p5613_p10  ;;  %s7103_s11 = sand.u32 1, %s5522_s21  }
  0x16   : > { %p5632_p0 = pnand %p5244_p13, %p5599_p4  ;;  %s5639_s13 = sand.u32 1, %s5518_s20  }
  0x17   : > { %p5624_p12 = pnand %p5225_p11, %p65_p5  ;;  %s4959_s14 = smul.u32 12, %s5522_s21 }
  0x18   : > { %s193_s7 = sshll.u32 %s7110_s4, 4  ;;  %s5200_s15 = smul.u32 192, %s5639_s13  ;;  %s194_s7 = int_to_ptr.hbm [resolvable:$true] %s193_s7 }
  0x19   : > { %5231 = dma.hbm_to_vmem [thread:$0]  (!%p5624_p12), %s194_s7, 144, %s196_s9, [#allocation10]  }
  0x1a   : > { %s7113_s1 = sld [smem:[#allocation19_spill]]  ;;  %s210_s25 = scalar_lea.vmem [#allocation6], %s5200_s15 }
  0x1b   : > { %s218_s27 = sshll.u32 %s210_s25, 4  ;;  %s5648_s30 = scalar_lea.sflag [#allocation7], %s7103_s11  ;;  %s219_s27 = int_to_ptr.vmem [resolvable:$true] %s218_s27 }
  0x1c   : > { %p5328_p2 = pneg %p5632_p0 }
  0x20   : > { %s215_s18 = scalar_lea.hbm %s7113_s1, %s4959_s14  ;;  %s5331_s14 = scalar_lea.hbm %s7113_s1, 576 }
  0x21   : > { %s216_s24 = sshll.u32 %s215_s18, 4  ;;  %s217_s24 = int_to_ptr.hbm [resolvable:$true] %s216_s24 }
  0x22   : > { %s5324_s6 = sshra.s32 %s217_s24, 4  ;;  %s5325_s6 = int_to_ptr.hbm [resolvable:$true] %s5324_s6 }
  0x23   : > { %s5326_s7 = scalar_lea.hbm %s5325_s6, 192  ;;  %p5332_p6 = scmp.lt.s32.totalorder %s5325_s6, %s7113_s1 }
  0x24   : > { %p5327_p1 = scmp.ne.s32.totalorder %s5325_s6, %s5326_s7  ;;  %p5333_p7 = scmp.lt.s32.totalorder %s5331_s14, %s5326_s7 }
  0x26   : > { %p5329_p3 = pnand %p5328_p2, %p5327_p1  ;;  %p5334_p11 = por %p5333_p7, %p5332_p6 }
  0x28   : > { %p5330_p4 = pneg %p5329_p3 }
  0x2a   : > { %p5335_p13 = pnand %p5334_p11, %p5330_p4 }
  0x2c   : > { %5338 = shalt.err (!%p5335_p13)
}
  0x2d   : > { %s5525_s17 = smov 576   ;;  %s5526_s18 = smov 192  }
  0x2e   : > { %s5527_s25 = smov 12   ;;  %s181_s6 = sshll.u32 %s7097_s0, 4  ;;  %s182_s6 = int_to_ptr.hbm [resolvable:$true] %s181_s6 }
  0x2f   : > { %5235 = dma.hbm_to_vmem [thread:$0]  (!%p5632_p0), %s217_s24, 3072, %s219_s27, %s5648_s30, %s5525_s17, %s5526_s18, %s5527_s25  }
  0x30   : > { %s5528_s7 = smov [#allocation3]   ;;  %s5201_s15 = smul.u32 3, %s5639_s13 }
  0x31   : > { %s183_s14 = sshll.u32 %s5528_s7, 4  ;;  %s233_s16 = smul.u32 3, %s5522_s21  ;;  %s184_s14 = int_to_ptr.vmem [resolvable:$true] %s183_s14 }
  0x32   : > { %5228 = dma.hbm_to_vmem [thread:$0]  (!%p5624_p12), %s182_s6, 256, %s184_s14, [#allocation4]  }
  0x33   : > { %s232_s11 = scalar_lea.vmem [#allocation8], %s5201_s15  ;;  %s236_s24 = scalar_lea.hbm %s7099_s2, %s233_s16 }
  0x34   : > { %s240_s1 = sshll.u32 %s232_s11, 4  ;;  %s238_s27 = sshll.u32 %s236_s24, 4  ;;  %s241_s1 = int_to_ptr.vmem [resolvable:$true] %s240_s1  ;;  %s239_s27 = int_to_ptr.hbm [resolvable:$true] %s238_s27 }
  0x35   : > { %s5202_s18 = smul.u32 1728, %s5639_s13  ;;  %s5384_s8 = sshra.s32 %s239_s27, 4  ;;  %s5385_s8 = int_to_ptr.hbm [resolvable:$true] %s5384_s8 }
  0x36   : > { %s5245_s25 = smul.u32 1728, %s5522_s21  ;;  %s5386_s9 = scalar_lea.hbm %s5385_s8, 3 }
  0x37   : > { %p5387_p1 = scmp.ne.s32.totalorder %s5385_s8, %s5386_s9  ;;  %s5391_s11 = scalar_lea.hbm %s7099_s2, 9 }
  0x38   : > { %p5392_p4 = scmp.lt.s32.totalorder %s5385_s8, %s7099_s2  ;;  %p5393_p6 = scmp.lt.s32.totalorder %s5391_s11, %s5386_s9 }
  0x39   : > { %p5389_p3 = pnand %p5387_p1, %p5328_p2 }
  0x3a   : > { %p5394_p7 = por %p5393_p6, %p5392_p4 }
  0x3b   : > { %p5390_p12 = pneg %p5389_p3 }
  0x3d   : > { %p5395_p11 = pnand %p5394_p7, %p5390_p12 }
  0x3f   : > { %5398 = shalt.err (!%p5395_p11)
}
  0x40   : > { %5238 = dma.hbm_to_vmem [thread:$0]  (!%p5632_p0), %s239_s27, 48, %s241_s1, %s5648_s30  }
  0x41   : > { %s257_s14 = scalar_lea.hbm %s7100_s3, %s5245_s25  ;;  %s251_s16 = scalar_lea.vmem [#allocation9], %s5202_s18 }
  0x42   : > { %s258_s15 = sshll.u32 %s257_s14, 4  ;;  %s260_s24 = sshll.u32 %s251_s16, 4  ;;  %s259_s15 = int_to_ptr.hbm [resolvable:$true] %s258_s15  ;;  %s261_s24 = int_to_ptr.vmem [resolvable:$true] %s260_s24 }
  0x43   : > { %s7114_s8 = sand.u32 1, %s5522_s21   ;;  %s5414_s10 = sshra.s32 %s259_s15, 4  ;;  %s5415_s10 = int_to_ptr.hbm [resolvable:$true] %s5414_s10 }
  0x44   : > { %s248_s9 = scalar_lea.sflag [#allocation10], %s7114_s8  ;;  %s5416_s6 = scalar_lea.hbm %s5415_s10, 1728 }
  0x45   : > { %p5417_p13 = scmp.ne.s32.totalorder %s5415_s10, %s5416_s6  ;;  %s5421_s27 = scalar_lea.hbm %s7100_s3, 5184 }
  0x46   : > { %p5422_p12 = scmp.lt.s32.totalorder %s5415_s10, %s7100_s3  ;;  %p5423_p4 = scmp.lt.s32.totalorder %s5421_s27, %s5416_s6 }
  0x47   : > { %p5419_p1 = pnand %p5417_p13, %p5328_p2 }
  0x48   : > { %p5424_p6 = por %p5423_p4, %p5422_p12 }
  0x49   : > { %p5420_p3 = pneg %p5419_p1 }
  0x4b   : > { %p5425_p7 = pnand %p5424_p6, %p5420_p3 }
  0x4d   : > { %5428 = shalt.err (!%p5425_p7)
}
  0x4e   : > { %s5529_s21 = smov 36   ;;  %272 = sbr.rel (%p5613_p10) target bundleno = 1497 (0x5d9), region = 40 }
  0x4f   : > { %5241 = dma.hbm_to_vmem [thread:$0]  (!%p5632_p0), %s259_s15, 27648, %s261_s24, %s248_s9, %s5525_s17, %s5525_s17, %s5529_s21  }
  0x53   : > { %5489 = dma.done.wait (%p65_p5), [#allocation4], 256  }
  0x54   : > { %5491 = vsyncadd (%p65_p5), [#allocation4], 4294967040  ;;  %s279_s18 = sand.u32 1, %s5584_s22   ;;  %s281_s7 = sand.u32 1, %s5514_s19  }
  0x55   : > { %s5204_s4 = smul.u32 192, %s281_s7  ;;  %s280_s26 = scalar_lea.sflag [#allocation7], %s279_s18 }
  0x57   : > { %s5715_s12 = scalar_lea.vmem [#allocation6], %s5204_s4 }
  0x58   : > { %5493 = dma.done.wait (%p5608_p8), %s280_s26, 3120  }
  0x59   : > { %5495 = vsyncadd (%p5608_p8), %s280_s26, 4294964176  ;;  %s5205_s29 = smul.u32 3, %s281_s7  ;;  %s300_s14 = scalar_lea.sflag [#allocation10], %s279_s18 }
  0x5a   : > { %s5206_s17 = smul.u32 1728, %s281_s7 }
  0x5b   : > { %s5721_s13 = scalar_lea.vmem [#allocation8], %s5205_s29 }
  0x5c   : > { %s5723_s15 = scalar_lea.vmem [#allocation9], %s5206_s17 }
  0x5d   : > { %5497 = dma.done.wait (%p5608_p8), %s300_s14, 27648  }
  0x5e   : > { %5499 = vsyncadd (%p5608_p8), %s300_s14, 4294939648 }
  0x5f   : > { %5501 = dma.done.wait (%p65_p5), [#allocation10], 144  }
  0x60   : > { %5503 = vsyncadd (%p65_p5), [#allocation10], 4294967152  ;;  %347 = sbr.rel (%p3986_p9) target bundleno = 1028 (0x404), region = 64  ;;  %s5530_s16 = smov (!%p3986_p9), 126  }
  0x61   : > { %s5531_s28 = smov (!%p3986_p9), 127   ;;  %s5532_s24 = smov (!%p3986_p9), 124  }
  0x62   : > { %s5533_s8 = smov (!%p3986_p9), 125  }
  0x65   : > { %v5735_v0 = vld [vmem:[#allocation3] sm:$0xff]  ;;  %v349_v4 = vld [vmem:[#allocation3 + $0x8] sm:$0xff]  ;;  %vm362_vm0 = vcmask 1039360   ;;  %vm376_vm1 = vcmask 1031168   ;;  %vm960_vm2 = vcmask 1014784   ;;  %vm946_vm3 = vcmask 1022976  }
  0x66   : > { %v368_v1 = vmul.f32 0.11118964, %v5735_v0  ;;  %v354_v2 = vmul.f32 0.2328342, %v5735_v0  ;;  %v388_v3 = vmul.f32 -0.1281668, %v5735_v0 }
  0x67   : > { %v369_v5 = vmul.f32 0.11118964, %v349_v4  ;;  %v355_v6 = vmul.f32 0.2328342, %v349_v4  ;;  %v389_v7 = vmul.f32 -0.1281668, %v349_v4 }
  0x68   : > { %372 = vrot.lane.b32.xlu1 %v368_v1, %s5530_s16  ;;  %358 = vrot.lane.b32.xlu0 %v354_v2, %s5531_s28  ;;  %v402_v8 = vmul.f32 0.24492411, %v349_v4  ;;  %v401_v9 = vmul.f32 0.24492411, %v5735_v0  ;;  %v420_v10 = vmul.f32 0.22828163, %v5735_v0 }
  0x69   : > { %392 = vrot.lane.b32.xlu2 %v388_v3, %s5531_s28  ;;  %v421_v11 = vmul.f32 0.22828163, %v349_v4  ;;  %v433_v12 = vmul.f32 0.27017096, %v5735_v0  ;;  %v434_v13 = vmul.f32 0.27017096, %v349_v4 }
  0x6a   : > { %v351_v17 = vmul.f32 0.052816056, %v349_v4  ;;  %v385_v20 = vmul.f32 0.075348996, %v349_v4  ;;  %v417_v34 = vmul.f32 -0.036367215, %v349_v4 }
  0x6b   : > { %v384_v50 = vmul.f32 0.075348996, %v5735_v0  ;;  %v350_v56 = vmul.f32 0.052816056, %v5735_v0  ;;  %v416_v57 = vmul.f32 -0.036367215, %v5735_v0 }
  0x6c   : > { %v353_v18 = vadd.f32 -0.26081866, %v351_v17  ;;  %v387_v24 = vadd.f32 0.28619617, %v385_v20  ;;  %v419_v37 = vadd.f32 0.035056338, %v417_v34 }
  0x6d   : > { %v386_v54 = vadd.f32 0.28619617, %v384_v50  ;;  %v352_v60 = vadd.f32 -0.26081866, %v350_v56  ;;  %v418_v62 = vadd.f32 0.035056338, %v416_v57 }
  0x70   : > { %374 = vrot.lane.b32.xlu1 %v369_v5, %s5530_s16  ;;  %360 = vrot.lane.b32.xlu0 %v355_v6, %s5531_s28 }
  0x71   : > { %394 = vrot.lane.b32.xlu2 %v389_v7, %s5531_s28 }
  0x78   : > { %407 = vrot.lane.b32.xlu1 %v402_v8, %s5530_s16  ;;  %405 = vrot.lane.b32.xlu0 %v401_v9, %s5530_s16 }
  0x79   : > { %424 = vrot.lane.b32.xlu2 %v420_v10, %s5531_s28 }
  0x80   : > { %426 = vrot.lane.b32.xlu0 %v421_v11, %s5531_s28  ;;  %437 = vrot.lane.b32.xlu1 %v433_v12, %s5530_s16 }
  0x81   : > { %439 = vrot.lane.b32.xlu2 %v434_v13, %s5530_s16 }
  0xc3   : > { %v393_v14 = vpop.permute.xlu2 %392 }
  0xcb   : > { %v395_v19 = vpop.permute.xlu2 %394 }
  0xcc   : > { %v400_v28 = vadd.f32 %v395_v19, %v387_v24  ;;  %v396_v55 = vsel %vm362_vm0, %v393_v14, %v395_v19 }
  0xcd   : > { %v399_v59 = vadd.f32 %v396_v55, %v386_v54 }
  0xd3   : > { %v425_v27 = vpop.permute.xlu2 %424 }
  0xda   : > { %v5755_v15 = vpop.permute.xlu1 %372  ;;  %v5757_v16 = vpop.permute.xlu0 %358 }
  0xdb   : > { %v440_v40 = vpop.permute.xlu2 %439 }
  0xe2   : > { %v5759_v21 = vpop.permute.xlu1 %374  ;;  %v361_v22 = vpop.permute.xlu0 %360 }
  0xe3   : > { %v367_v23 = vadd.f32 %v361_v22, %v353_v18  ;;  %v363_v2 = vsel %vm362_vm0, %v5757_v16, %v361_v22  ;;  %v377_v8 = vsel %vm376_vm1, %v5755_v15, %v5759_v21 }
  0xe4   : > { %v366_v0 = vadd.f32 %v363_v2, %v352_v60 }
  0xe5   : > { %v381_v25 = vadd.f32 %v5759_v21, %v367_v23 }
  0xe6   : > { %v380_v10 = vadd.f32 %v377_v8, %v366_v0 }
  0xe7   : > { %v5762_v26 = vmax.f32 %v381_v25, 0.0 }
  0xe8   : > { %v5820_v16 = vmax.f32 %v380_v10, 0.0 }
  0xe9   : > { %v466_v29 = vmul.f32 -0.24646087, %v5762_v26  ;;  %v453_v30 = vmul.f32 0.09669249, %v5762_v26  ;;  %v545_v44 = vmul.f32 -0.1911848, %v5762_v26 }
  0xea   : > { %v408_v31 = vpop.permute.xlu1 %407  ;;  %v406_v32 = vpop.permute.xlu0 %405  ;;  %v558_v49 = vmul.f32 0.04673658, %v5762_v26  ;;  %v637_v51 = vmul.f32 -0.21241239, %v5762_v26  ;;  %v650_v4 = vmul.f32 0.08054881, %v5762_v26 }
  0xeb   : > { %v413_v33 = vadd.f32 %v408_v31, %v400_v28  ;;  %471 = vrot.lane.b32.xlu0 %v466_v29, %s5530_s16  ;;  %458 = vrot.lane.b32.xlu1 %v453_v30, %s5531_s28  ;;  %v409_v58 = vsel %vm376_vm1, %v406_v32, %v408_v31  ;;  %v465_v18 = vmul.f32 -0.24646087, %v5820_v16  ;;  %v452_v19 = vmul.f32 0.09669249, %v5820_v16 }
  0xec   : > { %v412_v61 = vadd.f32 %v409_v58, %v399_v59  ;;  %v557_v24 = vmul.f32 0.04673658, %v5820_v16  ;;  %v544_v25 = vmul.f32 -0.1911848, %v5820_v16  ;;  %v649_v31 = vmul.f32 0.08054881, %v5820_v16 }
  0xed   : > { %v5768_v35 = vmax.f32 %v413_v33, 0.0  ;;  %v636_v32 = vmul.f32 -0.21241239, %v5820_v16  ;;  %v729_v33 = vmul.f32 0.25403762, %v5762_v26 }
  0xee   : > { %v5808_v6 = vmax.f32 %v412_v61, 0.0  ;;  %v820_v10 = vmul.f32 -0.18750721, %v5820_v16 }
  0xef   : > { %v483_v36 = vmul.f32 0.015098292, %v5768_v35  ;;  %v496_v38 = vmul.f32 -0.058972906, %v5768_v35  ;;  %v588_v47 = vmul.f32 0.17630109, %v5768_v35 }
  0xf0   : > { %v575_v48 = vmul.f32 0.04645787, %v5768_v35  ;;  %v680_v63 = vmul.f32 -0.17922968, %v5768_v35  ;;  %v667_v1 = vmul.f32 -0.13988607, %v5768_v35 }
  0xf1   : > { %488 = vrot.lane.b32.xlu2 %v483_v36, %s5531_s28  ;;  %v482_v12 = vmul.f32 0.015098292, %v5808_v6  ;;  %v574_v20 = vmul.f32 0.04645787, %v5808_v6  ;;  %v495_v22 = vmul.f32 -0.058972906, %v5808_v6 }
  0xf2   : > { %v427_v39 = vpop.permute.xlu0 %426  ;;  %v438_v5 = vpop.permute.xlu1 %437  ;;  %v587_v29 = vmul.f32 0.17630109, %v5808_v6  ;;  %v679_v36 = vmul.f32 -0.17922968, %v5808_v6  ;;  %v771_v57 = vmul.f32 0.079642415, %v5808_v6 }
  0xf3   : > { %v432_v41 = vadd.f32 %v427_v39, %v419_v37  ;;  %501 = vrot.lane.b32.xlu1 %v496_v38, %s5530_s16  ;;  %v428_v3 = vsel %vm362_vm0, %v425_v27, %v427_v39  ;;  %v441_v9 = vsel %vm376_vm1, %v438_v5, %v440_v40  ;;  %v666_v27 = vmul.f32 -0.13988607, %v5808_v6 }
  0xf4   : > { %v431_v7 = vadd.f32 %v428_v3, %v418_v62  ;;  %v758_v38 = vmul.f32 -0.17617676, %v5808_v6  ;;  %v741_v39 = vmul.f32 -0.2070045, %v5820_v16  ;;  %v850_v8 = vmul.f32 -0.14601992, %v5808_v6 }
  0xf5   : > { %v445_v42 = vadd.f32 %v440_v40, %v432_v41  ;;  %v728_v40 = vmul.f32 0.25403762, %v5820_v16 }
  0xf6   : > { %v444_v11 = vadd.f32 %v441_v9, %v431_v7  ;;  %v541_v7 = vmul.f32 0.027188806, %v5762_v26  ;;  %v833_v9 = vmul.f32 0.07523371, %v5820_v16 }
  0xf7   : > { %v5774_v43 = vmax.f32 %v445_v42, 0.0  ;;  %v449_v42 = vmul.f32 -0.26379165, %v5762_v26 }
  0xf8   : > { %v5822_v17 = vmax.f32 %v444_v11, 0.0  ;;  %v543_v11 = vadd.f32 0.18085718, %v541_v7 }
  0xf9   : > { %v526_v45 = vmul.f32 -0.030302333, %v5774_v43  ;;  %v513_v46 = vmul.f32 0.18950932, %v5774_v43  ;;  %v618_v52 = vmul.f32 -0.025017204, %v5774_v43 }
  0xfa   : > { %v605_v53 = vmul.f32 -0.055817503, %v5774_v43  ;;  %v710_v13 = vmul.f32 0.03390524, %v5774_v43  ;;  %v697_v14 = vmul.f32 -0.06582809, %v5774_v43 }
  0xfb   : > { %550 = vrot.lane.b32.xlu1 %v545_v44, %s5531_s28  ;;  %531 = vrot.lane.b32.xlu2 %v526_v45, %s5530_s16  ;;  %v525_v15 = vmul.f32 -0.030302333, %v5822_v17  ;;  %v512_v21 = vmul.f32 0.18950932, %v5822_v17  ;;  %v617_v23 = vmul.f32 -0.025017204, %v5822_v17 }
  0xfc   : > { %518 = vrot.lane.b32.xlu0 %v513_v46, %s5531_s28  ;;  %v604_v28 = vmul.f32 -0.055817503, %v5822_v17  ;;  %v709_v30 = vmul.f32 0.03390524, %v5822_v17  ;;  %v696_v34 = vmul.f32 -0.06582809, %v5822_v17 }
  0xfd   : > { %v772_v44 = vmul.f32 0.079642415, %v5768_v35  ;;  %v759_v45 = vmul.f32 -0.17617676, %v5768_v35  ;;  %v742_v46 = vmul.f32 -0.2070045, %v5762_v26 }
  0xfe   : > { %v801_v54 = vmul.f32 -0.13294223, %v5822_v17  ;;  %v788_v55 = vmul.f32 -0.017524138, %v5822_v17  ;;  %v509_v62 = vmul.f32 -0.16270396, %v5774_v43 }
  0xff   : > { %v802_v2 = vmul.f32 -0.13294223, %v5774_v43  ;;  %v789_v3 = vmul.f32 -0.017524138, %v5774_v43 }
 0x103   : > { %593 = vrot.lane.b32.xlu1 %v588_v47, %s5530_s16  ;;  %580 = vrot.lane.b32.xlu2 %v575_v48, %s5531_s28  ;;  %v451_v47 = vadd.f32 -0.36917835, %v449_v42 }
 0x104   : > { %563 = vrot.lane.b32.xlu0 %v558_v49, %s5530_s16 }
 0x10b   : > { %642 = vrot.lane.b32.xlu1 %v637_v51, %s5531_s28  ;;  %623 = vrot.lane.b32.xlu2 %v618_v52, %s5530_s16  ;;  %v479_v52 = vmul.f32 0.30728865, %v5768_v35 }
 0x10c   : > { %610 = vrot.lane.b32.xlu0 %v605_v53, %s5531_s28 }
 0x113   : > { %685 = vrot.lane.b32.xlu1 %v680_v63, %s5530_s16  ;;  %672 = vrot.lane.b32.xlu2 %v667_v1, %s5531_s28  ;;  %v821_v1 = vmul.f32 -0.18750721, %v5762_v26 }
 0x114   : > { %655 = vrot.lane.b32.xlu0 %v650_v4, %s5530_s16 }
 0x11b   : > { %486 = vrot.lane.b32.xlu1 %v482_v12, %s5531_s28  ;;  %715 = vrot.lane.b32.xlu2 %v710_v13, %s5530_s16 }
 0x11c   : > { %702 = vrot.lane.b32.xlu0 %v697_v14, %s5531_s28 }
 0x123   : > { %529 = vrot.lane.b32.xlu1 %v525_v15, %s5530_s16  ;;  %469 = vrot.lane.b32.xlu2 %v465_v18, %s5530_s16  ;;  %v571_v18 = vmul.f32 0.044535626, %v5768_v35 }
 0x124   : > { %456 = vrot.lane.b32.xlu0 %v452_v19, %s5531_s28 }
 0x12b   : > { %578 = vrot.lane.b32.xlu1 %v574_v20, %s5531_s28  ;;  %516 = vrot.lane.b32.xlu2 %v512_v21, %s5531_s28  ;;  %v864_v21 = vmul.f32 -0.06317609, %v5768_v35 }
 0x12c   : > { %499 = vrot.lane.b32.xlu0 %v495_v22, %s5530_s16  ;;  %v851_v22 = vmul.f32 -0.14601992, %v5768_v35 }
 0x133   : > { %621 = vrot.lane.b32.xlu1 %v617_v23, %s5530_s16  ;;  %561 = vrot.lane.b32.xlu2 %v557_v24, %s5530_s16  ;;  %v834_v23 = vmul.f32 0.07523371, %v5762_v26 }
 0x134   : > { %548 = vrot.lane.b32.xlu0 %v544_v25, %s5531_s28 }
 0x13b   : > { %670 = vrot.lane.b32.xlu1 %v666_v27, %s5531_s28  ;;  %608 = vrot.lane.b32.xlu2 %v604_v28, %s5531_s28 }
 0x13c   : > { %591 = vrot.lane.b32.xlu0 %v587_v29, %s5530_s16  ;;  %v601_v29 = vmul.f32 0.0722372, %v5774_v43 }
 0x143   : > { %713 = vrot.lane.b32.xlu1 %v709_v30, %s5530_s16  ;;  %653 = vrot.lane.b32.xlu2 %v649_v31, %s5530_s16 }
 0x144   : > { %640 = vrot.lane.b32.xlu0 %v636_v32, %s5531_s28  ;;  %v633_v32 = vmul.f32 0.095456444, %v5762_v26 }
 0x14b   : > { %734 = vrot.lane.b32.xlu1 %v729_v33, %s5531_s28  ;;  %700 = vrot.lane.b32.xlu2 %v696_v34, %s5531_s28  ;;  %v5860_v37 = vpop.permute.xlu2 %488 }
 0x14c   : > { %683 = vrot.lane.b32.xlu0 %v679_v36, %s5530_s16  ;;  %v893_v36 = vmul.f32 0.16263619, %v5822_v17 }
 0x153   : > { %762 = vrot.lane.b32.xlu1 %v758_v38, %s5531_s28  ;;  %745 = vrot.lane.b32.xlu2 %v741_v39, %s5530_s16  ;;  %v880_v38 = vmul.f32 -0.19389525, %v5822_v17  ;;  %v863_v39 = vmul.f32 -0.06317609, %v5808_v6 }
 0x154   : > { %732 = vrot.lane.b32.xlu0 %v728_v40, %s5531_s28  ;;  %v635_v40 = vadd.f32 -0.035657626, %v633_v32 }
 0x155   : > { %v5868_v41 = vpop.permute.xlu2 %531 }
 0x15b   : > { %777 = vrot.lane.b32.xlu1 %v772_v44, %s5530_s16  ;;  %764 = vrot.lane.b32.xlu2 %v759_v45, %s5531_s28 }
 0x15c   : > { %747 = vrot.lane.b32.xlu0 %v742_v46, %s5530_s16 }
 0x15d   : > { %v5877_v48 = vpop.permute.xlu1 %458  ;;  %v5879_v49 = vpop.permute.xlu2 %580 }
 0x15e   : > { %v464_v50 = vadd.f32 %v5877_v48, %v451_v47  ;;  %v5882_v51 = vpop.permute.xlu0 %471 }
 0x160   : > { %v477_v53 = vadd.f32 %v5882_v51, %v464_v50  ;;  %v663_v50 = vmul.f32 0.08241858, %v5768_v35 }
 0x162   : > { %v481_v56 = vadd.f32 %v479_v52, %v477_v53 }
 0x163   : > { %805 = vrot.lane.b32.xlu1 %v801_v54, %s5530_s16  ;;  %792 = vrot.lane.b32.xlu2 %v788_v55, %s5531_s28  ;;  %v894_v55 = vmul.f32 0.16263619, %v5774_v43 }
 0x164   : > { %775 = vrot.lane.b32.xlu0 %v771_v57, %s5530_s16  ;;  %v494_v58 = vadd.f32 %v5860_v37, %v481_v56  ;;  %v881_v56 = vmul.f32 -0.19389525, %v5774_v43 }
 0x165   : > { %v5893_v59 = vpop.permute.xlu1 %501  ;;  %v5895_v60 = vpop.permute.xlu2 %623 }
 0x166   : > { %v507_v61 = vadd.f32 %v5893_v59, %v494_v58 }
 0x168   : > { %v511_v63 = vadd.f32 %v509_v62, %v507_v61 }
 0x16b   : > { %826 = vrot.lane.b32.xlu1 %v821_v1, %s5531_s28  ;;  %807 = vrot.lane.b32.xlu2 %v802_v2, %s5530_s16 }
 0x16c   : > { %794 = vrot.lane.b32.xlu0 %v789_v3, %s5531_s28 }
 0x16d   : > { %v5905_v4 = vpop.permute.xlu1 %550  ;;  %v5907_v5 = vpop.permute.xlu2 %672 }
 0x16e   : > { %v5909_v0 = vpop.permute.xlu0 %518  ;;  %v556_v12 = vadd.f32 %v5905_v4, %v543_v11  ;;  %v448_v11 = vmul.f32 -0.26379165, %v5820_v16 }
 0x16f   : > { %v524_v25 = vadd.f32 %v5909_v0, %v511_v63  ;;  %v693_v63 = vmul.f32 -0.08914864, %v5774_v43 }
 0x171   : > { %v537_v34 = vadd.f32 %v5868_v41, %v524_v25 }
 0x173   : > { %854 = vrot.lane.b32.xlu1 %v850_v8, %s5531_s28  ;;  %837 = vrot.lane.b32.xlu2 %v833_v9, %s5530_s16  ;;  %v5949_v42 = vmax.f32 %v537_v34, 0.0 }
 0x174   : > { %824 = vrot.lane.b32.xlu0 %v820_v10, %s5531_s28 }
 0x175   : > { %v5919_v13 = vpop.permute.xlu1 %593  ;;  %v5921_v14 = vpop.permute.xlu2 %715  ;;  %v913_v54 = vmul.f32 -0.08376363, %v5949_v42  ;;  %v953_v8 = vmul.f32 0.08697116, %v5949_v42  ;;  %v939_v9 = vmul.f32 -0.1268827, %v5949_v42 }
 0x176   : > { %v5923_v15 = vpop.permute.xlu0 %563  ;;  %v926_v10 = vmul.f32 0.022873865, %v5949_v42 }
 0x177   : > { %v569_v19 = vadd.f32 %v5923_v15, %v556_v12 }
 0x179   : > { %v573_v20 = vadd.f32 %v571_v18, %v569_v19 }
 0x17b   : > { %v586_v24 = vadd.f32 %v5879_v49, %v573_v20  ;;  %869 = vrot.lane.b32.xlu1 %v864_v21, %s5530_s16  ;;  %856 = vrot.lane.b32.xlu2 %v851_v22, %s5531_s28  ;;  %v450_v22 = vadd.f32 -0.36917835, %v448_v11 }
 0x17c   : > { %839 = vrot.lane.b32.xlu0 %v834_v23, %s5530_s16 }
 0x17d   : > { %v5935_v27 = vpop.permute.xlu1 %642  ;;  %v599_v28 = vadd.f32 %v5919_v13, %v586_v24  ;;  %v470_v30 = vpop.permute.xlu2 %469 }
 0x17e   : > { %v5939_v31 = vpop.permute.xlu0 %610  ;;  %v648_v44 = vadd.f32 %v5935_v27, %v635_v40  ;;  %v473_v25 = vsel %vm376_vm1, %v470_v30, %v5882_v51 }
 0x17f   : > { %v603_v33 = vadd.f32 %v601_v29, %v599_v28 }
 0x181   : > { %v616_v58 = vadd.f32 %v5939_v31, %v603_v33 }
 0x183   : > { %897 = vrot.lane.b32.xlu1 %v893_v36, %s5530_s16  ;;  %884 = vrot.lane.b32.xlu2 %v880_v38, %s5531_s28  ;;  %v629_v7 = vadd.f32 %v5895_v60, %v616_v58  ;;  %v478_v36 = vmul.f32 0.30728865, %v5808_v6 }
 0x184   : > { %867 = vrot.lane.b32.xlu0 %v863_v39, %s5530_s16 }
 0x185   : > { %v5952_v45 = vpop.permute.xlu1 %685  ;;  %v5954_v46 = vpop.permute.xlu2 %516  ;;  %v5980_v12 = vmax.f32 %v629_v7, 0.0 }
 0x186   : > { %v5956_v47 = vpop.permute.xlu0 %655 }
 0x187   : > { %v661_v52 = vadd.f32 %v5956_v47, %v648_v44  ;;  %v997_v29 = vmul.f32 0.062184874, %v5980_v12  ;;  %v984_v32 = vmul.f32 -0.06080948, %v5980_v12  ;;  %v971_v34 = vmul.f32 0.047014374, %v5980_v12 }
 0x189   : > { %v665_v53 = vadd.f32 %v663_v50, %v661_v52  ;;  %v508_v52 = vmul.f32 -0.16270396, %v5822_v17 }
 0x18b   : > { %v678_v57 = vadd.f32 %v5907_v5, %v665_v53  ;;  %918 = vrot.lane.b32.xlu1 %v913_v54, %s5531_s28  ;;  %899 = vrot.lane.b32.xlu2 %v894_v55, %s5530_s16 }
 0x18c   : > { %886 = vrot.lane.b32.xlu0 %v881_v56, %s5531_s28 }
 0x18d   : > { %v487_v61 = vpop.permute.xlu1 %486  ;;  %v691_v62 = vadd.f32 %v5952_v45, %v678_v57  ;;  %v562_v1 = vpop.permute.xlu2 %561  ;;  %v1010_v57 = vmul.f32 0.122201815, %v5980_v12 }
 0x18e   : > { %v5970_v2 = vpop.permute.xlu0 %702  ;;  %v490_v51 = vsel %vm362_vm0, %v487_v61, %v5860_v37  ;;  %v540_v37 = vmul.f32 0.027188806, %v5820_v16 }
 0x18f   : > { %v695_v3 = vadd.f32 %v693_v63, %v691_v62 }
 0x190   : > { %v542_v63 = vadd.f32 0.18085718, %v540_v37 }
 0x191   : > { %v708_v18 = vadd.f32 %v5970_v2, %v695_v3 }
 0x193   : > { %958 = vrot.lane.b32.xlu1 %v953_v8, %s5532_s24  ;;  %944 = vrot.lane.b32.xlu2 %v939_v9, %s5533_s8  ;;  %v721_v28 = vadd.f32 %v5921_v14, %v708_v18 }
 0x194   : > { %931 = vrot.lane.b32.xlu0 %v926_v10, %s5530_s16  ;;  %v565_v10 = vsel %vm376_vm1, %v562_v1, %v5923_v15 }
 0x195   : > { %v530_v19 = vpop.permute.xlu1 %529  ;;  %v5983_v20 = vpop.permute.xlu2 %608  ;;  %v5999_v30 = vmax.f32 %v721_v28, 0.0 }
 0x196   : > { %v457_v21 = vpop.permute.xlu0 %456  ;;  %v533_v8 = vsel %vm376_vm1, %v530_v19, %v5868_v41 }
 0x197   : > { %v460_v23 = vsel %vm362_vm0, %v457_v21, %v5877_v48  ;;  %v1040_v54 = vmul.f32 0.02433572, %v5999_v30  ;;  %v1027_v55 = vmul.f32 0.02013586, %v5999_v30  ;;  %v1053_v18 = vmul.f32 0.019103274, %v5999_v30 }
 0x198   : > { %v463_v24 = vadd.f32 %v460_v23, %v450_v22  ;;  %v570_v21 = vmul.f32 0.044535626, %v5808_v6 }
 0x19a   : > { %v476_v33 = vadd.f32 %v473_v25, %v463_v24  ;;  %v600_v25 = vmul.f32 0.0722372, %v5822_v17 }
 0x19b   : > { %1002 = vrot.lane.b32.xlu1 %v997_v29, %s5533_s8  ;;  %989 = vrot.lane.b32.xlu2 %v984_v32, %s5530_s16 }
 0x19c   : > { %976 = vrot.lane.b32.xlu0 %v971_v34, %s5531_s28  ;;  %v480_v48 = vadd.f32 %v478_v36, %v476_v33  ;;  %v612_v34 = vsel %vm362_vm0, %v5983_v20, %v5939_v31 }
 0x19d   : > { %v579_v38 = vpop.permute.xlu1 %578  ;;  %v654_v39 = vpop.permute.xlu2 %653 }
 0x19e   : > { %v500_v40 = vpop.permute.xlu0 %499  ;;  %v493_v44 = vadd.f32 %v490_v51, %v480_v48  ;;  %v582_v41 = vsel %vm362_vm0, %v579_v38, %v5879_v49  ;;  %v632_v49 = vmul.f32 0.095456444, %v5820_v16  ;;  %v657_v31 = vsel %vm376_vm1, %v654_v39, %v5956_v47 }
 0x19f   : > { %v503_v50 = vsel %vm376_vm1, %v500_v40, %v5893_v59  ;;  %v520_v59 = vsel %vm362_vm0, %v5954_v46, %v5909_v0  ;;  %v1066_v0 = vmul.f32 -0.07321672, %v5999_v30  ;;  %v692_v39 = vmul.f32 -0.08914864, %v5822_v17 }
 0x1a0   : > { %v506_v53 = vadd.f32 %v503_v50, %v493_v44  ;;  %v634_v40 = vadd.f32 -0.035657626, %v632_v49 }
 0x1a2   : > { %v510_v56 = vadd.f32 %v508_v52, %v506_v53 }
 0x1a3   : > { %1045 = vrot.lane.b32.xlu1 %v1040_v54, %s5530_s16  ;;  %1032 = vrot.lane.b32.xlu2 %v1027_v55, %s5531_s28 }
 0x1a4   : > { %1015 = vrot.lane.b32.xlu0 %v1010_v57, %s5532_s24  ;;  %v523_v58 = vadd.f32 %v520_v59, %v510_v56 }
 0x1a5   : > { %v622_v61 = vpop.permute.xlu1 %621  ;;  %v701_v62 = vpop.permute.xlu2 %700 }
 0x1a6   : > { %v549_v3 = vpop.permute.xlu0 %548  ;;  %v536_v11 = vadd.f32 %v533_v8, %v523_v58  ;;  %v704_v8 = vsel %vm362_vm0, %v701_v62, %v5970_v2 }
 0x1a7   : > { %v552_v7 = vsel %vm362_vm0, %v549_v3, %v5905_v4 }
 0x1a8   : > { %v555_v9 = vadd.f32 %v552_v7, %v542_v63  ;;  %v6027_v19 = vmax.f32 %v536_v11, 0.0 }
 0x1aa   : > { %v568_v46 = vadd.f32 %v565_v10, %v555_v9  ;;  %v925_v29 = vmul.f32 0.022873865, %v6027_v19  ;;  %v912_v33 = vmul.f32 -0.08376363, %v6027_v19  ;;  %v952_v55 = vmul.f32 0.08697116, %v6027_v19 }
 0x1ab   : > { %1071 = vrot.lane.b32.xlu2 %v1066_v0, %s5532_s24 }
 0x1ac   : > { %1058 = vrot.lane.b32.xlu0 %v1053_v18, %s5533_s8  ;;  %v572_v4 = vadd.f32 %v570_v21, %v568_v46  ;;  %v725_v46 = vmul.f32 -0.031937674, %v5762_v26  ;;  %v724_v21 = vmul.f32 -0.031937674, %v5820_v16 }
 0x1ad   : > { %v671_v22 = vpop.permute.xlu1 %670  ;;  %v6029_v15 = vpop.permute.xlu2 %745 }
 0x1ae   : > { %v585_v1 = vadd.f32 %v582_v41, %v572_v4  ;;  %v592_v23 = vpop.permute.xlu0 %591  ;;  %v727_v4 = vadd.f32 0.2241925, %v725_v46 }
 0x1af   : > { %v595_v24 = vsel %vm376_vm1, %v592_v23, %v5919_v13  ;;  %v625_v13 = vsel %vm376_vm1, %v622_v61, %v5895_v60  ;;  %v662_v60 = vmul.f32 0.08241858, %v5808_v6 }
 0x1b0   : > { %v598_v28 = vadd.f32 %v595_v24, %v585_v1 }
 0x1b2   : > { %v602_v32 = vadd.f32 %v600_v25, %v598_v28  ;;  %v755_v28 = vmul.f32 -0.15143368, %v5768_v35 }
 0x1b3   : > { %929 = vrot.lane.b32.xlu2 %v925_v29, %s5530_s16 }
 0x1b4   : > { %v615_v36 = vadd.f32 %v612_v34, %v602_v32  ;;  %916 = vrot.lane.b32.xlu0 %v912_v33, %s5531_s28  ;;  %v754_v33 = vmul.f32 -0.15143368, %v5808_v6 }
 0x1b5   : > { %v714_v48 = vpop.permute.xlu1 %713  ;;  %v765_v51 = vpop.permute.xlu2 %764 }
 0x1b6   : > { %v628_v38 = vadd.f32 %v625_v13, %v615_v36  ;;  %v641_v44 = vpop.permute.xlu0 %640 }
 0x1b7   : > { %v644_v50 = vsel %vm362_vm0, %v641_v44, %v5935_v27  ;;  %v674_v27 = vsel %vm362_vm0, %v671_v22, %v5907_v5  ;;  %v717_v5 = vsel %vm376_vm1, %v714_v48, %v5921_v14  ;;  %v726_v22 = vadd.f32 0.2241925, %v724_v21 }
 0x1b8   : > { %v6046_v52 = vmax.f32 %v628_v38, 0.0  ;;  %v647_v53 = vadd.f32 %v644_v50, %v634_v40  ;;  %v785_v50 = vmul.f32 -0.1283304, %v5774_v43 }
 0x1ba   : > { %v660_v20 = vadd.f32 %v657_v31, %v647_v53  ;;  %v970_v54 = vmul.f32 0.047014374, %v6046_v52  ;;  %v1009_v3 = vmul.f32 0.122201815, %v6046_v52  ;;  %v996_v7 = vmul.f32 0.062184874, %v6046_v52 }
 0x1bc   : > { %974 = vrot.lane.b32.xlu2 %v970_v54, %s5531_s28  ;;  %956 = vrot.lane.b32.xlu0 %v952_v55, %s5532_s24  ;;  %v664_v56 = vadd.f32 %v662_v60, %v660_v20 }
 0x1bd   : > { %v735_v57 = vpop.permute.xlu1 %734  ;;  %v793_v37 = vpop.permute.xlu2 %792 }
 0x1be   : > { %v677_v59 = vadd.f32 %v674_v27, %v664_v56  ;;  %v684_v58 = vpop.permute.xlu0 %683  ;;  %v740_v14 = vadd.f32 %v735_v57, %v727_v4 }
 0x1bf   : > { %v687_v47 = vsel %vm376_vm1, %v684_v58, %v5952_v45 }
 0x1c0   : > { %v690_v61 = vadd.f32 %v687_v47, %v677_v59 }
 0x1c2   : > { %v694_v63 = vadd.f32 %v692_v39, %v690_v61 }
 0x1c4   : > { %v707_v9 = vadd.f32 %v704_v8, %v694_v63  ;;  %1013 = vrot.lane.b32.xlu2 %v1009_v3, %s5532_s24  ;;  %1000 = vrot.lane.b32.xlu0 %v996_v7, %s5533_s8 }
 0x1c5   : > { %v763_v45 = vpop.permute.xlu1 %762  ;;  %v808_v10 = vpop.permute.xlu2 %807 }
 0x1c6   : > { %v720_v11 = vadd.f32 %v717_v5, %v707_v9  ;;  %v733_v0 = vpop.permute.xlu0 %732  ;;  %v766_v48 = vsel %vm362_vm0, %v763_v45, %v765_v51 }
 0x1c7   : > { %v736_v41 = vsel %vm362_vm0, %v733_v0, %v735_v57 }
 0x1c8   : > { %v6069_v18 = vmax.f32 %v720_v11, 0.0  ;;  %v739_v24 = vadd.f32 %v736_v41, %v726_v22  ;;  %v938_v41 = vmul.f32 -0.1268827, %v6027_v19 }
 0x1ca   : > { %v1052_v2 = vmul.f32 0.019103274, %v6069_v18  ;;  %v1039_v62 = vmul.f32 0.02433572, %v6069_v18 }
 0x1cc   : > { %1056 = vrot.lane.b32.xlu2 %v1052_v2, %s5533_s8  ;;  %1043 = vrot.lane.b32.xlu0 %v1039_v62, %s5530_s16 }
 0x1cd   : > { %v778_v1 = vpop.permute.xlu1 %777  ;;  %v838_v23 = vpop.permute.xlu2 %837 }
 0x1ce   : > { %v748_v25 = vpop.permute.xlu0 %747 }
 0x1cf   : > { %v749_v29 = vsel %vm376_vm1, %v6029_v15, %v748_v25  ;;  %v753_v32 = vadd.f32 %v748_v25, %v740_v14  ;;  %v784_v15 = vmul.f32 -0.1283304, %v5822_v17 }
 0x1d0   : > { %v752_v49 = vadd.f32 %v749_v29, %v739_v24 }
 0x1d1   : > { %v757_v34 = vadd.f32 %v755_v28, %v753_v32  ;;  %v846_v28 = vmul.f32 -0.17412467, %v5808_v6 }
 0x1d2   : > { %v756_v36 = vadd.f32 %v754_v33, %v752_v49 }
 0x1d3   : > { %v770_v13 = vadd.f32 %v765_v51, %v757_v34 }
 0x1d4   : > { %v769_v53 = vadd.f32 %v766_v48, %v756_v36  ;;  %v877_v48 = vmul.f32 0.15447819, %v5774_v43 }
 0x1d5   : > { %v806_v38 = vpop.permute.xlu1 %805  ;;  %v857_v40 = vpop.permute.xlu2 %856  ;;  %v783_v44 = vadd.f32 %v778_v1, %v770_v13 }
 0x1d6   : > { %v776_v31 = vpop.permute.xlu0 %775  ;;  %v809_v47 = vsel %vm376_vm1, %v806_v38, %v808_v10 }
 0x1d7   : > { %v779_v20 = vsel %vm376_vm1, %v776_v31, %v778_v1  ;;  %v787_v54 = vadd.f32 %v785_v50, %v783_v44  ;;  %v847_v1 = vmul.f32 -0.17412467, %v5768_v35  ;;  %v983_v35 = vmul.f32 -0.06080948, %v6046_v52 }
 0x1d8   : > { %v782_v55 = vadd.f32 %v779_v20, %v769_v53  ;;  %v876_v20 = vmul.f32 0.15447819, %v5822_v17 }
 0x1da   : > { %v786_v60 = vadd.f32 %v784_v15, %v782_v55 }
 0x1dd   : > { %v827_v56 = vpop.permute.xlu1 %826  ;;  %v6085_v27 = vpop.permute.xlu2 %884 }
 0x1de   : > { %v795_v57 = vpop.permute.xlu0 %794 }
 0x1df   : > { %v796_v51 = vsel %vm362_vm0, %v793_v37, %v795_v57  ;;  %v800_v59 = vadd.f32 %v795_v57, %v787_v54  ;;  %v817_v37 = vmul.f32 -0.16412109, %v5762_v26 }
 0x1e0   : > { %v799_v58 = vadd.f32 %v796_v51, %v786_v60  ;;  %v1026_v60 = vmul.f32 0.02013586, %v6069_v18 }
 0x1e1   : > { %v813_v39 = vadd.f32 %v808_v10, %v800_v59  ;;  %v816_v10 = vmul.f32 -0.16412109, %v5820_v16  ;;  %v819_v0 = vadd.f32 0.0779866, %v817_v37 }
 0x1e2   : > { %v812_v61 = vadd.f32 %v809_v47, %v799_v58 }
 0x1e3   : > { %v6089_v63 = vmax.f32 %v813_v39, 0.0  ;;  %v818_v21 = vadd.f32 0.0779866, %v816_v10  ;;  %v832_v2 = vadd.f32 %v827_v56, %v819_v0 }
 0x1e4   : > { %v6091_v3 = vmax.f32 %v812_v61, 0.0 }
 0x1e5   : > { %v855_v7 = vpop.permute.xlu1 %854  ;;  %v900_v8 = vpop.permute.xlu2 %899  ;;  %v1083_v9 = vmul.f32 -0.013979954, %v6089_v63  ;;  %v1109_v14 = vmul.f32 0.05274196, %v6089_v63  ;;  %v1096_v16 = vmul.f32 0.09158983, %v6089_v63 }
 0x1e6   : > { %v825_v5 = vpop.permute.xlu0 %824  ;;  %v1095_v45 = vmul.f32 0.09158983, %v6091_v3  ;;  %v1082_v11 = vmul.f32 -0.013979954, %v6091_v3  ;;  %v858_v34 = vsel %vm362_vm0, %v855_v7, %v857_v40  ;;  %v1121_v44 = vmul.f32 -0.053557307, %v6091_v3 }
 0x1e7   : > { %1088 = vrot.lane.b32.xlu1 %v1083_v9, %s5531_s28  ;;  %v828_v46 = vsel %vm362_vm0, %v825_v5, %v827_v56  ;;  %v1065_v5 = vmul.f32 -0.07321672, %v6069_v18 }
 0x1e8   : > { %1099 = vrot.lane.b32.xlu2 %v1095_v45, %s5530_s16  ;;  %1086 = vrot.lane.b32.xlu0 %v1082_v11, %s5531_s28  ;;  %v831_v22 = vadd.f32 %v828_v46, %v818_v21  ;;  %v967_v46 = vmul.f32 -0.13095762, %v5980_v12 }
 0x1ed   : > { %v870_v62 = vpop.permute.xlu1 %869  ;;  %v6102_v4 = vpop.permute.xlu2 %944 }
 0x1ee   : > { %v840_v26 = vpop.permute.xlu0 %839 }
 0x1ef   : > { %v841_v24 = vsel %vm376_vm1, %v838_v23, %v840_v26  ;;  %v845_v25 = vadd.f32 %v840_v26, %v832_v2  ;;  %942 = vrot.lane.b32.xlu1 %v938_v41, %s5533_s8 }
 0x1f0   : > { %v844_v29 = vadd.f32 %v841_v24, %v831_v22  ;;  %1114 = vrot.lane.b32.xlu2 %v1109_v14, %s5533_s8  ;;  %1101 = vrot.lane.b32.xlu0 %v1096_v16, %s5530_s16 }
 0x1f1   : > { %v849_v32 = vadd.f32 %v847_v1, %v845_v25 }
 0x1f2   : > { %v848_v33 = vadd.f32 %v846_v28, %v844_v29  ;;  %v1122_v28 = vmul.f32 -0.053557307, %v6089_v63 }
 0x1f3   : > { %v862_v49 = vadd.f32 %v857_v40, %v849_v32  ;;  %v909_v40 = vmul.f32 -0.055680647, %v5949_v42 }
 0x1f4   : > { %v861_v38 = vadd.f32 %v858_v34, %v848_v33  ;;  %v1023_v34 = vmul.f32 -0.06642921, %v5999_v30 }
 0x1f5   : > { %v898_v36 = vpop.permute.xlu1 %897  ;;  %v6114_v13 = vpop.permute.xlu2 %989  ;;  %v875_v23 = vadd.f32 %v870_v62, %v862_v49  ;;  %v911_v15 = vadd.f32 -0.16905898, %v909_v40  ;;  %v1197_v40 = vmul.f32 0.045013636, %v5949_v42 }
 0x1f6   : > { %v868_v6 = vpop.permute.xlu0 %867  ;;  %v901_v17 = vsel %vm376_vm1, %v898_v36, %v900_v8 }
 0x1f7   : > { %v871_v50 = vsel %vm376_vm1, %v868_v6, %v870_v62  ;;  %987 = vrot.lane.b32.xlu1 %v983_v35, %s5530_s16  ;;  %v879_v53 = vadd.f32 %v877_v48, %v875_v23  ;;  %v1108_v62 = vmul.f32 0.05274196, %v6091_v3 }
 0x1f8   : > { %v874_v31 = vadd.f32 %v871_v50, %v861_v38  ;;  %1125 = vrot.lane.b32.xlu0 %v1121_v44, %s5532_s24  ;;  %v1209_v50 = vmul.f32 0.00026465754, %v6027_v19 }
 0x1fa   : > { %v878_v54 = vadd.f32 %v876_v20, %v874_v31 }
 0x1fd   : > { %v6124_v55 = vpop.permute.xlu1 %918  ;;  %v6126_v43 = vpop.permute.xlu2 %1032 }
 0x1fe   : > { %v924_v56 = vadd.f32 %v6124_v55, %v911_v15  ;;  %v887_v57 = vpop.permute.xlu0 %886 }
 0x1ff   : > { %v888_v51 = vsel %vm362_vm0, %v6085_v27, %v887_v57  ;;  %v892_v59 = vadd.f32 %v887_v57, %v879_v53  ;;  %1030 = vrot.lane.b32.xlu1 %v1026_v60, %s5531_s28  ;;  %v1079_v60 = vmul.f32 0.11970602, %v6089_v63 }
 0x200   : > { %v891_v58 = vadd.f32 %v888_v51, %v878_v54 }
 0x201   : > { %v905_v47 = vadd.f32 %v900_v8, %v892_v59  ;;  %v1223_v59 = vmul.f32 0.091141365, %v5949_v42 }
 0x202   : > { %v904_v39 = vadd.f32 %v901_v17, %v891_v58 }
 0x203   : > { %v6134_v61 = vmax.f32 %v905_v47, 0.0 }
 0x204   : > { %v6136_v7 = vmax.f32 %v904_v39, 0.0  ;;  %v1222_v39 = vmul.f32 0.091141365, %v6027_v19 }
 0x205   : > { %v6138_v9 = vpop.permute.xlu2 %1071  ;;  %v1139_v45 = vmul.f32 -0.027363693, %v6134_v61  ;;  %v6145_v8 = vpop.permute.xlu1 %958  ;;  %v1152_v14 = vmul.f32 0.10076299, %v6134_v61  ;;  %v1178_v29 = vmul.f32 0.10093015, %v6134_v61 }
 0x206   : > { %v932_v11 = vpop.permute.xlu0 %931  ;;  %v1138_v27 = vmul.f32 -0.027363693, %v6136_v7  ;;  %v1164_v41 = vmul.f32 0.0214884, %v6136_v7  ;;  %v1177_v49 = vmul.f32 0.10093015, %v6136_v7 }
 0x207   : > { %v937_v37 = vadd.f32 %v932_v11, %v924_v56  ;;  %1069 = vrot.lane.b32.xlu1 %v1065_v5, %s5532_s24  ;;  %1144 = vrot.lane.b32.xlu0 %v1139_v45, %s5531_s28  ;;  %v1151_v44 = vmul.f32 0.10076299, %v6136_v7  ;;  %v908_v56 = vmul.f32 -0.055680647, %v6027_v19  ;;  %v1165_v51 = vmul.f32 0.0214884, %v6134_v61 }
 0x208   : > { %1142 = vrot.lane.b32.xlu2 %v1138_v27, %s5531_s28 }
 0x209   : > { %v951_v10 = vadd.f32 %v6102_v4, %v937_v37  ;;  %v910_v47 = vadd.f32 -0.16905898, %v908_v56  ;;  %v1196_v37 = vmul.f32 0.045013636, %v6027_v19 }
 0x20b   : > { %v965_v0 = vadd.f32 %v6145_v8, %v951_v10  ;;  %v1252_v10 = vmul.f32 0.021261062, %v6046_v52 }
 0x20d   : > { %v969_v21 = vadd.f32 %v967_v46, %v965_v0  ;;  %v930_v2 = vpop.permute.xlu2 %929  ;;  %v1003_v24 = vpop.permute.xlu1 %1002  ;;  %v1236_v46 = vmul.f32 0.028774248, %v5949_v42 }
 0x20e   : > { %v977_v22 = vpop.permute.xlu0 %976  ;;  %v933_v26 = vsel %vm376_vm1, %v930_v2, %v932_v11  ;;  %v1266_v2 = vmul.f32 -0.09608191, %v5980_v12 }
 0x20f   : > { %v982_v16 = vadd.f32 %v977_v22, %v969_v21  ;;  %1112 = vrot.lane.b32.xlu1 %v1108_v62, %s5533_s8  ;;  %1168 = vrot.lane.b32.xlu0 %v1164_v41, %s5533_s8  ;;  %v1265_v41 = vmul.f32 -0.09608191, %v6046_v52 }
 0x210   : > { %1157 = vrot.lane.b32.xlu2 %v1152_v14, %s5530_s16 }
 0x211   : > { %v995_v1 = vadd.f32 %v6114_v13, %v982_v16  ;;  %v1279_v16 = vmul.f32 -0.03965225, %v5980_v12 }
 0x213   : > { %v1008_v25 = vadd.f32 %v1003_v24, %v995_v1 }
 0x215   : > { %v1046_v38 = vpop.permute.xlu1 %1045 }
 0x216   : > { %v1016_v32 = vpop.permute.xlu0 %1015  ;;  %v975_v33 = vpop.permute.xlu2 %974 }
 0x217   : > { %v1021_v36 = vadd.f32 %v1016_v32, %v1008_v25  ;;  %v6164_v35 = vsel %vm362_vm0, %v975_v33, %v977_v22  ;;  %1127 = vrot.lane.b32.xlu1 %v1122_v28, %s5532_s24  ;;  %1183 = vrot.lane.b32.xlu0 %v1178_v29, %s5532_s24  ;;  %v1309_v25 = vmul.f32 0.023583585, %v5999_v30  ;;  %v1308_v28 = vmul.f32 0.023583585, %v6069_v18 }
 0x218   : > { %1181 = vrot.lane.b32.xlu2 %v1177_v49, %s5532_s24  ;;  %v1278_v29 = vmul.f32 -0.03965225, %v6046_v52  ;;  %v1322_v33 = vmul.f32 -0.01423449, %v5999_v30 }
 0x219   : > { %v1025_v23 = vadd.f32 %v1023_v34, %v1021_v36  ;;  %v1292_v34 = vmul.f32 0.032008238, %v5980_v12  ;;  %v1348_v36 = vmul.f32 -0.040310204, %v5999_v30 }
 0x21b   : > { %v1038_v48 = vadd.f32 %v6126_v43, %v1025_v23  ;;  %v1347_v23 = vmul.f32 -0.040310204, %v6069_v18 }
 0x21d   : > { %v1051_v6 = vadd.f32 %v1046_v38, %v1038_v48 }
 0x21e   : > { %v1059_v53 = vpop.permute.xlu0 %1058  ;;  %v1014_v31 = vpop.permute.xlu2 %1013 }
 0x21f   : > { %v1064_v20 = vadd.f32 %v1059_v53, %v1051_v6  ;;  %v6174_v54 = vsel %vm960_vm2, %v1014_v31, %v1016_v32  ;;  %1155 = vrot.lane.b32.xlu1 %v1151_v44, %s5530_s16  ;;  %1213 = vrot.lane.b32.xlu0 %v1209_v50, %s5530_s16  ;;  %v1334_v32 = vmul.f32 -0.07284496, %v6069_v18  ;;  %v1377_v31 = vmul.f32 0.014852769, %v6091_v3 }
 0x220   : > { %1202 = vrot.lane.b32.xlu2 %v1197_v40, %s5531_s28  ;;  %v1365_v40 = vmul.f32 0.018159537, %v6089_v63 }
 0x221   : > { %v1077_v15 = vadd.f32 %v6138_v9, %v1064_v20 }
 0x223   : > { %v1081_v57 = vadd.f32 %v1079_v60, %v1077_v15 }
 0x226   : > { %v1057_v58 = vpop.permute.xlu2 %1056  ;;  %v917_v17 = vpop.permute.xlu0 %916 }
 0x227   : > { %v6186_v5 = vsel %vm946_vm3, %v1057_v58, %v1059_v53  ;;  %v920_v45 = vsel %vm362_vm0, %v917_v17, %v6124_v55  ;;  %1170 = vrot.lane.b32.xlu1 %v1165_v51, %s5533_s8  ;;  %1228 = vrot.lane.b32.xlu0 %v1223_v59, %s5533_s8  ;;  %v1210_v55 = vmul.f32 0.00026465754, %v5949_v42  ;;  %v1321_v53 = vmul.f32 -0.01423449, %v6069_v18 }
 0x228   : > { %v923_v11 = vadd.f32 %v920_v45, %v910_v47  ;;  %1226 = vrot.lane.b32.xlu2 %v1222_v39, %s5533_s8  ;;  %v1335_v58 = vmul.f32 -0.07284496, %v5999_v30  ;;  %v1391_v47 = vmul.f32 0.03061485, %v6089_v63  ;;  %v966_v39 = vmul.f32 -0.13095762, %v6046_v52 }
 0x22a   : > { %v936_v27 = vadd.f32 %v933_v26, %v923_v11  ;;  %v1291_v26 = vmul.f32 0.032008238, %v6046_v52  ;;  %v1390_v11 = vmul.f32 0.03061485, %v6091_v3 }
 0x22e   : > { %v957_v0 = vpop.permute.xlu0 %956 }
 0x22f   : > { %v961_v21 = vsel %vm960_vm2, %v957_v0, %v6145_v8  ;;  %1200 = vrot.lane.b32.xlu1 %v1196_v37, %s5531_s28  ;;  %1256 = vrot.lane.b32.xlu0 %v1252_v10, %s5531_s28  ;;  %v1235_v8 = vmul.f32 0.028774248, %v6027_v19 }
 0x230   : > { %1241 = vrot.lane.b32.xlu2 %v1236_v46, %s5532_s24 }
 0x236   : > { %v1001_v62 = vpop.permute.xlu0 %1000 }
 0x237   : > { %v6205_v22 = vsel %vm946_vm3, %v1001_v62, %v1003_v24  ;;  %1215 = vrot.lane.b32.xlu1 %v1210_v55, %s5530_s16  ;;  %1271 = vrot.lane.b32.xlu0 %v1266_v2, %s5530_s16  ;;  %v1253_v24 = vmul.f32 0.021261062, %v5980_v12  ;;  %v1364_v55 = vmul.f32 0.018159537, %v6091_v3  ;;  %v1420_v2 = vmul.f32 0.0792438, %v6136_v7 }
 0x238   : > { %1269 = vrot.lane.b32.xlu2 %v1265_v41, %s5530_s16  ;;  %v1404_v62 = vmul.f32 0.03039552, %v6089_v63 }
 0x23e   : > { %v1044_v14 = vpop.permute.xlu0 %1043 }
 0x23f   : > { %v6214_v1 = vsel %vm376_vm1, %v1044_v14, %v1046_v38  ;;  %1239 = vrot.lane.b32.xlu1 %v1235_v8, %s5532_s24  ;;  %1295 = vrot.lane.b32.xlu0 %v1291_v26, %s5532_s24 }
 0x240   : > { %1284 = vrot.lane.b32.xlu2 %v1279_v16, %s5533_s8 }
 0x242   : > { %v1100_v49 = vpop.permute.xlu2 %1099 }
 0x247   : > { %1258 = vrot.lane.b32.xlu1 %v1253_v24, %s5531_s28  ;;  %1314 = vrot.lane.b32.xlu0 %v1309_v25, %s5531_s28  ;;  %v1378_v25 = vmul.f32 0.014852769, %v6089_v63 }
 0x248   : > { %1312 = vrot.lane.b32.xlu2 %v1308_v28, %s5531_s28  ;;  %v1434_v28 = vmul.f32 -0.026465742, %v6134_v61 }
 0x24a   : > { %v6237_v38 = vpop.permute.xlu2 %1114 }
 0x24f   : > { %1282 = vrot.lane.b32.xlu1 %v1278_v29, %s5533_s8  ;;  %1338 = vrot.lane.b32.xlu0 %v1334_v32, %s5533_s8  ;;  %v1433_v29 = vmul.f32 -0.026465742, %v6136_v7 }
 0x250   : > { %1327 = vrot.lane.b32.xlu2 %v1322_v33, %s5530_s16 }
 0x257   : > { %1297 = vrot.lane.b32.xlu1 %v1292_v34, %s5532_s24  ;;  %1353 = vrot.lane.b32.xlu0 %v1348_v36, %s5532_s24  ;;  %v1078_v34 = vmul.f32 0.11970602, %v6091_v3 }
 0x258   : > { %1351 = vrot.lane.b32.xlu2 %v1347_v23, %s5532_s24 }
 0x259   : > { %v1089_v48 = vpop.permute.xlu1 %1088 }
 0x25a   : > { %v1094_v6 = vadd.f32 %v1089_v48, %v1081_v57  ;;  %v1087_v44 = vpop.permute.xlu0 %1086 }
 0x25b   : > { %v6240_v50 = vsel %vm362_vm0, %v1087_v44, %v1089_v48  ;;  %v1403_v48 = vmul.f32 0.03039552, %v6091_v3 }
 0x25f   : > { %1325 = vrot.lane.b32.xlu1 %v1321_v53, %s5530_s16  ;;  %1381 = vrot.lane.b32.xlu0 %v1377_v31, %s5530_s16 }
 0x260   : > { %1370 = vrot.lane.b32.xlu2 %v1365_v40, %s5531_s28 }
 0x261   : > { %v943_v20 = vpop.permute.xlu1 %942 }
 0x262   : > { %v947_v15 = vsel %vm946_vm3, %v943_v20, %v6102_v4  ;;  %v1143_v60 = vpop.permute.xlu2 %1142  ;;  %v1102_v56 = vpop.permute.xlu0 %1101 }
 0x263   : > { %v950_v57 = vadd.f32 %v947_v15, %v936_v27  ;;  %v1103_v51 = vsel %vm376_vm1, %v1100_v49, %v1102_v56  ;;  %v1107_v59 = vadd.f32 %v1102_v56, %v1094_v6  ;;  %v1459_v6 = vmul.f32 0.07831991, %v6136_v7 }
 0x264   : > { %v1479_v56 = vmul.f32 0.12282481, %v5949_v42 }
 0x265   : > { %v964_v17 = vadd.f32 %v961_v21, %v950_v57  ;;  %v6255_v45 = vadd.f32 %v6237_v38, %v1107_v59  ;;  %v1478_v57 = vmul.f32 0.12282481, %v6027_v19  ;;  %v1135_v59 = vmul.f32 0.08296758, %v6134_v61 }
 0x267   : > { %1340 = vrot.lane.b32.xlu1 %v1335_v58, %s5533_s8  ;;  %1396 = vrot.lane.b32.xlu0 %v1391_v47, %s5533_s8  ;;  %v968_v4 = vadd.f32 %v966_v39, %v964_v17  ;;  %v1134_v39 = vmul.f32 0.08296758, %v6136_v7 }
 0x268   : > { %1394 = vrot.lane.b32.xlu2 %v1390_v11, %s5533_s8 }
 0x269   : > { %v988_v27 = vpop.permute.xlu1 %987  ;;  %v981_v37 = vadd.f32 %v6164_v35, %v968_v4  ;;  %v1022_v35 = vmul.f32 -0.06642921, %v6069_v18 }
 0x26a   : > { %v991_v10 = vsel %vm376_vm1, %v988_v27, %v6114_v13  ;;  %v6264_v0 = vpop.permute.xlu2 %1157  ;;  %v1126_v13 = vpop.permute.xlu0 %1125 }
 0x26b   : > { %v994_v46 = vadd.f32 %v991_v10, %v981_v37  ;;  %v1446_v37 = vmul.f32 -0.012816417, %v6136_v7  ;;  %v1504_v10 = vmul.f32 0.25270113, %v6027_v19 }
 0x26d   : > { %v1007_v21 = vadd.f32 %v6205_v22, %v994_v46  ;;  %v1492_v46 = vmul.f32 -0.24082789, %v5949_v42 }
 0x26f   : > { %1368 = vrot.lane.b32.xlu1 %v1364_v55, %s5531_s28  ;;  %1424 = vrot.lane.b32.xlu0 %v1420_v2, %s5531_s28  ;;  %v1020_v41 = vadd.f32 %v6174_v54, %v1007_v21 }
 0x270   : > { %1409 = vrot.lane.b32.xlu2 %v1404_v62, %s5532_s24 }
 0x271   : > { %v1031_v8 = vpop.permute.xlu1 %1030  ;;  %v1024_v26 = vadd.f32 %v1022_v35, %v1020_v41 }
 0x272   : > { %v1034_v22 = vsel %vm362_vm0, %v1031_v8, %v6126_v43  ;;  %v1182_v14 = vpop.permute.xlu2 %1181  ;;  %v1460_v8 = vmul.f32 0.07831991, %v6134_v61 }
 0x273   : > { %v1037_v16 = vadd.f32 %v1034_v22, %v1024_v26  ;;  %v1518_v26 = vmul.f32 0.1290614, %v5949_v42  ;;  %v1517_v22 = vmul.f32 0.1290614, %v6027_v19 }
 0x275   : > { %v1050_v24 = vadd.f32 %v6214_v1, %v1037_v16 }
 0x277   : > { %1383 = vrot.lane.b32.xlu1 %v1378_v25, %s5530_s16  ;;  %1439 = vrot.lane.b32.xlu0 %v1434_v28, %s5530_s16  ;;  %v1063_v54 = vadd.f32 %v6186_v5, %v1050_v24  ;;  %v1447_v5 = vmul.f32 -0.012816417, %v6134_v61 }
 0x278   : > { %1437 = vrot.lane.b32.xlu2 %v1433_v29, %s5530_s16 }
 0x279   : > { %v1070_v32 = vpop.permute.xlu1 %1069  ;;  %v1145_v43 = vpop.permute.xlu0 %1144 }
 0x27a   : > { %v1073_v33 = vsel %vm960_vm2, %v1070_v32, %v6138_v9  ;;  %v1146_v1 = vsel %vm362_vm0, %v1143_v60, %v1145_v43  ;;  %v6288_v49 = vpop.permute.xlu2 %1202  ;;  %v1421_v60 = vmul.f32 0.0792438, %v6134_v61  ;;  %v1491_v32 = vmul.f32 -0.24082789, %v6027_v19 }
 0x27b   : > { %v1076_v36 = vadd.f32 %v1073_v33, %v1063_v54  ;;  %v1535_v33 = vmul.f32 -0.21117634, %v5980_v12 }
 0x27d   : > { %v1080_v23 = vadd.f32 %v1078_v34, %v1076_v36  ;;  %v1193_v36 = vmul.f32 0.038474504, %v5949_v42 }
 0x27f   : > { %1407 = vrot.lane.b32.xlu1 %v1403_v48, %s5532_s24  ;;  %1463 = vrot.lane.b32.xlu0 %v1459_v6, %s5532_s24  ;;  %v1093_v9 = vadd.f32 %v6240_v50, %v1080_v23  ;;  %v1192_v48 = vmul.f32 0.038474504, %v6027_v19  ;;  %v1505_v6 = vmul.f32 0.25270113, %v5949_v42 }
 0x280   : > { %1452 = vrot.lane.b32.xlu2 %v1447_v5, %s5533_s8  ;;  %v1561_v5 = vmul.f32 -0.2033181, %v5980_v12 }
 0x281   : > { %v1113_v44 = vpop.permute.xlu1 %1112  ;;  %v1106_v53 = vadd.f32 %v1103_v51, %v1093_v9  ;;  %v1169_v31 = vpop.permute.xlu0 %1168  ;;  %v1195_v9 = vadd.f32 0.020051608, %v1193_v36  ;;  %v1591_v36 = vmul.f32 0.20964414, %v5999_v30 }
 0x282   : > { %v1116_v40 = vsel %vm946_vm3, %v1113_v44, %v6237_v38  ;;  %v6300_v20 = vpop.permute.xlu2 %1226  ;;  %v1560_v44 = vmul.f32 -0.2033181, %v6046_v52 }
 0x283   : > { %v1119_v15 = vadd.f32 %v1116_v40, %v1106_v53  ;;  %v1208_v53 = vadd.f32 %v6288_v49, %v1195_v9  ;;  %v1194_v40 = vadd.f32 0.020051608, %v1192_v48  ;;  %v1647_v48 = vmul.f32 0.11893335, %v6089_v63 }
 0x287   : > { %1426 = vrot.lane.b32.xlu1 %v1421_v60, %s5531_s28  ;;  %1484 = vrot.lane.b32.xlu0 %v1479_v56, %s5531_s28 }
 0x288   : > { %1482 = vrot.lane.b32.xlu2 %v1478_v57, %s5531_s28 }
 0x289   : > { %v1128_v50 = vpop.permute.xlu1 %1127  ;;  %v1184_v51 = vpop.permute.xlu0 %1183 }
 0x28a   : > { %v1129_v38 = vsel %vm960_vm2, %v1126_v13, %v1128_v50  ;;  %v1133_v58 = vadd.f32 %v1128_v50, %v6255_v45  ;;  %v1185_v17 = vsel %vm960_vm2, %v1182_v14, %v1184_v51  ;;  %v6312_v47 = vpop.permute.xlu2 %1241 }
 0x28b   : > { %v1132_v11 = vadd.f32 %v1129_v38, %v1119_v15 }
 0x28c   : > { %v1137_v4 = vadd.f32 %v1135_v59, %v1133_v58  ;;  %v1534_v58 = vmul.f32 -0.21117634, %v6046_v52 }
 0x28d   : > { %v1136_v27 = vadd.f32 %v1134_v39, %v1132_v11  ;;  %v1574_v39 = vmul.f32 0.0696144, %v5980_v12 }
 0x28e   : > { %v1150_v21 = vadd.f32 %v1145_v43, %v1137_v4  ;;  %v1547_v43 = vmul.f32 0.22176334, %v6046_v52 }
 0x28f   : > { %1450 = vrot.lane.b32.xlu1 %v1446_v37, %s5533_s8  ;;  %1508 = vrot.lane.b32.xlu0 %v1504_v10, %s5533_s8  ;;  %v1149_v45 = vadd.f32 %v1146_v1, %v1136_v27 }
 0x290   : > { %1497 = vrot.lane.b32.xlu2 %v1492_v46, %s5530_s16  ;;  %v1163_v55 = vadd.f32 %v6264_v0, %v1150_v21 }
 0x291   : > { %v1156_v2 = vpop.permute.xlu1 %1155  ;;  %v1214_v62 = vpop.permute.xlu0 %1213 }
 0x292   : > { %v1159_v35 = vsel %vm376_vm1, %v1156_v2, %v6264_v0  ;;  %v6324_v41 = vpop.permute.xlu2 %1269  ;;  %v1248_v2 = vmul.f32 -0.015216408, %v6046_v52 }
 0x293   : > { %v1162_v13 = vadd.f32 %v1159_v35, %v1149_v45  ;;  %v1604_v35 = vmul.f32 0.18513244, %v5999_v30 }
 0x297   : > { %1465 = vrot.lane.b32.xlu1 %v1460_v8, %s5532_s24  ;;  %1523 = vrot.lane.b32.xlu0 %v1518_v26, %s5532_s24 }
 0x298   : > { %1521 = vrot.lane.b32.xlu2 %v1517_v22, %s5532_s24  ;;  %v1573_v22 = vmul.f32 0.0696144, %v6046_v52 }
 0x299   : > { %v1171_v14 = vpop.permute.xlu1 %1170  ;;  %v1229_v16 = vpop.permute.xlu0 %1228 }
 0x29a   : > { %v1172_v24 = vsel %vm946_vm3, %v1169_v31, %v1171_v14  ;;  %v1176_v0 = vadd.f32 %v1171_v14, %v1163_v55  ;;  %v6333_v25 = vpop.permute.xlu2 %1284  ;;  %v1230_v4 = vsel %vm946_vm3, %v6300_v20, %v1229_v16  ;;  %v1603_v20 = vmul.f32 0.18513244, %v6069_v18 }
 0x29b   : > { %v1175_v28 = vadd.f32 %v1172_v24, %v1162_v13  ;;  %v1629_v14 = vmul.f32 -0.055913843, %v6069_v18 }
 0x29c   : > { %v6335_v29 = vadd.f32 %v1184_v51, %v1176_v0 }
 0x29d   : > { %v6337_v54 = vadd.f32 %v1185_v17, %v1175_v28  ;;  %v1590_v17 = vmul.f32 0.20964414, %v6069_v18 }
 0x29f   : > { %1495 = vrot.lane.b32.xlu1 %v1491_v32, %s5530_s16  ;;  %1551 = vrot.lane.b32.xlu0 %v1547_v43, %s5530_s16 }
 0x2a0   : > { %1540 = vrot.lane.b32.xlu2 %v1535_v33, %s5531_s28 }
 0x2a1   : > { %v1201_v1 = vpop.permute.xlu1 %1200  ;;  %v1257_v34 = vpop.permute.xlu0 %1256 }
 0x2a2   : > { %v6346_v23 = vpop.permute.xlu2 %1312  ;;  %v1204_v31 = vsel %vm362_vm0, %v1201_v1, %v6288_v49  ;;  %v1249_v49 = vmul.f32 -0.015216408, %v5980_v12 }
 0x2a3   : > { %v1207_v51 = vadd.f32 %v1204_v31, %v1194_v40 }
 0x2a7   : > { %1510 = vrot.lane.b32.xlu1 %v1505_v6, %s5533_s8  ;;  %1566 = vrot.lane.b32.xlu0 %v1561_v5, %s5533_s8 }
 0x2a8   : > { %1564 = vrot.lane.b32.xlu2 %v1560_v44, %s5533_s8 }
 0x2a9   : > { %v1216_v15 = vpop.permute.xlu1 %1215  ;;  %v1272_v60 = vpop.permute.xlu0 %1271 }
 0x2aa   : > { %v1217_v56 = vsel %vm376_vm1, %v1214_v62, %v1216_v15  ;;  %v1221_v57 = vadd.f32 %v1216_v15, %v1208_v53  ;;  %v6359_v50 = vpop.permute.xlu2 %1327  ;;  %v1548_v62 = vmul.f32 0.22176334, %v5980_v12  ;;  %v1273_v6 = vsel %vm376_vm1, %v6324_v41, %v1272_v60 }
 0x2ab   : > { %v1220_v38 = vadd.f32 %v1217_v56, %v1207_v51  ;;  %v1305_v15 = vmul.f32 -0.041949794, %v5999_v30 }
 0x2ac   : > { %v1234_v59 = vadd.f32 %v1229_v16, %v1221_v57  ;;  %v1617_v16 = vmul.f32 0.041627076, %v5999_v30  ;;  %v1304_v57 = vmul.f32 -0.041949794, %v6069_v18 }
 0x2ad   : > { %v1233_v10 = vadd.f32 %v1230_v4, %v1220_v38 }
 0x2ae   : > { %v1247_v11 = vadd.f32 %v6312_v47, %v1234_v59 }
 0x2af   : > { %1538 = vrot.lane.b32.xlu1 %v1534_v58, %s5531_s28  ;;  %1594 = vrot.lane.b32.xlu0 %v1590_v17, %s5531_s28  ;;  %v1616_v58 = vmul.f32 0.041627076, %v6069_v18  ;;  %v1672_v17 = vmul.f32 0.13376883, %v6091_v3 }
 0x2b0   : > { %1579 = vrot.lane.b32.xlu2 %v1574_v39, %s5532_s24  ;;  %v1251_v27 = vadd.f32 %v1249_v49, %v1247_v11 }
 0x2b1   : > { %v1240_v37 = vpop.permute.xlu1 %1239  ;;  %v1296_v46 = vpop.permute.xlu0 %1295 }
 0x2b2   : > { %v1243_v21 = vsel %vm960_vm2, %v1240_v37, %v6312_v47  ;;  %v6373_v45 = vpop.permute.xlu2 %1351  ;;  %v1686_v37 = vmul.f32 0.2207129, %v6089_v63 }
 0x2b3   : > { %v1246_v55 = vadd.f32 %v1243_v21, %v1233_v10  ;;  %v1685_v21 = vmul.f32 0.2207129, %v6091_v3 }
 0x2b5   : > { %v1250_v13 = vadd.f32 %v1248_v2, %v1246_v55 }
 0x2b7   : > { %1553 = vrot.lane.b32.xlu1 %v1548_v62, %s5530_s16  ;;  %1609 = vrot.lane.b32.xlu0 %v1604_v35, %s5530_s16 }
 0x2b8   : > { %1607 = vrot.lane.b32.xlu2 %v1603_v20, %s5530_s16 }
 0x2b9   : > { %v1259_v8 = vpop.permute.xlu1 %1258  ;;  %v1315_v47 = vpop.permute.xlu0 %1314 }
 0x2ba   : > { %v6382_v26 = vpop.permute.xlu2 %1370  ;;  %v1260_v24 = vsel %vm362_vm0, %v1257_v34, %v1259_v8  ;;  %v1264_v0 = vadd.f32 %v1259_v8, %v1251_v27  ;;  %v1646_v34 = vmul.f32 0.11893335, %v6091_v3  ;;  %v1630_v27 = vmul.f32 -0.055913843, %v5999_v30 }
 0x2bb   : > { %v1263_v33 = vadd.f32 %v1260_v24, %v1250_v13  ;;  %v1316_v10 = vsel %vm362_vm0, %v6346_v23, %v1315_v47  ;;  %v1659_v24 = vmul.f32 -0.027986418, %v6091_v3 }
 0x2bc   : > { %v1277_v1 = vadd.f32 %v1272_v60, %v1264_v0  ;;  %v1715_v0 = vmul.f32 -0.294149, %v6136_v7 }
 0x2bd   : > { %v1276_v9 = vadd.f32 %v1273_v6, %v1263_v33  ;;  %v1703_v33 = vmul.f32 0.21433999, %v6134_v61  ;;  %v1729_v6 = vmul.f32 -0.08435081, %v6134_v61 }
 0x2be   : > { %v1290_v44 = vadd.f32 %v6333_v25, %v1277_v1 }
 0x2bf   : > { %1577 = vrot.lane.b32.xlu1 %v1573_v22, %s5532_s24  ;;  %1633 = vrot.lane.b32.xlu0 %v1629_v14, %s5532_s24  ;;  %v1361_v14 = vmul.f32 0.0139814215, %v6089_v63 }
 0x2c0   : > { %1622 = vrot.lane.b32.xlu2 %v1617_v16, %s5533_s8 }
 0x2c1   : > { %v1283_v28 = vpop.permute.xlu1 %1282  ;;  %v1339_v32 = vpop.permute.xlu0 %1338 }
 0x2c2   : > { %v6391_v43 = vpop.permute.xlu2 %1394  ;;  %v1286_v5 = vsel %vm946_vm3, %v1283_v28, %v6333_v25  ;;  %v1660_v25 = vmul.f32 -0.027986418, %v6089_v63 }
 0x2c3   : > { %v1289_v53 = vadd.f32 %v1286_v5, %v1276_v9  ;;  %v1728_v5 = vmul.f32 -0.08435081, %v6136_v7 }
 0x2c7   : > { %1596 = vrot.lane.b32.xlu1 %v1591_v36, %s5531_s28  ;;  %1652 = vrot.lane.b32.xlu0 %v1647_v48, %s5531_s28  ;;  %v1673_v48 = vmul.f32 0.13376883, %v6089_v63 }
 0x2c8   : > { %1650 = vrot.lane.b32.xlu2 %v1646_v34, %s5531_s28 }
 0x2c9   : > { %v1298_v31 = vpop.permute.xlu1 %1297  ;;  %v1354_v40 = vpop.permute.xlu0 %1353 }
 0x2ca   : > { %v1299_v41 = vsel %vm960_vm2, %v1296_v46, %v1298_v31  ;;  %v1303_v60 = vadd.f32 %v1298_v31, %v1290_v44  ;;  %v6406_v56 = vpop.permute.xlu2 %1409 }
 0x2cb   : > { %v1302_v51 = vadd.f32 %v1299_v41, %v1289_v53  ;;  %v6453_v53 = vmax.f32 %v6337_v54, 0.0 }
 0x2cc   : > { %v1307_v59 = vadd.f32 %v1305_v15, %v1303_v60 }
 0x2cd   : > { %v1306_v38 = vadd.f32 %v1304_v57, %v1302_v51 }
 0x2ce   : > { %v1320_v4 = vadd.f32 %v1315_v47, %v1307_v59  ;;  %v1355_v47 = vsel %vm960_vm2, %v6373_v45, %v1354_v40  ;;  %v1702_v59 = vmul.f32 0.21433999, %v6136_v7 }
 0x2cf   : > { %1620 = vrot.lane.b32.xlu1 %v1616_v58, %s5533_s8  ;;  %1676 = vrot.lane.b32.xlu0 %v1672_v17, %s5533_s8  ;;  %v1319_v55 = vadd.f32 %v1316_v10, %v1306_v38  ;;  %v1758_v38 = vmul.f32 0.057952914, %v6453_v53  ;;  %v1742_v58 = vmul.f32 0.13854894, %v6134_v61  ;;  %v1417_v17 = vmul.f32 -0.013704981, %v6134_v61 }
 0x2d0   : > { %1665 = vrot.lane.b32.xlu2 %v1660_v25, %s5530_s16  ;;  %v1333_v2 = vadd.f32 %v6359_v50, %v1320_v4 }
 0x2d1   : > { %v1326_v39 = vpop.permute.xlu1 %1325  ;;  %v1382_v49 = vpop.permute.xlu0 %1381 }
 0x2d2   : > { %v6415_v11 = vpop.permute.xlu2 %1437  ;;  %v1329_v46 = vsel %vm376_vm1, %v1326_v39, %v6359_v50  ;;  %v1360_v50 = vmul.f32 0.0139814215, %v6091_v3  ;;  %v1191_v39 = vmax.f32 %v6335_v29, 0.0 }
 0x2d3   : > { %v1332_v62 = vadd.f32 %v1329_v46, %v1319_v55  ;;  %v1716_v55 = vmul.f32 -0.294149, %v6134_v61 }
 0x2d7   : > { %1635 = vrot.lane.b32.xlu1 %v1630_v27, %s5532_s24  ;;  %1691 = vrot.lane.b32.xlu0 %v1686_v37, %s5532_s24 }
 0x2d8   : > { %1689 = vrot.lane.b32.xlu2 %v1685_v21, %s5532_s24  ;;  %v1416_v21 = vmul.f32 -0.013704981, %v6136_v7 }
 0x2d9   : > { %v1341_v35 = vpop.permute.xlu1 %1340  ;;  %v1397_v13 = vpop.permute.xlu0 %1396 }
 0x2da   : > { %v1342_v20 = vsel %vm946_vm3, %v1339_v32, %v1341_v35  ;;  %v1346_v23 = vadd.f32 %v1341_v35, %v1333_v2  ;;  %v6435_v28 = vpop.permute.xlu2 %1452  ;;  %v1398_v54 = vsel %vm946_vm3, %v6391_v43, %v1397_v13  ;;  %v1770_v2 = vmul.f32 0.018119665, %v1191_v39 }
 0x2db   : > { %v1345_v8 = vadd.f32 %v1342_v20, %v1332_v62  ;;  %v1769_v62 = vmul.f32 0.018119665, %v6453_v53  ;;  %v1791_v20 = vmul.f32 0.11701953, %v6453_v53 }
 0x2dc   : > { %v1359_v22 = vadd.f32 %v1354_v40, %v1346_v23  ;;  %v1781_v23 = vmul.f32 0.04572019, %v1191_v39 }
 0x2dd   : > { %v1358_v16 = vadd.f32 %v1355_v47, %v1345_v8 }
 0x2de   : > { %v1363_v32 = vadd.f32 %v1361_v14, %v1359_v22 }
 0x2df   : > { %1663 = vrot.lane.b32.xlu1 %v1659_v24, %s5530_s16  ;;  %1719 = vrot.lane.b32.xlu0 %v1715_v0, %s5530_s16  ;;  %v1362_v45 = vadd.f32 %v1360_v50, %v1358_v16  ;;  %v1759_v0 = vmul.f32 0.057952914, %v1191_v39 }
 0x2e0   : > { %1708 = vrot.lane.b32.xlu2 %v1703_v33, %s5531_s28  ;;  %v1376_v44 = vadd.f32 %v6382_v26, %v1363_v32 }
 0x2e1   : > { %v1369_v1 = vpop.permute.xlu1 %1368  ;;  %v1425_v36 = vpop.permute.xlu0 %1424 }
 0x2e2   : > { %v1372_v34 = vsel %vm362_vm0, %v1369_v1, %v6382_v26  ;;  %v6448_v9 = vpop.permute.xlu2 %1482 }
 0x2e3   : > { %v1375_v60 = vadd.f32 %v1372_v34, %v1362_v45 }
 0x2e7   : > { %1678 = vrot.lane.b32.xlu1 %v1673_v48, %s5533_s8  ;;  %1734 = vrot.lane.b32.xlu0 %v1729_v6, %s5533_s8 }
 0x2e8   : > { %1732 = vrot.lane.b32.xlu2 %v1728_v5, %s5533_s8 }
 0x2e9   : > { %v1384_v31 = vpop.permute.xlu1 %1383  ;;  %v1440_v40 = vpop.permute.xlu0 %1439 }
 0x2ea   : > { %v1385_v15 = vsel %vm376_vm1, %v1382_v49, %v1384_v31  ;;  %v1389_v41 = vadd.f32 %v1384_v31, %v1376_v44  ;;  %v6467_v37 = vpop.permute.xlu2 %1497  ;;  %v1441_v50 = vsel %vm376_vm1, %v6415_v11, %v1440_v40  ;;  %v1780_v11 = vmul.f32 0.04572019, %v6453_v53 }
 0x2eb   : > { %v1388_v51 = vadd.f32 %v1385_v15, %v1375_v60 }
 0x2ec   : > { %v1402_v57 = vadd.f32 %v1397_v13, %v1389_v41 }
 0x2ed   : > { %v1401_v4 = vadd.f32 %v1398_v54, %v1388_v51 }
 0x2ee   : > { %v1415_v26 = vadd.f32 %v6406_v56, %v1402_v57  ;;  %v1474_v57 = vmul.f32 0.18445475, %v6027_v19 }
 0x2ef   : > { %1706 = vrot.lane.b32.xlu1 %v1702_v59, %s5531_s28  ;;  %1762 = vrot.lane.b32.xlu0 %v1758_v38, %s5531_s28 }
 0x2f0   : > { %1747 = vrot.lane.b32.xlu2 %v1742_v58, %s5532_s24  ;;  %v1419_v25 = vadd.f32 %v1417_v17, %v1415_v26  ;;  %v1792_v26 = vmul.f32 0.11701953, %v1191_v39 }
 0x2f1   : > { %v1408_v49 = vpop.permute.xlu1 %1407  ;;  %v1464_v27 = vpop.permute.xlu0 %1463 }
 0x2f2   : > { %v1411_v10 = vsel %vm960_vm2, %v1408_v49, %v6406_v56  ;;  %v1522_v13 = vpop.permute.xlu2 %1521  ;;  %v1741_v56 = vmul.f32 0.13854894, %v6136_v7 }
 0x2f3   : > { %v1414_v46 = vadd.f32 %v1411_v10, %v1401_v4 }
 0x2f5   : > { %v1418_v43 = vadd.f32 %v1416_v21, %v1414_v46 }
 0x2f7   : > { %1721 = vrot.lane.b32.xlu1 %v1716_v55, %s5530_s16  ;;  %1775 = vrot.lane.b32.xlu0 %v1770_v2, %s5530_s16 }
 0x2f8   : > { %1773 = vrot.lane.b32.xlu2 %v1769_v62, %s5530_s16  ;;  %v1531_v62 = vmul.f32 0.30051112, %v5980_v12 }
 0x2f9   : > { %v1427_v29 = vpop.permute.xlu1 %1426  ;;  %v1485_v35 = vpop.permute.xlu0 %1484 }
 0x2fa   : > { %v1428_v8 = vsel %vm362_vm0, %v1425_v36, %v1427_v29  ;;  %v1432_v47 = vadd.f32 %v1427_v29, %v1419_v25  ;;  %v6485_v33 = vpop.permute.xlu2 %1540  ;;  %v1486_v58 = vsel %vm362_vm0, %v6448_v9, %v1485_v35 }
 0x2fb   : > { %v1431_v16 = vadd.f32 %v1428_v8, %v1418_v43 }
 0x2fc   : > { %v1445_v24 = vadd.f32 %v1440_v40, %v1432_v47  ;;  %v1475_v40 = vmul.f32 0.18445475, %v5949_v42  ;;  %v1476_v42 = vadd.f32 -0.08185959, %v1474_v57 }
 0x2fd   : > { %v1444_v45 = vadd.f32 %v1441_v50, %v1431_v16 }
 0x2fe   : > { %v1458_v1 = vadd.f32 %v6435_v28, %v1445_v24  ;;  %v1477_v38 = vadd.f32 -0.08185959, %v1475_v40  ;;  %v1489_v49 = vadd.f32 %v1486_v58, %v1476_v42 }
 0x2ff   : > { %1745 = vrot.lane.b32.xlu1 %v1741_v56, %s5532_s24  ;;  %1795 = vrot.lane.b32.xlu0 %v1791_v20, %s5532_s24 }
 0x300   : > { %1786 = vrot.lane.b32.xlu2 %v1781_v23, %s5533_s8  ;;  %v1490_v17 = vadd.f32 %v1485_v35, %v1477_v38 }
 0x301   : > { %v1451_v22 = vpop.permute.xlu1 %1450  ;;  %v1509_v14 = vpop.permute.xlu0 %1508 }
 0x302   : > { %v1454_v32 = vsel %vm946_vm3, %v1451_v22, %v6435_v28  ;;  %v1565_v28 = vpop.permute.xlu2 %1564  ;;  %v1503_v4 = vadd.f32 %v6467_v37, %v1490_v17 }
 0x303   : > { %v1457_v36 = vadd.f32 %v1454_v32, %v1444_v45 }
 0x307   : > { %1764 = vrot.lane.b32.xlu1 %v1759_v0, %s5531_s28 }
 0x309   : > { %v1466_v48 = vpop.permute.xlu1 %1465  ;;  %v1524_v6 = vpop.permute.xlu0 %1523 }
 0x30a   : > { %v1467_v5 = vsel %vm960_vm2, %v1464_v27, %v1466_v48  ;;  %v1471_v34 = vadd.f32 %v1466_v48, %v1458_v1  ;;  %v1580_v9 = vpop.permute.xlu2 %1579  ;;  %v1525_v2 = vsel %vm960_vm2, %v1522_v13, %v1524_v6  ;;  %v1587_v48 = vmul.f32 -0.22661513, %v5999_v30 }
 0x30b   : > { %v1470_v44 = vadd.f32 %v1467_v5, %v1457_v36 }
 0x30c   : > { %v1473_v31 = vmax.f32 %v1471_v34, 0.0 }
 0x30d   : > { %v6492_v15 = vmax.f32 %v1470_v44, 0.0 }
 0x30e   : > { %v1805_v41 = vmul.f32 -0.051755685, %v1473_v31  ;;  %v1816_v19 = vmul.f32 -0.14754757, %v1473_v31  ;;  %v1838_v56 = vmul.f32 0.22596815, %v1473_v31 }
 0x30f   : > { %1784 = vrot.lane.b32.xlu1 %v1780_v11, %s5533_s8  ;;  %v1804_v60 = vmul.f32 -0.051755685, %v6492_v15  ;;  %v1826_v25 = vmul.f32 -0.15957423, %v6492_v15  ;;  %v1815_v35 = vmul.f32 -0.14754757, %v6492_v15 }
 0x310   : > { %1810 = vrot.lane.b32.xlu0 %v1805_v41, %s5531_s28  ;;  %v1837_v8 = vmul.f32 0.22596815, %v6492_v15  ;;  %v1827_v12 = vmul.f32 -0.15957423, %v1473_v31  ;;  %v1586_v41 = vmul.f32 -0.22661513, %v6069_v18 }
 0x311   : > { %v1496_v51 = vpop.permute.xlu1 %1495  ;;  %v1552_v59 = vpop.permute.xlu0 %1551  ;;  %1808 = vrot.lane.b32.xlu2 %v1804_v60, %s5531_s28 }
 0x312   : > { %v1499_v54 = vsel %vm376_vm1, %v1496_v51, %v6467_v37  ;;  %v1530_v37 = vmul.f32 0.30051112, %v6046_v52  ;;  %v1608_v13 = vpop.permute.xlu2 %1607 }
 0x313   : > { %v1502_v27 = vadd.f32 %v1499_v54, %v1489_v49 }
 0x317   : > { %1797 = vrot.lane.b32.xlu1 %v1792_v26, %s5532_s24 }
 0x318   : > { %1830 = vrot.lane.b32.xlu0 %v1826_v25, %s5533_s8 }
 0x319   : > { %v1511_v10 = vpop.permute.xlu1 %1510  ;;  %v1567_v46 = vpop.permute.xlu0 %1566  ;;  %1821 = vrot.lane.b32.xlu2 %v1816_v19, %s5530_s16 }
 0x31a   : > { %v1512_v39 = vsel %vm946_vm3, %v1509_v14, %v1511_v10  ;;  %v1516_v21 = vadd.f32 %v1511_v10, %v1503_v4  ;;  %v1623_v36 = vpop.permute.xlu2 %1622  ;;  %v1568_v5 = vsel %vm946_vm3, %v1565_v28, %v1567_v46 }
 0x31b   : > { %v1515_v55 = vadd.f32 %v1512_v39, %v1502_v27  ;;  %v1643_v27 = vmul.f32 -0.2595387, %v6089_v63 }
 0x31c   : > { %v1529_v43 = vadd.f32 %v1524_v6, %v1516_v21 }
 0x31d   : > { %v1528_v29 = vadd.f32 %v1525_v2, %v1515_v55 }
 0x31e   : > { %v1533_v20 = vadd.f32 %v1531_v62, %v1529_v43 }
 0x31f   : > { %1819 = vrot.lane.b32.xlu1 %v1815_v35, %s5530_s16  ;;  %v1532_v23 = vadd.f32 %v1530_v37, %v1528_v29 }
 0x320   : > { %1843 = vrot.lane.b32.xlu0 %v1838_v56, %s5532_s24  ;;  %v1546_v14 = vadd.f32 %v6485_v33, %v1533_v20 }
 0x321   : > { %v1539_v47 = vpop.permute.xlu1 %1538  ;;  %v1595_v22 = vpop.permute.xlu0 %1594  ;;  %1841 = vrot.lane.b32.xlu2 %v1837_v8, %s5532_s24 }
 0x322   : > { %v1542_v52 = vsel %vm362_vm0, %v1539_v47, %v6485_v33  ;;  %v1651_v57 = vpop.permute.xlu2 %1650 }
 0x323   : > { %v1545_v32 = vadd.f32 %v1542_v52, %v1532_v23 }
 0x327   : > { %1832 = vrot.lane.b32.xlu1 %v1827_v12, %s5533_s8 }
 0x329   : > { %v1554_v16 = vpop.permute.xlu1 %1553  ;;  %v1610_v24 = vpop.permute.xlu0 %1609 }
 0x32a   : > { %v1555_v0 = vsel %vm376_vm1, %v1552_v59, %v1554_v16  ;;  %v1559_v50 = vadd.f32 %v1554_v16, %v1546_v14  ;;  %v1666_v42 = vpop.permute.xlu2 %1665  ;;  %v1611_v54 = vsel %vm376_vm1, %v1608_v13, %v1610_v24  ;;  %v1699_v14 = vmul.f32 0.28645957, %v6134_v61 }
 0x32b   : > { %v1558_v1 = vadd.f32 %v1555_v0, %v1545_v32 }
 0x32c   : > { %v1572_v45 = vadd.f32 %v1567_v46, %v1559_v50 }
 0x32d   : > { %v1571_v31 = vadd.f32 %v1568_v5, %v1558_v1 }
 0x32e   : > { %v1585_v6 = vadd.f32 %v1580_v9, %v1572_v45 }
 0x330   : > { %v1589_v34 = vadd.f32 %v1587_v48, %v1585_v6 }
 0x331   : > { %v1578_v44 = vpop.permute.xlu1 %1577  ;;  %v1634_v11 = vpop.permute.xlu0 %1633 }
 0x332   : > { %v1581_v33 = vsel %vm960_vm2, %v1578_v44, %v1580_v9  ;;  %v1642_v9 = vmul.f32 -0.2595387, %v6091_v3  ;;  %v1690_v2 = vpop.permute.xlu2 %1689 }
 0x333   : > { %v1584_v40 = vadd.f32 %v1581_v33, %v1571_v31 }
 0x335   : > { %v1588_v60 = vadd.f32 %v1586_v41, %v1584_v40 }
 0x339   : > { %v1597_v51 = vpop.permute.xlu1 %1596  ;;  %v1653_v59 = vpop.permute.xlu0 %1652 }
 0x33a   : > { %v1598_v38 = vsel %vm362_vm0, %v1595_v22, %v1597_v51  ;;  %v1602_v58 = vadd.f32 %v1597_v51, %v1589_v34  ;;  %v1654_v37 = vsel %vm362_vm0, %v1651_v57, %v1653_v59  ;;  %v1709_v20 = vpop.permute.xlu2 %1708 }
 0x33b   : > { %v1601_v28 = vadd.f32 %v1598_v38, %v1588_v60 }
 0x33c   : > { %v1615_v26 = vadd.f32 %v1610_v24, %v1602_v58  ;;  %v1698_v24 = vmul.f32 0.28645957, %v6136_v7 }
 0x33d   : > { %v1614_v49 = vadd.f32 %v1611_v54, %v1601_v28 }
 0x33e   : > { %v1628_v19 = vadd.f32 %v1623_v36, %v1615_v26 }
 0x341   : > { %v1621_v30 = vpop.permute.xlu1 %1620  ;;  %v1677_v17 = vpop.permute.xlu0 %1676 }
 0x342   : > { %v1624_v25 = vsel %vm946_vm3, %v1621_v30, %v1623_v36  ;;  %v1733_v45 = vpop.permute.xlu2 %1732 }
 0x343   : > { %v1627_v4 = vadd.f32 %v1624_v25, %v1614_v49  ;;  %v1756_v49 = vmul.f32 0.22080249, %v6453_v53 }
 0x349   : > { %v1636_v18 = vpop.permute.xlu1 %1635  ;;  %v1692_v21 = vpop.permute.xlu0 %1691 }
 0x34a   : > { %v1637_v10 = vsel %vm960_vm2, %v1634_v11, %v1636_v18  ;;  %v1641_v46 = vadd.f32 %v1636_v18, %v1628_v19  ;;  %v1693_v12 = vsel %vm960_vm2, %v1690_v2, %v1692_v21  ;;  %v1748_v31 = vpop.permute.xlu2 %1747 }
 0x34b   : > { %v1640_v39 = vadd.f32 %v1637_v10, %v1627_v4  ;;  %v1757_v10 = vadd.f32 0.029995054, %v1756_v49 }
 0x34c   : > { %v1645_v55 = vadd.f32 %v1643_v27, %v1641_v46 }
 0x34d   : > { %v1644_v43 = vadd.f32 %v1642_v9, %v1640_v39 }
 0x34e   : > { %v1658_v29 = vadd.f32 %v1653_v59, %v1645_v55 }
 0x34f   : > { %v1657_v23 = vadd.f32 %v1654_v37, %v1644_v43 }
 0x350   : > { %v1671_v63 = vadd.f32 %v1666_v42, %v1658_v29 }
 0x351   : > { %v1664_v62 = vpop.permute.xlu1 %1663  ;;  %v1720_v35 = vpop.permute.xlu0 %1719 }
 0x352   : > { %v1667_v56 = vsel %vm376_vm1, %v1664_v62, %v1666_v42  ;;  %v1774_v30 = vpop.permute.xlu2 %1773 }
 0x353   : > { %v1670_v8 = vadd.f32 %v1667_v56, %v1657_v23  ;;  %v1802_v56 = vmul.f32 -0.09562799, %v6492_v15 }
 0x359   : > { %v1679_v47 = vpop.permute.xlu1 %1678  ;;  %v1735_v50 = vpop.permute.xlu0 %1734 }
 0x35a   : > { %v1680_v22 = vsel %vm946_vm3, %v1677_v17, %v1679_v47  ;;  %v1684_v3 = vadd.f32 %v1679_v47, %v1671_v63  ;;  %v1736_v7 = vsel %vm946_vm3, %v1733_v45, %v1735_v50  ;;  %v1787_v19 = vpop.permute.xlu2 %1786 }
 0x35b   : > { %v1683_v13 = vadd.f32 %v1680_v22, %v1670_v8 }
 0x35c   : > { %v1697_v52 = vadd.f32 %v1692_v21, %v1684_v3 }
 0x35d   : > { %v1696_v16 = vadd.f32 %v1693_v12, %v1683_v13 }
 0x35e   : > { %v1701_v0 = vadd.f32 %v1699_v14, %v1697_v52 }
 0x35f   : > { %v1700_v32 = vadd.f32 %v1698_v24, %v1696_v16 }
 0x360   : > { %v1714_v48 = vadd.f32 %v1709_v20, %v1701_v0 }
 0x361   : > { %v1707_v1 = vpop.permute.xlu1 %1706  ;;  %v1763_v6 = vpop.permute.xlu0 %1762 }
 0x362   : > { %v1710_v36 = vsel %vm362_vm0, %v1707_v1, %v1709_v20  ;;  %v1897_v1 = vld [vmem:[#allocation11] sm:$0xff] }
 0x363   : > { %v1713_v11 = vadd.f32 %v1710_v36, %v1700_v32  ;;  %v5293_v36 = vld [vmem:[#allocation11 + $0x8] ss:$0 sm:$0xff] }
 0x364   : > { %1927 = vst [vmem:[#allocation12 + $0x40] sm:$0xff] %v5293_v36 }
 0x369   : > { %v1722_v5 = vpop.permute.xlu1 %1721  ;;  %v1776_v38 = vpop.permute.xlu0 %1775 }
 0x36a   : > { %v1723_v34 = vsel %vm376_vm1, %v1720_v35, %v1722_v5  ;;  %v1727_v44 = vadd.f32 %v1722_v5, %v1714_v48  ;;  %v1777_v55 = vsel %vm376_vm1, %v1774_v30, %v1776_v38  ;;  %v1901_v48 = vperm.slane %v1897_v1, 0 }
 0x36b   : > { %v1726_v61 = vadd.f32 %v1723_v34, %v1713_v11  ;;  %v1809_v2 = vpop.permute.xlu2 %1808  ;;  %v1903_v5 = vperm.slane %v1897_v1, 2  ;;  %v1904_v34 = vperm.slane %v1897_v1, 3  ;;  %v1906_v11 = vperm.slane %v1897_v1, 5 }
 0x36c   : > { %v1740_v33 = vadd.f32 %v1735_v50, %v1727_v44  ;;  %v1905_v44 = vperm.slane %v1897_v1, 4  ;;  %1919 = vst [vmem:[#allocation12] sm:$0xff] %v1901_v48 }
 0x36d   : > { %v1739_v57 = vadd.f32 %v1736_v7, %v1726_v61  ;;  %1921 = vst [vmem:[#allocation12 + $0x10] sm:$0xff] %v1903_v5  ;;  %v1908_v61 = vperm.slane %v1897_v1, 7 }
 0x36e   : > { %v1753_v40 = vadd.f32 %v1748_v31, %v1740_v33  ;;  %v1907_v33 = vperm.slane %v1897_v1, 6  ;;  %1922 = vst [vmem:[#allocation12 + $0x18] sm:$0xff] %v1904_v34 }
 0x36f   : > { %1923 = vst [vmem:[#allocation12 + $0x20] sm:$0xff] %v1905_v44 }
 0x370   : > { %v1755_v41 = vmax.f32 %v1753_v40, 0.0  ;;  %1924 = vst [vmem:[#allocation12 + $0x28] sm:$0xff] %v1906_v11 }
 0x371   : > { %v1746_v60 = vpop.permute.xlu1 %1745  ;;  %v1796_v25 = vpop.permute.xlu0 %1795  ;;  %1925 = vst [vmem:[#allocation12 + $0x30] sm:$0xff] %v1907_v33 }
 0x372   : > { %v1749_v51 = vsel %vm960_vm2, %v1746_v60, %v1748_v31  ;;  %v1851_v59 = vmul.f32 -0.004851798, %v1755_v41  ;;  %v1862_v4 = vmul.f32 -0.1386126, %v1755_v41  ;;  %v1873_v18 = vmul.f32 -0.124912374, %v1755_v41 }
 0x373   : > { %v1752_v58 = vadd.f32 %v1749_v51, %v1739_v57  ;;  %v1884_v9 = vmul.f32 -0.22474693, %v1755_v41  ;;  %v1822_v8 = vpop.permute.xlu2 %1821  ;;  %1926 = vst [vmem:[#allocation12 + $0x38] sm:$0xff] %v1908_v61 }
 0x374   : > { %1856 = vrot.lane.b32.xlu2 %v1851_v59, %s5531_s28 }
 0x375   : > { %v1754_v17 = vmax.f32 %v1752_v58, 0.0 }
 0x377   : > { %v1850_v42 = vmul.f32 -0.004851798, %v1754_v17  ;;  %v1861_v28 = vmul.f32 -0.1386126, %v1754_v17  ;;  %v1872_v54 = vmul.f32 -0.124912374, %v1754_v17 }
 0x378   : > { %v1883_v62 = vmul.f32 -0.22474693, %v1754_v17  ;;  %v1848_v32 = vmul.f32 0.12181416, %v1754_v17 }
 0x379   : > { %v1765_v26 = vpop.permute.xlu1 %1764  ;;  %1854 = vrot.lane.b32.xlu1 %v1850_v42, %s5531_s28  ;;  %1865 = vrot.lane.b32.xlu0 %v1861_v28, %s5530_s16 }
 0x37a   : > { %v1766_v27 = vsel %vm362_vm0, %v1763_v6, %v1765_v26  ;;  %v1902_v6 = vperm.slane %v1897_v1, 1 }
 0x37b   : > { %v1768_v39 = vadd.f32 %v1766_v27, %v1757_v10  ;;  %v1842_v24 = vpop.permute.xlu2 %1841 }
 0x37c   : > { %1876 = vrot.lane.b32.xlu2 %v1872_v54, %s5533_s8  ;;  %1920 = vst [vmem:[#allocation12 + $0x8] sm:$0xff] %v1902_v6 }
 0x37d   : > { %v1779_v43 = vadd.f32 %v1777_v55, %v1768_v39 }
 0x381   : > { %1867 = vrot.lane.b32.xlu1 %v1862_v4, %s5530_s16  ;;  %v1785_v46 = vpop.permute.xlu1 %1784  ;;  %1878 = vrot.lane.b32.xlu0 %v1873_v18, %s5533_s8 }
 0x382   : > { %v1811_v21 = vpop.permute.xlu0 %1810  ;;  %v1788_v53 = vsel %vm946_vm3, %v1785_v46, %v1787_v19 }
 0x383   : > { %v1790_v29 = vadd.f32 %v1788_v53, %v1779_v43  ;;  %v1812_v22 = vsel %vm362_vm0, %v1809_v2, %v1811_v21 }
 0x384   : > { %1889 = vrot.lane.b32.xlu2 %v1884_v9, %s5532_s24 }
 0x389   : > { %1887 = vrot.lane.b32.xlu1 %v1883_v62, %s5532_s24  ;;  %v1798_v35 = vpop.permute.xlu1 %1797 }
 0x38a   : > { %v1799_v37 = vsel %vm960_vm2, %v1796_v25, %v1798_v35  ;;  %v1831_v63 = vpop.permute.xlu0 %1830 }
 0x38b   : > { %v1801_v20 = vadd.f32 %v1799_v37, %v1790_v29 }
 0x38d   : > { %v1803_v23 = vadd.f32 %v1802_v56, %v1801_v20 }
 0x38f   : > { %v1814_v13 = vadd.f32 %v1812_v22, %v1803_v23 }
 0x391   : > { %v1820_v47 = vpop.permute.xlu1 %1819 }
 0x392   : > { %v1823_v3 = vsel %vm376_vm1, %v1820_v47, %v1822_v8  ;;  %v1844_v52 = vpop.permute.xlu0 %1843 }
 0x393   : > { %v1825_v12 = vadd.f32 %v1823_v3, %v1814_v13  ;;  %v1845_v50 = vsel %vm960_vm2, %v1842_v24, %v1844_v52 }
 0x399   : > { %v1833_v14 = vpop.permute.xlu1 %1832 }
 0x39a   : > { %v1834_v16 = vsel %vm946_vm3, %v1831_v63, %v1833_v14 }
 0x39b   : > { %v1836_v0 = vadd.f32 %v1834_v16, %v1825_v12 }
 0x39d   : > { %v1847_v15 = vadd.f32 %v1845_v50, %v1836_v0 }
 0x39f   : > { %v1849_v45 = vadd.f32 %v1848_v32, %v1847_v15 }
 0x3ce   : > { %v1857_v31 = vpop.permute.xlu2 %1856 }
 0x3d6   : > { %v1877_v41 = vpop.permute.xlu2 %1876 }
 0x3de   : > { %v1890_v17 = vpop.permute.xlu2 %1889 }
 0x3eb   : > { %v1855_v40 = vpop.permute.xlu1 %1854  ;;  %v1866_v7 = vpop.permute.xlu0 %1865 }
 0x3ec   : > { %v1858_v60 = vsel %vm362_vm0, %v1855_v40, %v1857_v31 }
 0x3ed   : > { %v1860_v59 = vadd.f32 %v1858_v60, %v1849_v45 }
 0x3f3   : > { %v1868_v57 = vpop.permute.xlu1 %1867  ;;  %v1879_v58 = vpop.permute.xlu0 %1878 }
 0x3f4   : > { %v1869_v51 = vsel %vm376_vm1, %v1866_v7, %v1868_v57  ;;  %v1880_v30 = vsel %vm946_vm3, %v1877_v41, %v1879_v58 }
 0x3f5   : > { %v1871_v38 = vadd.f32 %v1869_v51, %v1860_v59 }
 0x3f7   : > { %v1882_v42 = vadd.f32 %v1880_v30, %v1871_v38 }
 0x3fb   : > { %v1888_v28 = vpop.permute.xlu1 %1887 }
 0x3fc   : > { %v1891_v26 = vsel %vm960_vm2, %v1888_v28, %v1890_v17 }
 0x3fd   : > { %v1893_v54 = vadd.f32 %v1891_v26, %v1882_v42 }
 0x3ff   : > { %v1894_v25 = vmax.f32 %v1893_v54, 0.0 }
 0x401   : > { %v1895_v49 = vpack.c.bf16 %v1894_v25, %v1894_v25 }
 0x403   : > { %1896 = vst [vmem:[#allocation2] sm:$0xf] %v1895_v49 }
 0x404 PF: > { %v4081_v19 = vld [vmem:[%s5715_s12 + $0xa8] sm:$0xf]  ;;  %v4982_v4 = vld [vmem:[%s5715_s12 + $0xb0] sm:$0xf0]  ;;  %v4981_v18 = vld [vmem:[%s5715_s12 + $0xac] sm:$0xf] }
 0x405   : > { %v4082_v27 = vor.u32 %v4982_v4, %v4081_v19  ;;  %v4083_v10 = vld [vmem:[%s5715_s12 + $0xb4] sm:$0xf0]  ;;  %v4089_v46 = vld [vmem:[%s5715_s12 + $0xb0] sm:$0xf]  ;;  %v4983_v9 = vld [vmem:[%s5715_s12 + $0xb8] sm:$0xf0] }
 0x406   : > { %v4086_v39 = vor.u32 %v4981_v18, %v4083_v10  ;;  %v4090_v21 = vor.u32 %v4983_v9, %v4089_v46  ;;  %v4069_v55 = vld [vmem:[%s5715_s12 + $0x90] sm:$0xf]  ;;  %v4979_v53 = vld [vmem:[%s5715_s12 + $0x98] sm:$0xf0]  ;;  %v4978_v2 = vld [vmem:[%s5715_s12 + $0x94] sm:$0xf] }
 0x407   : > { %2097 = vmatpush.bf16.msra.mxu0 %v4082_v27  ;;  %v4070_v43 = vor.u32 %v4979_v53, %v4069_v55  ;;  %v4071_v62 = vld [vmem:[%s5715_s12 + $0x9c] sm:$0xf0]  ;;  %v4077_v29 = vld [vmem:[%s5715_s12 + $0x98] sm:$0xf]  ;;  %v4980_v35 = vld [vmem:[%s5715_s12 + $0xa0] sm:$0xf0] }
 0x408   : > { %2110 = vmatpush.bf16.msra.mxu1 %v4086_v39  ;;  %2123 = vmatpush.bf16.msra.mxu2 %v4090_v21  ;;  %v4074_v37 = vor.u32 %v4978_v2, %v4071_v62  ;;  %v4078_v56 = vor.u32 %v4980_v35, %v4077_v29  ;;  %v4057_v20 = vld [vmem:[%s5715_s12 + $0x78] sm:$0xf]  ;;  %v4976_v23 = vld [vmem:[%s5715_s12 + $0x80] sm:$0xf0]  ;;  %v4975_v63 = vld [vmem:[%s5715_s12 + $0x7c] sm:$0xf] }
 0x409   : > { %v4059_v8 = vld [vmem:[%s5715_s12 + $0x84] sm:$0xf0]  ;;  %v4065_v47 = vld [vmem:[%s5715_s12 + $0x80] sm:$0xf]  ;;  %v4977_v22 = vld [vmem:[%s5715_s12 + $0x88] sm:$0xf0]  ;;  %v4058_v3 = vor.u32 %v4976_v23, %v4057_v20 }
 0x40a   : > { %v4062_v13 = vor.u32 %v4975_v63, %v4059_v8  ;;  %v4066_v12 = vor.u32 %v4977_v22, %v4065_v47  ;;  %v4045_v52 = vld [vmem:[%s5715_s12 + $0x60] sm:$0xf]  ;;  %v4973_v14 = vld [vmem:[%s5715_s12 + $0x68] sm:$0xf0]  ;;  %v4972_v16 = vld [vmem:[%s5715_s12 + $0x64] sm:$0xf] }
 0x40b   : > { %2098 = vmatpush.bf16.msra.mxu0 %v4070_v43  ;;  %v4047_v24 = vld [vmem:[%s5715_s12 + $0x6c] sm:$0xf0]  ;;  %v4053_v0 = vld [vmem:[%s5715_s12 + $0x68] sm:$0xf]  ;;  %v4974_v50 = vld [vmem:[%s5715_s12 + $0x70] sm:$0xf0]  ;;  %v4046_v15 = vor.u32 %v4973_v14, %v4045_v52 }
 0x40c   : > { %2111 = vmatpush.bf16.msra.mxu1 %v4074_v37  ;;  %2124 = vmatpush.bf16.msra.mxu2 %v4078_v56  ;;  %v4050_v32 = vor.u32 %v4972_v16, %v4047_v24  ;;  %v4054_v45 = vor.u32 %v4974_v50, %v4053_v0  ;;  %v4033_v1 = vld [vmem:[%s5715_s12 + $0x48] sm:$0xf]  ;;  %v4970_v36 = vld [vmem:[%s5715_s12 + $0x50] sm:$0xf0]  ;;  %v4969_v48 = vld [vmem:[%s5715_s12 + $0x4c] sm:$0xf] }
 0x40d   : > { %v4035_v6 = vld [vmem:[%s5715_s12 + $0x54] sm:$0xf0]  ;;  %v4041_v5 = vld [vmem:[%s5715_s12 + $0x50] sm:$0xf]  ;;  %v4971_v34 = vld [vmem:[%s5715_s12 + $0x58] sm:$0xf0]  ;;  %v4034_v44 = vor.u32 %v4970_v36, %v4033_v1 }
 0x40e   : > { %v4021_v31 = vld [vmem:[%s5715_s12 + $0x30] sm:$0xf]  ;;  %v4967_v11 = vld [vmem:[%s5715_s12 + $0x38] sm:$0xf0]  ;;  %v4038_v33 = vor.u32 %v4969_v48, %v4035_v6  ;;  %v4042_v61 = vor.u32 %v4971_v34, %v4041_v5  ;;  %v4966_v40 = vld [vmem:[%s5715_s12 + $0x34] sm:$0xf] }
 0x40f   : > { %2099 = vmatpush.bf16.msra.mxu0 %v4058_v3  ;;  %v4345_v7 = vld [vmem:[%s5723_s15 + $0x1f8] sm:$0xf]  ;;  %v5051_v41 = vld [vmem:[%s5723_s15 + $0x218] sm:$0xf0]  ;;  %v4029_v57 = vld [vmem:[%s5715_s12 + $0x38] sm:$0xf]  ;;  %v4022_v30 = vor.u32 %v4967_v11, %v4021_v31 }
 0x410   : > { %2112 = vmatpush.bf16.msra.mxu1 %v4062_v13  ;;  %2125 = vmatpush.bf16.msra.mxu2 %v4066_v12  ;;  %v4023_v60 = vld [vmem:[%s5715_s12 + $0x3c] sm:$0xf0]  ;;  %v4968_v51 = vld [vmem:[%s5715_s12 + $0x40] sm:$0xf0]  ;;  %v4346_v59 = vor.u32 %v5051_v41, %v4345_v7  ;;  %v4309_v38 = vld [vmem:[%s5723_s15 + $0x1b0] sm:$0xf] }
 0x411   : > { %v5042_v58 = vld [vmem:[%s5723_s15 + $0x1d0] sm:$0xf0]  ;;  %v4964_v42 = vld [vmem:[%s5715_s12 + $0x20] sm:$0xf0]  ;;  %v4026_v26 = vor.u32 %v4966_v40, %v4023_v60  ;;  %v4030_v54 = vor.u32 %v4968_v51, %v4029_v57  ;;  %v4011_v49 = vld [vmem:[%s5715_s12 + $0x24] sm:$0xf0] }
 0x412   : > { %v4009_v17 = vld [vmem:[%s5715_s12 + $0x18] sm:$0xf]  ;;  %3492 = vmatpush.bf16.msra.mxu3 %v4346_v59  ;;  %v4310_v28 = vor.u32 %v5042_v58, %v4309_v38  ;;  %v4963_v25 = vld [vmem:[%s5715_s12 + $0x1c] sm:$0xf]  ;;  %v4017_v19 = vld [vmem:[%s5715_s12 + $0x20] sm:$0xf] }
 0x413   : > { %2100 = vmatpush.bf16.msra.mxu0 %v4046_v15  ;;  %v4965_v4 = vld [vmem:[%s5715_s12 + $0x28] sm:$0xf0]  ;;  %v5033_v27 = vld [vmem:[%s5723_s15 + $0x188] sm:$0xf0]  ;;  %v4010_v10 = vor.u32 %v4964_v42, %v4009_v17  ;;  %v3997_v46 = vld [vmem:[%s5715_s12] sm:$0xf]  ;;  %v4014_v55 = vor.u32 %v4963_v25, %v4011_v49 }
 0x414   : > { %2113 = vmatpush.bf16.msra.mxu1 %v4050_v32  ;;  %2126 = vmatpush.bf16.msra.mxu2 %v4054_v45  ;;  %v4273_v18 = vld [vmem:[%s5723_s15 + $0x168] sm:$0xf]  ;;  %v4960_v39 = vld [vmem:[%s5715_s12 + $0x4] sm:$0xf]  ;;  %v4018_v53 = vor.u32 %v4965_v4, %v4017_v19  ;;  %v5024_v62 = vld [vmem:[%s5723_s15 + $0x140] sm:$0xf0] }
 0x415   : > { %v4961_v9 = vld [vmem:[%s5715_s12 + $0x8] sm:$0xf0]  ;;  %v4274_v21 = vor.u32 %v5033_v27, %v4273_v18  ;;  %v3999_v2 = vld [vmem:[%s5715_s12 + $0xc] sm:$0xf0]  ;;  %v4237_v43 = vld [vmem:[%s5723_s15 + $0x120] sm:$0xf] }
 0x416   : > { %3493 = vmatpush.bf16.msra.mxu3 %v4310_v28  ;;  %v4005_v29 = vld [vmem:[%s5715_s12 + $0x8] sm:$0xf]  ;;  %v4962_v35 = vld [vmem:[%s5715_s12 + $0x10] sm:$0xf0]  ;;  %v4633_v37 = vld [vmem:[%s5723_s15 + $0x438] sm:$0xf]  ;;  %v3998_v63 = vor.u32 %v4961_v9, %v3997_v46  ;;  %v4238_v22 = vor.u32 %v5024_v62, %v4237_v43  ;;  %v4002_v3 = vor.u32 %v4960_v39, %v3999_v2 }
 0x417   : > { %2101 = vmatpush.bf16.msra.mxu0 %v4034_v44  ;;  %v5123_v56 = vld [vmem:[%s5723_s15 + $0x458] sm:$0xf0]  ;;  %v4347_v23 = vld [vmem:[%s5723_s15 + $0x21c] sm:$0xf0]  ;;  %v4921_v8 = vld [vmem:[%s5723_s15 + $0x678] sm:$0xf]  ;;  %v4006_v13 = vor.u32 %v4962_v35, %v4005_v29 }
 0x418   : > { %2114 = vmatpush.bf16.msra.mxu1 %v4038_v33  ;;  %2127 = vmatpush.bf16.msra.mxu2 %v4042_v61  ;;  %v5047_v20 = vld [vmem:[%s5723_s15 + $0x1fc] sm:$0xf]  ;;  %v4634_v12 = vor.u32 %v5123_v56, %v4633_v37  ;;  %v4597_v14 = vld [vmem:[%s5723_s15 + $0x3f0] sm:$0xf]  ;;  %v4201_v16 = vld [vmem:[%s5723_s15 + $0xd8] sm:$0xf] }
 0x419   : > { %v5195_v47 = vld [vmem:[%s5723_s15 + $0x698] sm:$0xf0]  ;;  %v4350_v52 = vor.u32 %v5047_v20, %v4347_v23  ;;  %v5114_v0 = vld [vmem:[%s5723_s15 + $0x410] sm:$0xf0]  ;;  %v4311_v15 = vld [vmem:[%s5723_s15 + $0x1d4] sm:$0xf0] }
 0x41a   : > { %3494 = vmatpush.bf16.msra.mxu3 %v4274_v21  ;;  %v5015_v24 = vld [vmem:[%s5723_s15 + $0xf8] sm:$0xf0]  ;;  %v5038_v50 = vld [vmem:[%s5723_s15 + $0x1b4] sm:$0xf]  ;;  %v4922_v32 = vor.u32 %v5195_v47, %v4921_v8  ;;  %v1928_v45 = vld [vmem:[#allocation2] sm:$0xf]  ;;  %v4598_v6 = vor.u32 %v5114_v0, %v4597_v14 }
 0x41b   : > { %2102 = vmatpush.bf16.msra.mxu0 %v4022_v30  ;;  %v4885_v1 = vld [vmem:[%s5723_s15 + $0x630] sm:$0xf]  ;;  %v5186_v36 = vld [vmem:[%s5723_s15 + $0x650] sm:$0xf0]  ;;  %v4202_v48 = vor.u32 %v5015_v24, %v4201_v16  ;;  %v4314_v5 = vor.u32 %v5038_v50, %v4311_v15  ;;  %v4561_v34 = vld [vmem:[%s5723_s15 + $0x3a8] sm:$0xf] }
 0x41c   : > { %2115 = vmatpush.bf16.msra.mxu1 %v4026_v26  ;;  %2128 = vmatpush.bf16.msra.mxu2 %v4030_v54  ;;  %v4165_v44 = vld [vmem:[%s5723_s15 + $0x90] sm:$0xf]  ;;  %v5006_v31 = vld [vmem:[%s5723_s15 + $0xb0] sm:$0xf0]  ;;  %v5105_v11 = vld [vmem:[%s5723_s15 + $0x3c8] sm:$0xf0]  ;;  %v4886_v40 = vor.u32 %v5186_v36, %v4885_v1 }
 0x41d   : > { %v5029_v33 = vld [vmem:[%s5723_s15 + $0x16c] sm:$0xf]  ;;  %v4275_v61 = vld [vmem:[%s5723_s15 + $0x18c] sm:$0xf0]  ;;  %v4849_v7 = vld [vmem:[%s5723_s15 + $0x5e8] sm:$0xf]  ;;  %v4166_v60 = vor.u32 %v5006_v31, %v4165_v44  ;;  %v4562_v57 = vor.u32 %v5105_v11, %v4561_v34 }
 0x41e   : > { %3495 = vmatpush.bf16.msra.mxu3 %v4238_v22  ;;  %v5177_v41 = vld [vmem:[%s5723_s15 + $0x608] sm:$0xf0]  ;;  %v4278_v51 = vor.u32 %v5029_v33, %v4275_v61  ;;  %v4525_v59 = vld [vmem:[%s5723_s15 + $0x360] sm:$0xf]  ;;  %v4129_v38 = vld [vmem:[%s5723_s15 + $0x48] sm:$0xf] }
 0x41f   : > { %2103 = vmatpush.bf16.msra.mxu0 %v4010_v10  ;;  %v4997_v58 = vld [vmem:[%s5723_s15 + $0x68] sm:$0xf0]  ;;  %v5096_v30 = vld [vmem:[%s5723_s15 + $0x380] sm:$0xf0]  ;;  %v4239_v42 = vld [vmem:[%s5723_s15 + $0x144] sm:$0xf0]  ;;  %v4850_v28 = vor.u32 %v5177_v41, %v4849_v7 }
 0x420   : > { %2116 = vmatpush.bf16.msra.mxu1 %v4014_v55  ;;  %2129 = vmatpush.bf16.msra.mxu2 %v4018_v53  ;;  %v5020_v17 = vld [vmem:[%s5723_s15 + $0x124] sm:$0xf]  ;;  %v4813_v26 = vld [vmem:[%s5723_s15 + $0x5a0] sm:$0xf]  ;;  %v4489_v25 = vld [vmem:[%s5723_s15 + $0x318] sm:$0xf]  ;;  %v4130_v49 = vor.u32 %v4997_v58, %v4129_v38  ;;  %v4526_v19 = vor.u32 %v5096_v30, %v4525_v59 }
 0x421   : > { %v5168_v54 = vld [vmem:[%s5723_s15 + $0x5c0] sm:$0xf0]  ;;  %v4242_v4 = vor.u32 %v5020_v17, %v4239_v42  ;;  %v5087_v18 = vld [vmem:[%s5723_s15 + $0x338] sm:$0xf0]  ;;  %v4093_v27 = vld [vmem:[%s5723_s15] sm:$0xf] }
 0x422   : > { %3496 = vmatpush.bf16.msra.mxu3 %v4202_v48  ;;  %v4988_v10 = vld [vmem:[%s5723_s15 + $0x20] sm:$0xf0]  ;;  %v5011_v46 = vld [vmem:[%s5723_s15 + $0xdc] sm:$0xf]  ;;  %v4203_v9 = vld [vmem:[%s5723_s15 + $0xfc] sm:$0xf0]  ;;  %v4814_v39 = vor.u32 %v5168_v54, %v4813_v26  ;;  %v4490_v62 = vor.u32 %v5087_v18, %v4489_v25 }
 0x423   : > { %2104 = vmatpush.bf16.msra.mxu0 %v3998_v63  ;;  %v4777_v21 = vld [vmem:[%s5723_s15 + $0x558] sm:$0xf]  ;;  %v5159_v55 = vld [vmem:[%s5723_s15 + $0x578] sm:$0xf0]  ;;  %v4635_v2 = vld [vmem:[%s5723_s15 + $0x45c] sm:$0xf0]  ;;  %v4094_v43 = vor.u32 %v4988_v10, %v4093_v27  ;;  %v4206_v29 = vor.u32 %v5011_v46, %v4203_v9 }
 0x424   : > { %2117 = vmatpush.bf16.msra.mxu1 %v4002_v3  ;;  %2130 = vmatpush.bf16.msra.mxu2 %v4006_v13  ;;  %v5119_v53 = vld [vmem:[%s5723_s15 + $0x43c] sm:$0xf]  ;;  %v4453_v35 = vld [vmem:[%s5723_s15 + $0x2d0] sm:$0xf]  ;;  %v5078_v37 = vld [vmem:[%s5723_s15 + $0x2f0] sm:$0xf0]  ;;  %v4778_v23 = vor.u32 %v5159_v55, %v4777_v21 }
 0x425   : > { %v5002_v56 = vld [vmem:[%s5723_s15 + $0x94] sm:$0xf]  ;;  %v4167_v20 = vld [vmem:[%s5723_s15 + $0xb4] sm:$0xf0]  ;;  %v4741_v63 = vld [vmem:[%s5723_s15 + $0x510] sm:$0xf]  ;;  %v4638_v8 = vor.u32 %v5119_v53, %v4635_v2  ;;  %v4454_v13 = vor.u32 %v5078_v37, %v4453_v35 }
 0x426   : > { %2105 = vmatmul.bf16.vlgmr.msra.gmra.mxu0 %v1928_v45  ;;  %3497 = vmatpush.bf16.msra.mxu3 %v4166_v60  ;;  %v5150_v47 = vld [vmem:[%s5723_s15 + $0x530] sm:$0xf0]  ;;  %v4599_v3 = vld [vmem:[%s5723_s15 + $0x414] sm:$0xf0]  ;;  %v5069_v14 = vld [vmem:[%s5723_s15 + $0x2a8] sm:$0xf0] }
 0x427   : > { %3505 = vmatpush.bf16.msrb.mxu0 %v4634_v12  ;;  %2118 = vmatmul.bf16.vlgmr.msra.gmra.mxu1 %v1928_v45  ;;  %v5110_v22 = vld [vmem:[%s5723_s15 + $0x3f4] sm:$0xf]  ;;  %v4170_v12 = vor.u32 %v5002_v56, %v4167_v20  ;;  %v4993_v16 = vld [vmem:[%s5723_s15 + $0x4c] sm:$0xf]  ;;  %v4131_v24 = vld [vmem:[%s5723_s15 + $0x6c] sm:$0xf0]  ;;  %v4742_v0 = vor.u32 %v5150_v47, %v4741_v63 }
 0x428   : > { %3531 = vmatpush.bf16.msrb.mxu2 %v4350_v52  ;;  %3518 = vmatpush.bf16.msrb.mxu1 %v4922_v32  ;;  %v4417_v52 = vld [vmem:[%s5723_s15 + $0x288] sm:$0xf]  ;;  %v4602_v15 = vor.u32 %v5110_v22, %v4599_v3  ;;  %v5141_v32 = vld [vmem:[%s5723_s15 + $0x4e8] sm:$0xf0]  ;;  %v4563_v1 = vld [vmem:[%s5723_s15 + $0x3cc] sm:$0xf0] }
 0x429   : > { %2131 = vmatmul.bf16.vlgmr.msra.gmra.mxu2 %v1928_v45  ;;  %v4705_v50 = vld [vmem:[%s5723_s15 + $0x4c8] sm:$0xf]  ;;  %v5101_v45 = vld [vmem:[%s5723_s15 + $0x3ac] sm:$0xf]  ;;  %v4381_v36 = vld [vmem:[%s5723_s15 + $0x240] sm:$0xf]  ;;  %v4418_v48 = vor.u32 %v5069_v14, %v4417_v52 }
 0x42a   : > { %3498 = vmatpush.bf16.msra.mxu3 %v4130_v49  ;;  %v4984_v34 = vld [vmem:[%s5723_s15 + $0x4] sm:$0xf]  ;;  %v4095_v44 = vld [vmem:[%s5723_s15 + $0x24] sm:$0xf0]  ;;  %v5191_v31 = vld [vmem:[%s5723_s15 + $0x67c] sm:$0xf]  ;;  %v4706_v33 = vor.u32 %v5141_v32, %v4705_v50  ;;  %v4566_v61 = vor.u32 %v5101_v45, %v4563_v1 }
 0x42b   : > { %3506 = vmatpush.bf16.msrb.mxu0 %v4598_v6  ;;  %v4134_v6 = vor.u32 %v4993_v16, %v4131_v24  ;;  %v4923_v11 = vld [vmem:[%s5723_s15 + $0x69c] sm:$0xf0]  ;;  %v5124_v7 = vld [vmem:[%s5723_s15 + $0x460] sm:$0xf0]  ;;  %v4098_v38 = vor.u32 %v4984_v34, %v4095_v44  ;;  %v4887_v26 = vld [vmem:[%s5723_s15 + $0x654] sm:$0xf0] }
 0x42c   : > { %3532 = vmatpush.bf16.msrb.mxu2 %v4314_v5  ;;  %3519 = vmatpush.bf16.msrb.mxu1 %v4886_v40  ;;  %v5060_v5 = vld [vmem:[%s5723_s15 + $0x260] sm:$0xf0]  ;;  %v4641_v40 = vld [vmem:[%s5723_s15 + $0x440] sm:$0xf]  ;;  %v4926_v17 = vor.u32 %v5191_v31, %v4923_v11  ;;  %v4605_v54 = vld [vmem:[%s5723_s15 + $0x3f8] sm:$0xf] }
 0x42d   : > { %v4669_v41 = vld [vmem:[%s5723_s15 + $0x480] sm:$0xf]  ;;  %v5132_v60 = vld [vmem:[%s5723_s15 + $0x4a0] sm:$0xf0]  ;;  %v4382_v59 = vor.u32 %v5060_v5, %v4381_v36  ;;  %v4642_v42 = vor.u32 %v5124_v7, %v4641_v40  ;;  %v5115_v25 = vld [vmem:[%s5723_s15 + $0x418] sm:$0xf0] }
 0x42e   : > { %3499 = vmatpush.bf16.msra.mxu3 %v4094_v43  ;;  %v4353_v58 = vld [vmem:[%s5723_s15 + $0x200] sm:$0xf]  ;;  %v5052_v30 = vld [vmem:[%s5723_s15 + $0x220] sm:$0xf0]  ;;  %v4670_v49 = vor.u32 %v5132_v60, %v4669_v41  ;;  %v5083_v18 = vld [vmem:[%s5723_s15 + $0x31c] sm:$0xf] }
 0x42f   : > { %3507 = vmatpush.bf16.msrb.mxu0 %v4562_v57  ;;  %v5092_v57 = vld [vmem:[%s5723_s15 + $0x364] sm:$0xf]  ;;  %v4491_v27 = vld [vmem:[%s5723_s15 + $0x33c] sm:$0xf0]  ;;  %v4317_v10 = vld [vmem:[%s5723_s15 + $0x1b8] sm:$0xf] }
 0x430   : > { %3533 = vmatpush.bf16.msrb.mxu2 %v4278_v51  ;;  %3520 = vmatpush.bf16.msrb.mxu1 %v4850_v28  ;;  %v4527_v51 = vld [vmem:[%s5723_s15 + $0x384] sm:$0xf0]  ;;  %v5182_v28 = vld [vmem:[%s5723_s15 + $0x634] sm:$0xf]  ;;  %v5043_v46 = vld [vmem:[%s5723_s15 + $0x1d8] sm:$0xf0]  ;;  %v4494_v43 = vor.u32 %v5083_v18, %v4491_v27 }
 0x431   : > { %v4890_v9 = vor.u32 %v5182_v28, %v4887_v26  ;;  %v5173_v21 = vld [vmem:[%s5723_s15 + $0x5ec] sm:$0xf]  ;;  %v4851_v55 = vld [vmem:[%s5723_s15 + $0x60c] sm:$0xf0]  ;;  %v5106_v2 = vld [vmem:[%s5723_s15 + $0x3d0] sm:$0xf0] }
 0x432   : > { %3544 = vmatpush.bf16.msrb.mxu3 %v4638_v8  ;;  %v4569_v53 = vld [vmem:[%s5723_s15 + $0x3b0] sm:$0xf]  ;;  %v4455_v35 = vld [vmem:[%s5723_s15 + $0x2f4] sm:$0xf0]  ;;  %v5034_v56 = vld [vmem:[%s5723_s15 + $0x190] sm:$0xf0]  ;;  %v4854_v20 = vor.u32 %v5173_v21, %v4851_v55 }
 0x433   : > { %3508 = vmatpush.bf16.msrb.mxu0 %v4526_v19  ;;  %v4530_v19 = vor.u32 %v5092_v57, %v4527_v51  ;;  %v4281_v37 = vld [vmem:[%s5723_s15 + $0x170] sm:$0xf]  ;;  %v5164_v63 = vld [vmem:[%s5723_s15 + $0x5a4] sm:$0xf]  ;;  %v4815_v8 = vld [vmem:[%s5723_s15 + $0x5c4] sm:$0xf0] }
 0x434   : > { %3534 = vmatpush.bf16.msrb.mxu2 %v4242_v4  ;;  %3521 = vmatpush.bf16.msrb.mxu1 %v4814_v39  ;;  %v4354_v4 = vor.u32 %v5052_v30, %v4353_v58  ;;  %v4606_v39 = vor.u32 %v5115_v25, %v4605_v54  ;;  %v4533_v47 = vld [vmem:[%s5723_s15 + $0x368] sm:$0xf]  ;;  %v5097_v22 = vld [vmem:[%s5723_s15 + $0x388] sm:$0xf0]  ;;  %v4818_v14 = vor.u32 %v5164_v63, %v4815_v8  ;;  %v5155_v24 = vld [vmem:[%s5723_s15 + $0x55c] sm:$0xf] }
 0x435   : > { %v5025_v52 = vld [vmem:[%s5723_s15 + $0x148] sm:$0xf0]  ;;  %v4534_v16 = vor.u32 %v5097_v22, %v4533_v47  ;;  %v4497_v50 = vld [vmem:[%s5723_s15 + $0x320] sm:$0xf]  ;;  %v5016_v1 = vld [vmem:[%s5723_s15 + $0x100] sm:$0xf0] }
 0x436   : > { %3545 = vmatpush.bf16.msrb.mxu3 %v4602_v15  ;;  %v5088_v15 = vld [vmem:[%s5723_s15 + $0x340] sm:$0xf0]  ;;  %v4209_v45 = vld [vmem:[%s5723_s15 + $0xe0] sm:$0xf]  ;;  %v4743_v5 = vld [vmem:[%s5723_s15 + $0x534] sm:$0xf0] }
 0x437   : > { %3509 = vmatpush.bf16.msrb.mxu0 %v4490_v62  ;;  %v4318_v62 = vor.u32 %v5043_v46, %v4317_v10  ;;  %v4461_v34 = vld [vmem:[%s5723_s15 + $0x2d8] sm:$0xf]  ;;  %v5079_v44 = vld [vmem:[%s5723_s15 + $0x2f8] sm:$0xf0]  ;;  %v4210_v31 = vor.u32 %v5016_v1, %v4209_v45  ;;  %v4419_v40 = vld [vmem:[%s5723_s15 + $0x2ac] sm:$0xf0] }
 0x438   : > { %3535 = vmatpush.bf16.msrb.mxu2 %v4206_v29  ;;  %3522 = vmatpush.bf16.msrb.mxu1 %v4778_v23  ;;  %v5074_v29 = vld [vmem:[%s5723_s15 + $0x2d4] sm:$0xf]  ;;  %v4570_v23 = vor.u32 %v5106_v2, %v4569_v53  ;;  %v5137_v7 = vld [vmem:[%s5723_s15 + $0x4cc] sm:$0xf]  ;;  %v4707_v60 = vld [vmem:[%s5723_s15 + $0x4ec] sm:$0xf0] }
 0x439   : > { %v4458_v3 = vor.u32 %v5074_v29, %v4455_v35  ;;  %v4425_v57 = vld [vmem:[%s5723_s15 + $0x290] sm:$0xf]  ;;  %v5070_v51 = vld [vmem:[%s5723_s15 + $0x2b0] sm:$0xf0]  ;;  %v4173_v58 = vld [vmem:[%s5723_s15 + $0x98] sm:$0xf] }
 0x43a   : > { %3546 = vmatpush.bf16.msrb.mxu3 %v4566_v61  ;;  %v5065_v61 = vld [vmem:[%s5723_s15 + $0x28c] sm:$0xf]  ;;  %v5007_v30 = vld [vmem:[%s5723_s15 + $0xb8] sm:$0xf0]  ;;  %v4383_v28 = vld [vmem:[%s5723_s15 + $0x264] sm:$0xf0] }
 0x43b   : > { %3510 = vmatpush.bf16.msrb.mxu0 %v4454_v13  ;;  %v4282_v13 = vor.u32 %v5034_v56, %v4281_v37  ;;  %v4422_v41 = vor.u32 %v5065_v61, %v4419_v40  ;;  %v5128_v26 = vld [vmem:[%s5723_s15 + $0x484] sm:$0xf]  ;;  %v4671_v25 = vld [vmem:[%s5723_s15 + $0x4a4] sm:$0xf0]  ;;  %v4137_v27 = vld [vmem:[%s5723_s15 + $0x50] sm:$0xf] }
 0x43c   : > { %3536 = vmatpush.bf16.msrb.mxu2 %v4170_v12  ;;  %3523 = vmatpush.bf16.msrb.mxu1 %v4742_v0  ;;  %v4245_v12 = vld [vmem:[%s5723_s15 + $0x128] sm:$0xf]  ;;  %v4779_v0 = vld [vmem:[%s5723_s15 + $0x57c] sm:$0xf0]  ;;  %v4998_v10 = vld [vmem:[%s5723_s15 + $0x70] sm:$0xf0] }
 0x43d   : > { %v4246_v32 = vor.u32 %v5025_v52, %v4245_v12  ;;  %v4782_v36 = vor.u32 %v5155_v24, %v4779_v0  ;;  %v4138_v46 = vor.u32 %v4998_v10, %v4137_v27  ;;  %v1961_v55 = vld [vmem:[%s5721_s13] sm:$0x7]  ;;  %v5048_v29 = vld [vmem:[%s5723_s15 + $0x204] sm:$0xf]  ;;  %v4355_v37 = vld [vmem:[%s5723_s15 + $0x224] sm:$0xf0] }
 0x43e   : > { %3547 = vmatpush.bf16.msrb.mxu3 %v4530_v19  ;;  %v5061_v19 = vld [vmem:[%s5723_s15 + $0x268] sm:$0xf0]  ;;  %v1963_v53 = vperm.slane %v1961_v55, 0  ;;  %v1964_v2 = vperm.slane %v1961_v55, 1  ;;  %v5192_v56 = vld [vmem:[%s5723_s15 + $0x684] sm:$0xf] }
 0x43f   : > { %3511 = vmatpush.bf16.msrb.mxu0 %v4418_v48  ;;  %v4498_v48 = vor.u32 %v5088_v15, %v4497_v50  ;;  %v1965_v22 = vperm.slane %v1961_v55, 2  ;;  %v4893_v52 = vld [vmem:[%s5723_s15 + $0x638] sm:$0xf]  ;;  %v4319_v0 = vld [vmem:[%s5723_s15 + $0x1dc] sm:$0xf0]  ;;  %s5534_s9 = smov [#allocation12]  }
 0x440   : > { %3537 = vmatpush.bf16.msrb.mxu2 %v4134_v6  ;;  %3524 = vmatpush.bf16.msrb.mxu1 %v4706_v33  ;;  %v5146_v6 = vld [vmem:[%s5723_s15 + $0x514] sm:$0xf]  ;;  %v4462_v33 = vor.u32 %v5079_v44, %v4461_v34  ;;  %v5183_v50 = vld [vmem:[%s5723_s15 + $0x63c] sm:$0xf]  ;;  %v4895_v15 = vld [vmem:[%s5723_s15 + $0x65c] sm:$0xf0] }
 0x441   : > { %v4746_v11 = vor.u32 %v5146_v6, %v4743_v5  ;;  %v5120_v45 = vld [vmem:[%s5723_s15 + $0x444] sm:$0xf]  ;;  %v4643_v1 = vld [vmem:[%s5723_s15 + $0x464] sm:$0xf0]  ;;  %v4898_v6 = vor.u32 %v5183_v50, %v4895_v15  ;;  %v4857_v5 = vld [vmem:[%s5723_s15 + $0x5f0] sm:$0xf] }
 0x442   : > { %3548 = vmatpush.bf16.msrb.mxu3 %v4494_v43  ;;  %v4929_v43 = vld [vmem:[%s5723_s15 + $0x680] sm:$0xf]  ;;  %v5178_v34 = vld [vmem:[%s5723_s15 + $0x610] sm:$0xf0]  ;;  %v4859_v40 = vld [vmem:[%s5723_s15 + $0x614] sm:$0xf0] }
 0x443   : > { %3512 = vmatpush.bf16.msrb.mxu0 %v4382_v59  ;;  %v4710_v59 = vor.u32 %v5137_v7, %v4707_v60  ;;  %v5030_v44 = vld [vmem:[%s5723_s15 + $0x174] sm:$0xf]  ;;  %s3867_s10 = sshll.u32 %s5534_s9, 4  ;;  %s3869_s30 = sshll.u32 %s7102_s5, 4  ;;  %s3868_s10 = int_to_ptr.vmem [resolvable:$true] %s3867_s10  ;;  %s3870_s30 = int_to_ptr.hbm [resolvable:$true] %s3869_s30 }
 0x444   : > { %3538 = vmatpush.bf16.msrb.mxu2 %v4098_v38  ;;  %3525 = vmatpush.bf16.msrb.mxu1 %v4670_v49  ;;  %v4426_v38 = vor.u32 %v5070_v51, %v4425_v57  ;;  %v4389_v49 = vld [vmem:[%s5723_s15 + $0x248] sm:$0xf]  ;;  %v5174_v61 = vld [vmem:[%s5723_s15 + $0x5f4] sm:$0xf]  ;;  %v4858_v57 = vor.u32 %v5178_v34, %v4857_v5  ;;  %v5111_v51 = vld [vmem:[%s5723_s15 + $0x3fc] sm:$0xf] }
 0x445   : > { %v4390_v18 = vor.u32 %v5061_v19, %v4389_v49  ;;  %v5102_v19 = vld [vmem:[%s5723_s15 + $0x3b4] sm:$0xf]  ;;  %p5248_p5 = scmp.eq.s32.totalorder %s5584_s22, 2 }
 0x446   : > { %3549 = vmatpush.bf16.msrb.mxu3 %v4458_v3  ;;  %v5142_v50 = vld [vmem:[%s5723_s15 + $0x4f0] sm:$0xf0] }
 0x447   : > { %3557 = vmatpush.bf16.msra.mxu0 %v4926_v17  ;;  %v4174_v17 = vor.u32 %v5007_v30, %v4173_v58  ;;  %v4862_v58 = vor.u32 %v5174_v61, %v4859_v40  ;;  %v4821_v30 = vld [vmem:[%s5723_s15 + $0x5a8] sm:$0xf]  ;;  %v4994_v15 = vld [vmem:[%s5723_s15 + $0x54] sm:$0xf]  ;;  %v4103_v61 = vld [vmem:[%s5723_s15 + $0x2c] sm:$0xf0] }
 0x448   : > { %3583 = vmatpush.bf16.msra.mxu2 %v4642_v42  ;;  %3570 = vmatpush.bf16.msra.mxu1 %v4354_v4  ;;  %v5056_v42 = vld [vmem:[%s5723_s15 + $0x244] sm:$0xf]  ;;  %v4674_v4 = vor.u32 %v5128_v26, %v4671_v25  ;;  %v5165_v26 = vld [vmem:[%s5723_s15 + $0x5ac] sm:$0xf] }
 0x449   : > { %v4386_v54 = vor.u32 %v5056_v42, %v4383_v28  ;;  %v5021_v42 = vld [vmem:[%s5723_s15 + $0x12c] sm:$0xf]  ;;  %v4247_v28 = vld [vmem:[%s5723_s15 + $0x14c] sm:$0xf0] }
 0x44a   : > { %3550 = vmatpush.bf16.msrb.mxu3 %v4422_v41  ;;  %v4646_v41 = vor.u32 %v5120_v45, %v4643_v1  ;;  %v4250_v27 = vor.u32 %v5021_v42, %v4247_v28  ;;  %v5138_v1 = vld [vmem:[%s5723_s15 + $0x4d4] sm:$0xf]  ;;  %v5129_v40 = vld [vmem:[%s5723_s15 + $0x48c] sm:$0xf] }
 0x44b   : > { %3558 = vmatpush.bf16.msra.mxu0 %v4890_v9  ;;  %v4101_v9 = vld [vmem:[%s5723_s15 + $0x8] sm:$0xf]  ;;  %v5066_v28 = vld [vmem:[%s5723_s15 + $0x294] sm:$0xf] }
 0x44c   : > { %3584 = vmatpush.bf16.msra.mxu2 %v4606_v39  ;;  %3571 = vmatpush.bf16.msra.mxu1 %v4318_v62  ;;  %v4989_v39 = vld [vmem:[%s5723_s15 + $0x28] sm:$0xf0]  ;;  %v5196_v62 = vld [vmem:[%s5723_s15 + $0x6a0] sm:$0xf0] }
 0x44d   : > { %v4102_v21 = vor.u32 %v4989_v39, %v4101_v9  ;;  %v4930_v47 = vor.u32 %v5196_v62, %v4929_v43  ;;  %v5160_v9 = vld [vmem:[%s5723_s15 + $0x580] sm:$0xf0]  ;;  %v5093_v43 = vld [vmem:[%s5723_s15 + $0x36c] sm:$0xf]  ;;  %v4535_v62 = vld [vmem:[%s5723_s15 + $0x38c] sm:$0xf0] }
 0x44e   : > { %3551 = vmatpush.bf16.msrb.mxu3 %v4386_v54  ;;  %v4823_v54 = vld [vmem:[%s5723_s15 + $0x5cc] sm:$0xf0]  ;;  %v5012_v39 = vld [vmem:[%s5723_s15 + $0xe4] sm:$0xf] }
 0x44f   : > { %3559 = vmatpush.bf16.msra.mxu0 %v4854_v20  ;;  %v4931_v20 = vld [vmem:[%s5723_s15 + $0x6a4] sm:$0xf0]  ;;  %v4826_v10 = vor.u32 %v5165_v26, %v4823_v54  ;;  %v4427_v26 = vld [vmem:[%s5723_s15 + $0x2b4] sm:$0xf0] }
 0x450   : > { %3585 = vmatpush.bf16.msra.mxu2 %v4570_v23  ;;  %3572 = vmatpush.bf16.msra.mxu1 %v4282_v13  ;;  %v4358_v13 = vor.u32 %v5048_v29, %v4355_v37  ;;  %v4934_v12 = vor.u32 %v5192_v56, %v4931_v20  ;;  %v4749_v37 = vld [vmem:[%s5723_s15 + $0x518] sm:$0xf]  ;;  %v5151_v20 = vld [vmem:[%s5723_s15 + $0x538] sm:$0xf0] }
 0x453   : > { %3560 = vmatpush.bf16.msra.mxu0 %v4818_v14  ;;  %v5187_v14 = vld [vmem:[%s5723_s15 + $0x658] sm:$0xf0] }
 0x454   : > { %3586 = vmatpush.bf16.msra.mxu2 %v4534_v16  ;;  %3573 = vmatpush.bf16.msra.mxu1 %v4246_v32  ;;  %v5039_v16 = vld [vmem:[%s5723_s15 + $0x1bc] sm:$0xf]  ;;  %v4894_v32 = vor.u32 %v5187_v14, %v4893_v52  ;;  %v4750_v52 = vor.u32 %v5151_v20, %v4749_v37 }
 0x455   : > { %v5035_v37 = vld [vmem:[%s5723_s15 + $0x198] sm:$0xf0] }
 0x457   : > { %3561 = vmatpush.bf16.msra.mxu0 %v4782_v36 }
 0x458   : > { %3587 = vmatpush.bf16.msra.mxu2 %v4498_v48  ;;  %3574 = vmatpush.bf16.msra.mxu1 %v4210_v31  ;;  %v4322_v48 = vor.u32 %v5039_v16, %v4319_v0  ;;  %v4713_v16 = vld [vmem:[%s5723_s15 + $0x4d0] sm:$0xf] }
 0x459   : > { %v4714_v5 = vor.u32 %v5142_v50, %v4713_v16  ;;  %v4253_v16 = vld [vmem:[%s5723_s15 + $0x130] sm:$0xf] }
 0x45a   : > { %v4541_v50 = vld [vmem:[%s5723_s15 + $0x370] sm:$0xf] }
 0x45b   : > { %3562 = vmatpush.bf16.msra.mxu0 %v4746_v11 }
 0x45c   : > { %3588 = vmatpush.bf16.msra.mxu2 %v4462_v33  ;;  %3575 = vmatpush.bf16.msra.mxu1 %v4174_v17  ;;  %v4283_v33 = vld [vmem:[%s5723_s15 + $0x194] sm:$0xf0]  ;;  %v5169_v17 = vld [vmem:[%s5723_s15 + $0x5c8] sm:$0xf0] }
 0x45d   : > { %v4822_v49 = vor.u32 %v5169_v17, %v4821_v30  ;;  %v4363_v30 = vld [vmem:[%s5723_s15 + $0x22c] sm:$0xf0] }
 0x45f   : > { %3563 = vmatpush.bf16.msra.mxu0 %v4710_v59  ;;  %v4607_v59 = vld [vmem:[%s5723_s15 + $0x41c] sm:$0xf0] }
 0x460   : > { %3589 = vmatpush.bf16.msra.mxu2 %v4426_v38  ;;  %3576 = vmatpush.bf16.msra.mxu1 %v4138_v46  ;;  %v4286_v38 = vor.u32 %v5030_v44, %v4283_v33  ;;  %v4610_v25 = vor.u32 %v5111_v51, %v4607_v59  ;;  %v4785_v46 = vld [vmem:[%s5723_s15 + $0x560] sm:$0xf]  ;;  %v4677_v44 = vld [vmem:[%s5723_s15 + $0x488] sm:$0xf]  ;;  %v5053_v51 = vld [vmem:[%s5723_s15 + $0x228] sm:$0xf0] }
 0x461   : > { %v4786_v29 = vor.u32 %v5160_v9, %v4785_v46  ;;  %v4649_v59 = vld [vmem:[%s5723_s15 + $0x448] sm:$0xf]  ;;  %v5116_v46 = vld [vmem:[%s5723_s15 + $0x420] sm:$0xf0] }
 0x462   : > { %v5040_v9 = vld [vmem:[%s5723_s15 + $0x1c4] sm:$0xf] }
 0x463   : > { %3564 = vmatpush.bf16.msra.mxu0 %v4674_v4  ;;  %v4571_v4 = vld [vmem:[%s5723_s15 + $0x3d4] sm:$0xf0] }
 0x464   : > { %3590 = vmatpush.bf16.msra.mxu2 %v4390_v18  ;;  %3577 = vmatpush.bf16.msra.mxu1 %v4102_v21  ;;  %v4211_v21 = vld [vmem:[%s5723_s15 + $0x104] sm:$0xf0]  ;;  %v4574_v55 = vor.u32 %v5102_v19, %v4571_v4  ;;  %v4325_v4 = vld [vmem:[%s5723_s15 + $0x1c0] sm:$0xf] }
 0x4a3   : > { %v2106_v35 = vpop.f32.mrf.mxu0 }
 0x4a4   : > { %v2107_v23 = vadd.f32 %v2106_v35, %v1963_v53  ;;  %v2119_v63 = vpop.f32.mrf.mxu1  ;;  %v5156_v53 = vld [vmem:[%s5723_s15 + $0x564] sm:$0xf]  ;;  %v4214_v35 = vor.u32 %v5012_v39, %v4211_v21  ;;  %v4327_v39 = vld [vmem:[%s5723_s15 + $0x1e4] sm:$0xf0]  ;;  %v5057_v21 = vld [vmem:[%s5723_s15 + $0x24c] sm:$0xf] }
 0x4a5   : > { %v2120_v8 = vadd.f32 %v2119_v63, %v1964_v2  ;;  %v4787_v2 = vld [vmem:[%s5723_s15 + $0x584] sm:$0xf0]  ;;  %v4175_v63 = vld [vmem:[%s5723_s15 + $0xbc] sm:$0xf0] }
 0x4a6   : > { %v6749_v3 = vpack.c.bf16 %v2107_v23, %v2107_v23  ;;  %v4790_v56 = vor.u32 %v5156_v53, %v4787_v2  ;;  %v5003_v23 = vld [vmem:[%s5723_s15 + $0x9c] sm:$0xf]  ;;  %v4937_v2 = vld [vmem:[%s5723_s15 + $0x688] sm:$0xf] }
 0x4a7   : > { %v6754_v24 = vpack.c.bf16 %v2120_v8, %v2120_v8  ;;  %v4538_v8 = vor.u32 %v5093_v43, %v4535_v62  ;;  %v4178_v14 = vor.u32 %v5003_v23, %v4175_v63  ;;  %v5197_v43 = vld [vmem:[%s5723_s15 + $0x6a8] sm:$0xf0]  ;;  %v5107_v23 = vld [vmem:[%s5723_s15 + $0x3d8] sm:$0xf0] }
 0x4a8   : > { %3500 = vmatmul.bf16.vlgmr.msra.gmra.mxu3 %v6749_v3  ;;  %3539 = vmatmul.bf16.vlgmr.msrb.gmra.mxu2 %v6749_v3  ;;  %v5031_v63 = vld [vmem:[%s5723_s15 + $0x17c] sm:$0xf] }
 0x4a9   : > { %3513 = vmatmul.bf16.vlgmr.msrb.gmra.mxu0 %v6754_v24  ;;  %3596 = vmatpush.bf16.msra.mxu3 %v4930_v47  ;;  %v5147_v47 = vld [vmem:[%s5723_s15 + $0x51c] sm:$0xf] }
 0x4aa   : > { %3609 = vmatpush.bf16.msrb.mxu0 %v4358_v13  ;;  %3635 = vmatpush.bf16.msrb.mxu2 %v4934_v12  ;;  %v5084_v13 = vld [vmem:[%s5723_s15 + $0x324] sm:$0xf]  ;;  %v4499_v12 = vld [vmem:[%s5723_s15 + $0x344] sm:$0xf0] }
 0x4ab   : > { %v2108_v11 = vpop.f32.mrf.mxu0  ;;  %v4502_v45 = vor.u32 %v5084_v13, %v4499_v12  ;;  %v4901_v13 = vld [vmem:[%s5723_s15 + $0x640] sm:$0xf]  ;;  %v5188_v12 = vld [vmem:[%s5723_s15 + $0x660] sm:$0xf0] }
 0x4ac   : > { %v2132_v36 = vpop.f32.mrf.mxu2  ;;  %v2121_v7 = vpop.f32.mrf.mxu1  ;;  %v4985_v11 = vld [vmem:[%s5723_s15 + $0xc] sm:$0xf] }
 0x4ad   : > { %v2133_v31 = vadd.f32 %v2132_v36, %v1965_v22  ;;  %3597 = vmatpush.bf16.msra.mxu3 %v4894_v32  ;;  %v4751_v22 = vld [vmem:[%s5723_s15 + $0x53c] sm:$0xf0]  ;;  %v4139_v32 = vld [vmem:[%s5723_s15 + $0x74] sm:$0xf0]  ;;  %v4679_v7 = vld [vmem:[%s5723_s15 + $0x4ac] sm:$0xf0]  ;;  %v4106_v42 = vor.u32 %v4985_v11, %v4103_v61 }
 0x4ae   : > { %3610 = vmatpush.bf16.msrb.mxu0 %v4322_v48  ;;  %3636 = vmatpush.bf16.msrb.mxu2 %v4898_v6  ;;  %v4754_v0 = vor.u32 %v5147_v47, %v4751_v22  ;;  %v4715_v36 = vld [vmem:[%s5723_s15 + $0x4f4] sm:$0xf0]  ;;  %v5075_v48 = vld [vmem:[%s5723_s15 + $0x2dc] sm:$0xf]  ;;  %v4463_v6 = vld [vmem:[%s5723_s15 + $0x2fc] sm:$0xf0]  ;;  %v4142_v34 = vor.u32 %v4994_v15, %v4139_v32  ;;  %v4682_v54 = vor.u32 %v5129_v40, %v4679_v7 }
 0x4af   : > { %v6770_v60 = vpack.c.bf16 %v2133_v31, %v2133_v31  ;;  %v5133_v31 = vld [vmem:[%s5723_s15 + $0x4a8] sm:$0xf0]  ;;  %v4718_v33 = vor.u32 %v5138_v1, %v4715_v36  ;;  %v4938_v47 = vor.u32 %v5197_v43, %v4937_v2  ;;  %v5098_v15 = vld [vmem:[%s5723_s15 + $0x390] sm:$0xf0]  ;;  %v4902_v1 = vor.u32 %v5188_v12, %v4901_v13  ;;  %v4505_v11 = vld [vmem:[%s5723_s15 + $0x328] sm:$0xf] }
 0x4b0   : > { %v4678_v17 = vor.u32 %v5133_v31, %v4677_v44  ;;  %v5022_v32 = vld [vmem:[%s5723_s15 + $0x134] sm:$0xf]  ;;  %v4217_v44 = vld [vmem:[%s5723_s15 + $0xe8] sm:$0xf]  ;;  %v5017_v31 = vld [vmem:[%s5723_s15 + $0x108] sm:$0xf0] }
 0x4b1   : > { %3526 = vmatmul.bf16.vlgmr.msrb.gmra.mxu1 %v6770_v60  ;;  %3598 = vmatpush.bf16.msra.mxu3 %v4858_v57  ;;  %v4361_v57 = vld [vmem:[%s5723_s15 + $0x208] sm:$0xf]  ;;  %v5013_v61 = vld [vmem:[%s5723_s15 + $0xec] sm:$0xf]  ;;  %v4219_v40 = vld [vmem:[%s5723_s15 + $0x10c] sm:$0xf0] }
 0x4b2   : > { %3622 = vmatpush.bf16.msrb.mxu1 %v4646_v41  ;;  %3611 = vmatpush.bf16.msrb.mxu0 %v4286_v38  ;;  %v4466_v41 = vor.u32 %v5075_v48, %v4463_v6  ;;  %v5125_v38 = vld [vmem:[%s5723_s15 + $0x468] sm:$0xf0]  ;;  %v4865_v48 = vld [vmem:[%s5723_s15 + $0x5f8] sm:$0xf]  ;;  %v5179_v6 = vld [vmem:[%s5723_s15 + $0x618] sm:$0xf0] }
 0x4b3   : > { %3637 = vmatpush.bf16.msrb.mxu2 %v4862_v58  ;;  %v5049_v58 = vld [vmem:[%s5723_s15 + $0x20c] sm:$0xf]  ;;  %v4866_v7 = vor.u32 %v5179_v6, %v4865_v48  ;;  %v5152_v43 = vld [vmem:[%s5723_s15 + $0x540] sm:$0xf0]  ;;  %v4939_v12 = vld [vmem:[%s5723_s15 + $0x6ac] sm:$0xf0] }
 0x4b4   : > { %v2134_v18 = vpop.f32.mrf.mxu2  ;;  %v4366_v19 = vor.u32 %v5049_v58, %v4363_v30  ;;  %v4181_v58 = vld [vmem:[%s5723_s15 + $0xa0] sm:$0xf]  ;;  %v5008_v30 = vld [vmem:[%s5723_s15 + $0xc0] sm:$0xf0]  ;;  %v5193_v13 = vld [vmem:[%s5723_s15 + $0x68c] sm:$0xf] }
 0x4b5   : > { %3599 = vmatpush.bf16.msra.mxu3 %v4822_v49  ;;  %v4650_v49 = vor.u32 %v5125_v38, %v4649_v59  ;;  %v5044_v18 = vld [vmem:[%s5723_s15 + $0x1e0] sm:$0xf0]  ;;  %v4222_v38 = vor.u32 %v5013_v61, %v4219_v40  ;;  %v4615_v48 = vld [vmem:[%s5723_s15 + $0x424] sm:$0xf0]  ;;  %v5134_v61 = vld [vmem:[%s5723_s15 + $0x4b0] sm:$0xf0] }
 0x4b6   : > { %3623 = vmatpush.bf16.msrb.mxu1 %v4610_v25  ;;  %3612 = vmatpush.bf16.msrb.mxu0 %v4250_v27  ;;  %v4362_v25 = vor.u32 %v5053_v51, %v4361_v57  ;;  %v4613_v27 = vld [vmem:[%s5723_s15 + $0x400] sm:$0xf]  ;;  %v4326_v53 = vor.u32 %v5044_v18, %v4325_v4  ;;  %v4829_v57 = vld [vmem:[%s5723_s15 + $0x5b0] sm:$0xf]  ;;  %v5170_v51 = vld [vmem:[%s5723_s15 + $0x5d0] sm:$0xf0] }
 0x4b7   : > { %3638 = vmatpush.bf16.msrb.mxu2 %v4826_v10  ;;  %v4430_v10 = vor.u32 %v5066_v28, %v4427_v26  ;;  %v4614_v62 = vor.u32 %v5116_v46, %v4613_v27  ;;  %v5004_v28 = vld [vmem:[%s5723_s15 + $0xa4] sm:$0xf]  ;;  %v4183_v26 = vld [vmem:[%s5723_s15 + $0xc4] sm:$0xf0]  ;;  %v4145_v27 = vld [vmem:[%s5723_s15 + $0x58] sm:$0xf] }
 0x4b8   : > { %3552 = vmatmul.bf16.vlgmr.msrb.gmra.mxu3 %v6754_v24  ;;  %3591 = vmatmul.bf16.vlgmr.msra.gmra.mxu2 %v6754_v24  ;;  %v4186_v18 = vor.u32 %v5004_v28, %v4183_v26  ;;  %v4433_v46 = vld [vmem:[%s5723_s15 + $0x298] sm:$0xf]  ;;  %v4369_v40 = vld [vmem:[%s5723_s15 + $0x210] sm:$0xf]  ;;  %v4585_v28 = vld [vmem:[%s5723_s15 + $0x3c0] sm:$0xf] }
 0x4b9   : > { %3565 = vmatmul.bf16.vlgmr.msra.gmra.mxu0 %v6770_v60  ;;  %3600 = vmatpush.bf16.msra.mxu3 %v4786_v29  ;;  %v4330_v29 = vor.u32 %v5040_v9, %v4327_v39  ;;  %v5071_v9 = vld [vmem:[%s5723_s15 + $0x2b8] sm:$0xf0]  ;;  %v5108_v26 = vld [vmem:[%s5723_s15 + $0x3e0] sm:$0xf0] }
 0x4ba   : > { %3624 = vmatpush.bf16.msrb.mxu1 %v4574_v55  ;;  %3613 = vmatpush.bf16.msrb.mxu0 %v4214_v35  ;;  %v4391_v55 = vld [vmem:[%s5723_s15 + $0x26c] sm:$0xf0]  ;;  %v4289_v35 = vld [vmem:[%s5723_s15 + $0x178] sm:$0xf]  ;;  %v4995_v39 = vld [vmem:[%s5723_s15 + $0x5c] sm:$0xf] }
 0x4bb   : > { %3639 = vmatpush.bf16.msrb.mxu2 %v4790_v56  ;;  %v4577_v56 = vld [vmem:[%s5723_s15 + $0x3b8] sm:$0xf]  ;;  %v4394_v20 = vor.u32 %v5057_v21, %v4391_v55  ;;  %v4290_v22 = vor.u32 %v5035_v37, %v4289_v35  ;;  %v4147_v21 = vld [vmem:[%s5723_s15 + $0x7c] sm:$0xf0]  ;;  %v4434_v35 = vor.u32 %v5071_v9, %v4433_v46 }
 0x4bc   : > { %v4150_v37 = vor.u32 %v4995_v39, %v4147_v21  ;;  %v4831_v9 = vld [vmem:[%s5723_s15 + $0x5d4] sm:$0xf0]  ;;  %v5099_v21 = vld [vmem:[%s5723_s15 + $0x398] sm:$0xf0] }
 0x4bd   : > { %3601 = vmatpush.bf16.msra.mxu3 %v4750_v52  ;;  %v4578_v52 = vor.u32 %v5107_v23, %v4577_v56  ;;  %v4397_v56 = vld [vmem:[%s5723_s15 + $0x250] sm:$0xf]  ;;  %v4986_v23 = vld [vmem:[%s5723_s15 + $0x14] sm:$0xf]  ;;  %v4549_v39 = vld [vmem:[%s5723_s15 + $0x378] sm:$0xf] }
 0x4be   : > { %3625 = vmatpush.bf16.msrb.mxu1 %v4538_v8  ;;  %3614 = vmatpush.bf16.msrb.mxu0 %v4178_v14  ;;  %v4291_v8 = vld [vmem:[%s5723_s15 + $0x19c] sm:$0xf0] }
 0x4bf   : > { %3640 = vmatpush.bf16.msrb.mxu2 %v4754_v0  ;;  %v4294_v14 = vor.u32 %v5031_v63, %v4291_v8  ;;  %v5026_v0 = vld [vmem:[%s5723_s15 + $0x150] sm:$0xf0]  ;;  %v4111_v63 = vld [vmem:[%s5723_s15 + $0x34] sm:$0xf0]  ;;  %v5121_v8 = vld [vmem:[%s5723_s15 + $0x44c] sm:$0xf] }
 0x4c0   : > { %v4254_v36 = vor.u32 %v5026_v0, %v4253_v16  ;;  %v5126_v16 = vld [vmem:[%s5723_s15 + $0x470] sm:$0xf0]  ;;  %v4721_v0 = vld [vmem:[%s5723_s15 + $0x4d8] sm:$0xf] }
 0x4c1   : > { %3578 = vmatmul.bf16.vlgmr.msra.gmra.mxu1 %v6749_v3  ;;  %3602 = vmatpush.bf16.msra.mxu3 %v4714_v5  ;;  %v4542_v5 = vor.u32 %v5098_v15, %v4541_v50  ;;  %v5143_v50 = vld [vmem:[%s5723_s15 + $0x4f8] sm:$0xf0] }
 0x4c2   : > { %3626 = vmatpush.bf16.msrb.mxu1 %v4502_v45  ;;  %3615 = vmatpush.bf16.msrb.mxu0 %v4142_v34  ;;  %v4255_v45 = vld [vmem:[%s5723_s15 + $0x154] sm:$0xf0] }
 0x4c3   : > { %3641 = vmatpush.bf16.msrb.mxu2 %v4718_v33  ;;  %v4258_v34 = vor.u32 %v5022_v32, %v4255_v45  ;;  %v5089_v33 = vld [vmem:[%s5723_s15 + $0x348] sm:$0xf0]  ;;  %v4114_v32 = vor.u32 %v4986_v23, %v4111_v63  ;;  %v4513_v23 = vld [vmem:[%s5723_s15 + $0x330] sm:$0xf]  ;;  %v5090_v63 = vld [vmem:[%s5723_s15 + $0x350] sm:$0xf0] }
 0x4c4   : > { %v4506_v59 = vor.u32 %v5089_v33, %v4505_v11  ;;  %v5117_v11 = vld [vmem:[%s5723_s15 + $0x428] sm:$0xf0]  ;;  %v4685_v33 = vld [vmem:[%s5723_s15 + $0x490] sm:$0xf] }
 0x4c5   : > { %3603 = vmatpush.bf16.msra.mxu3 %v4678_v17  ;;  %v4469_v17 = vld [vmem:[%s5723_s15 + $0x2e0] sm:$0xf] }
 0x4c6   : > { %3627 = vmatpush.bf16.msrb.mxu1 %v4466_v41  ;;  %3616 = vmatpush.bf16.msrb.mxu0 %v4106_v42  ;;  %v4218_v41 = vor.u32 %v5017_v31, %v4217_v44  ;;  %v5080_v42 = vld [vmem:[%s5723_s15 + $0x300] sm:$0xf0]  ;;  %v4903_v44 = vld [vmem:[%s5723_s15 + $0x664] sm:$0xf0] }
 0x4c7   : > { %3642 = vmatpush.bf16.msrb.mxu2 %v4682_v54  ;;  %v4830_v54 = vor.u32 %v5170_v51, %v4829_v57  ;;  %v4470_v4 = vor.u32 %v5080_v42, %v4469_v17  ;;  %v4621_v31 = vld [vmem:[%s5723_s15 + $0x408] sm:$0xf]  ;;  %v4867_v42 = vld [vmem:[%s5723_s15 + $0x61c] sm:$0xf0] }
 0x4c8   : > { %3604 = vmatmul.bf16.vlgmr.msra.gmra.mxu3 %v6770_v60  ;;  %v4622_v51 = vor.u32 %v5117_v11, %v4621_v31  ;;  %v4723_v11 = vld [vmem:[%s5723_s15 + $0x4fc] sm:$0xf0] }
 0x4c9   : > { %3648 = vmatpush.bf16.msrb.mxu3 %v4362_v25  ;;  %3617 = vmatmul.bf16.vlgmr.msrb.gmra.mxu0 %v6749_v3  ;;  %v4182_v25 = vor.u32 %v5008_v30, %v4181_v58  ;;  %v4579_v58 = vld [vmem:[%s5723_s15 + $0x3dc] sm:$0xf0]  ;;  %v5175_v30 = vld [vmem:[%s5723_s15 + $0x5fc] sm:$0xf] }
 0x4ca   : > { %3661 = vmatpush.bf16.msra.mxu0 %v4650_v49  ;;  %3628 = vmatpush.bf16.msrb.mxu1 %v4430_v10  ;;  %v4793_v49 = vld [vmem:[%s5723_s15 + $0x568] sm:$0xf]  ;;  %v4999_v10 = vld [vmem:[%s5723_s15 + $0x78] sm:$0xf0] }
 0x4cb   : > { %3687 = vmatpush.bf16.msra.mxu2 %v4366_v19  ;;  %v5161_v19 = vld [vmem:[%s5723_s15 + $0x588] sm:$0xf0]  ;;  %v4146_v2 = vor.u32 %v4999_v10, %v4145_v27  ;;  %v4543_v27 = vld [vmem:[%s5723_s15 + $0x394] sm:$0xf0]  ;;  %v5166_v10 = vld [vmem:[%s5723_s15 + $0x5b4] sm:$0xf] }
 0x4cc   : > { %3643 = vmatmul.bf16.vlgmr.msrb.gmra.mxu2 %v6770_v60  ;;  %v4794_v55 = vor.u32 %v5161_v19, %v4793_v49  ;;  %v4870_v19 = vor.u32 %v5175_v30, %v4867_v42  ;;  %v4687_v30 = vld [vmem:[%s5723_s15 + $0x4b4] sm:$0xf0] }
 0x4cd   : > { %3649 = vmatpush.bf16.msrb.mxu3 %v4326_v53  ;;  %v4757_v53 = vld [vmem:[%s5723_s15 + $0x520] sm:$0xf] }
 0x4ce   : > { %3662 = vmatpush.bf16.msra.mxu0 %v4614_v62  ;;  %3629 = vmatpush.bf16.msrb.mxu1 %v4394_v20  ;;  %v4109_v62 = vld [vmem:[%s5723_s15 + $0x10] sm:$0xf]  ;;  %v5062_v20 = vld [vmem:[%s5723_s15 + $0x270] sm:$0xf0] }
 0x4cf   : > { %3688 = vmatpush.bf16.msra.mxu2 %v4330_v29  ;;  %v4990_v29 = vld [vmem:[%s5723_s15 + $0x30] sm:$0xf0]  ;;  %v4398_v15 = vor.u32 %v5062_v20, %v4397_v56  ;;  %v4795_v20 = vld [vmem:[%s5723_s15 + $0x58c] sm:$0xf0] }
 0x4d1   : > { %3650 = vmatpush.bf16.msrb.mxu3 %v4290_v22  ;;  %3630 = vmatmul.bf16.vlgmr.msrb.gmra.mxu1 %v6754_v24  ;;  %v4758_v22 = vor.u32 %v5152_v43, %v4757_v53  ;;  %v5036_v53 = vld [vmem:[%s5723_s15 + $0x1a0] sm:$0xf0]  ;;  %v4834_v43 = vor.u32 %v5166_v10, %v4831_v9 }
 0x4d2   : > { %3674 = vmatpush.bf16.msra.mxu1 %v4938_v47  ;;  %3663 = vmatpush.bf16.msra.mxu0 %v4578_v52  ;;  %v4651_v47 = vld [vmem:[%s5723_s15 + $0x46c] sm:$0xf0]  ;;  %v5000_v10 = vld [vmem:[%s5723_s15 + $0x80] sm:$0xf0] }
 0x4d3   : > { %3689 = vmatpush.bf16.msra.mxu2 %v4294_v14  ;;  %v4657_v52 = vld [vmem:[%s5723_s15 + $0x450] sm:$0xf]  ;;  %v4110_v14 = vor.u32 %v4990_v29, %v4109_v62  ;;  %v4654_v45 = vor.u32 %v5121_v8, %v4651_v47  ;;  %v4550_v62 = vor.u32 %v5099_v21, %v4549_v39  ;;  %v5085_v29 = vld [vmem:[%s5723_s15 + $0x32c] sm:$0xf]  ;;  %v4261_v8 = vld [vmem:[%s5723_s15 + $0x138] sm:$0xf] }
 0x4d4   : > { %v4658_v6 = vor.u32 %v5126_v16, %v4657_v52  ;;  %v5027_v47 = vld [vmem:[%s5723_s15 + $0x158] sm:$0xf0]  ;;  %v5076_v52 = vld [vmem:[%s5723_s15 + $0x2e4] sm:$0xf] }
 0x4d5   : > { %3651 = vmatpush.bf16.msrb.mxu3 %v4254_v36  ;;  %v5112_v36 = vld [vmem:[%s5723_s15 + $0x404] sm:$0xf] }
 0x4d6   : > { %3675 = vmatpush.bf16.msra.mxu1 %v4902_v1  ;;  %3664 = vmatpush.bf16.msra.mxu0 %v4542_v5  ;;  %v4942_v1 = vor.u32 %v5193_v13, %v4939_v12  ;;  %v4722_v5 = vor.u32 %v5143_v50, %v4721_v0  ;;  %v4514_v12 = vor.u32 %v5090_v63, %v4513_v23  ;;  %v5148_v16 = vld [vmem:[%s5723_s15 + $0x524] sm:$0xf]  ;;  %v4759_v50 = vld [vmem:[%s5723_s15 + $0x544] sm:$0xf0]  ;;  %v5122_v23 = vld [vmem:[%s5723_s15 + $0x454] sm:$0xf] }
 0x4d7   : > { %3690 = vmatpush.bf16.msra.mxu2 %v4258_v34  ;;  %v5184_v34 = vld [vmem:[%s5723_s15 + $0x644] sm:$0xf]  ;;  %v4262_v0 = vor.u32 %v5027_v47, %v4261_v8  ;;  %v4659_v63 = vld [vmem:[%s5723_s15 + $0x474] sm:$0xf0] }
 0x4d8   : > { %v4906_v57 = vor.u32 %v5184_v34, %v4903_v44  ;;  %v4435_v34 = vld [vmem:[%s5723_s15 + $0x2bc] sm:$0xf0]  ;;  %v5139_v44 = vld [vmem:[%s5723_s15 + $0x4dc] sm:$0xf] }
 0x4d9   : > { %3652 = vmatpush.bf16.msrb.mxu3 %v4218_v41  ;;  %v4618_v41 = vor.u32 %v5112_v36, %v4615_v48  ;;  %v4762_v48 = vor.u32 %v5148_v16, %v4759_v50  ;;  %v4662_v16 = vor.u32 %v5122_v23, %v4659_v63  ;;  %v5176_v50 = vld [vmem:[%s5723_s15 + $0x604] sm:$0xf]  ;;  %v5077_v23 = vld [vmem:[%s5723_s15 + $0x2ec] sm:$0xf]  ;;  %v4479_v63 = vld [vmem:[%s5723_s15 + $0x30c] sm:$0xf0] }
 0x4da   : > { %3676 = vmatpush.bf16.msra.mxu1 %v4866_v7  ;;  %3665 = vmatpush.bf16.msra.mxu0 %v4506_v59  ;;  %v5054_v7 = vld [vmem:[%s5723_s15 + $0x230] sm:$0xf0]  ;;  %v4686_v59 = vor.u32 %v5134_v61, %v4685_v33  ;;  %v4441_v33 = vld [vmem:[%s5723_s15 + $0x2a0] sm:$0xf]  ;;  %v5072_v61 = vld [vmem:[%s5723_s15 + $0x2c0] sm:$0xf0] }
 0x4db   : > { %3691 = vmatpush.bf16.msra.mxu2 %v4222_v38  ;;  %v5103_v38 = vld [vmem:[%s5723_s15 + $0x3bc] sm:$0xf]  ;;  %v4370_v17 = vor.u32 %v5054_v7, %v4369_v40  ;;  %v4189_v40 = vld [vmem:[%s5723_s15 + $0xa8] sm:$0xf]  ;;  %v5009_v7 = vld [vmem:[%s5723_s15 + $0xc8] sm:$0xf0] }
 0x4dc   : > { %v4582_v49 = vor.u32 %v5103_v38, %v4579_v58  ;;  %v4442_v38 = vor.u32 %v5072_v61, %v4441_v33  ;;  %v5130_v58 = vld [vmem:[%s5723_s15 + $0x494] sm:$0xf]  ;;  %v4190_v42 = vor.u32 %v5009_v7, %v4189_v40  ;;  %v4839_v33 = vld [vmem:[%s5723_s15 + $0x5dc] sm:$0xf0]  ;;  %v5104_v61 = vld [vmem:[%s5723_s15 + $0x3c4] sm:$0xf] }
 0x4dd   : > { %3653 = vmatpush.bf16.msrb.mxu3 %v4182_v25  ;;  %v5045_v25 = vld [vmem:[%s5723_s15 + $0x1e8] sm:$0xf0]  ;;  %v4587_v40 = vld [vmem:[%s5723_s15 + $0x3e4] sm:$0xf0] }
 0x4de   : > { %3677 = vmatpush.bf16.msra.mxu1 %v4830_v54  ;;  %3666 = vmatpush.bf16.msra.mxu0 %v4470_v4  ;;  %v4333_v54 = vld [vmem:[%s5723_s15 + $0x1c8] sm:$0xf]  ;;  %v4586_v4 = vor.u32 %v5108_v26, %v4585_v28  ;;  %v5063_v28 = vld [vmem:[%s5723_s15 + $0x278] sm:$0xf0]  ;;  %v4945_v26 = vld [vmem:[%s5723_s15 + $0x690] sm:$0xf] }
 0x4df   : > { %3692 = vmatpush.bf16.msra.mxu2 %v4186_v18  ;;  %v5094_v18 = vld [vmem:[%s5723_s15 + $0x374] sm:$0xf]  ;;  %v4334_v46 = vor.u32 %v5045_v25, %v4333_v54 }
 0x4e0   : > { %v5198_v54 = vld [vmem:[%s5723_s15 + $0x6b0] sm:$0xf0] }
 0x4e1   : > { %3654 = vmatpush.bf16.msrb.mxu3 %v4146_v2  ;;  %v4546_v2 = vor.u32 %v5094_v18, %v4543_v27  ;;  %v5050_v25 = vld [vmem:[%s5723_s15 + $0x214] sm:$0xf]  ;;  %v4947_v18 = vld [vmem:[%s5723_s15 + $0x6b4] sm:$0xf0]  ;;  %v4153_v27 = vld [vmem:[%s5723_s15 + $0x60] sm:$0xf]  ;;  %v4946_v39 = vor.u32 %v5198_v54, %v4945_v26 }
 0x4e2   : > { %3678 = vmatpush.bf16.msra.mxu1 %v4794_v55  ;;  %3667 = vmatpush.bf16.msra.mxu0 %v4434_v35  ;;  %v4297_v55 = vld [vmem:[%s5723_s15 + $0x180] sm:$0xf]  ;;  %v4507_v35 = vld [vmem:[%s5723_s15 + $0x34c] sm:$0xf0] }
 0x4e3   : > { %3693 = vmatpush.bf16.msra.mxu2 %v4150_v37  ;;  %v5157_v37 = vld [vmem:[%s5723_s15 + $0x56c] sm:$0xf]  ;;  %v4298_v56 = vor.u32 %v5036_v53, %v4297_v55  ;;  %v4909_v55 = vld [vmem:[%s5723_s15 + $0x648] sm:$0xf]  ;;  %v4551_v26 = vld [vmem:[%s5723_s15 + $0x39c] sm:$0xf0] }
 0x4e4   : > { %v4798_v13 = vor.u32 %v5157_v37, %v4795_v20  ;;  %v5189_v53 = vld [vmem:[%s5723_s15 + $0x668] sm:$0xf0]  ;;  %v4911_v37 = vld [vmem:[%s5723_s15 + $0x66c] sm:$0xf0]  ;;  %v4991_v20 = vld [vmem:[%s5723_s15 + $0x38] sm:$0xf0] }
 0x4e5   : > { %3655 = vmatpush.bf16.msrb.mxu3 %v4110_v14  ;;  %v4471_v14 = vld [vmem:[%s5723_s15 + $0x304] sm:$0xf0]  ;;  %v4910_v8 = vor.u32 %v5189_v53, %v4909_v55 }
 0x4e6   : > { %3679 = vmatpush.bf16.msra.mxu1 %v4758_v22  ;;  %3668 = vmatpush.bf16.msra.mxu0 %v4398_v15  ;;  %v4510_v22 = vor.u32 %v5085_v29, %v4507_v35  ;;  %v4477_v15 = vld [vmem:[%s5723_s15 + $0x2e8] sm:$0xf]  ;;  %v4474_v36 = vor.u32 %v5076_v52, %v4471_v14  ;;  %v4335_v29 = vld [vmem:[%s5723_s15 + $0x1ec] sm:$0xf0]  ;;  %v5185_v35 = vld [vmem:[%s5723_s15 + $0x64c] sm:$0xf] }
 0x4e7   : > { %3694 = vmatpush.bf16.msra.mxu2 %v4114_v32  ;;  %v5081_v32 = vld [vmem:[%s5723_s15 + $0x308] sm:$0xf0]  ;;  %v5180_v52 = vld [vmem:[%s5723_s15 + $0x620] sm:$0xf0] }
 0x4e8   : > { %3656 = vmatmul.bf16.vlgmr.msrb.gmra.mxu3 %v6749_v3  ;;  %v5032_v14 = vld [vmem:[%s5723_s15 + $0x184] sm:$0xf] }
 0x4e9   : > { %3700 = vmatpush.bf16.msra.mxu3 %v4654_v45  ;;  %3669 = vmatmul.bf16.vlgmr.msra.gmra.mxu0 %v6754_v24  ;;  %v4225_v45 = vld [vmem:[%s5723_s15 + $0xf0] sm:$0xf] }
 0x4ea   : > { %3713 = vmatpush.bf16.msrb.mxu0 %v4942_v1  ;;  %3680 = vmatpush.bf16.msra.mxu1 %v4722_v5  ;;  %v5018_v1 = vld [vmem:[%s5723_s15 + $0x110] sm:$0xf0]  ;;  %v5067_v5 = vld [vmem:[%s5723_s15 + $0x29c] sm:$0xf] }
 0x4eb   : > { %3739 = vmatpush.bf16.msrb.mxu2 %v4658_v6  ;;  %v4478_v6 = vor.u32 %v5081_v32, %v4477_v15  ;;  %v4226_v31 = vor.u32 %v5018_v1, %v4225_v45  ;;  %v4875_v15 = vld [vmem:[%s5723_s15 + $0x624] sm:$0xf0]  ;;  %v5113_v32 = vld [vmem:[%s5723_s15 + $0x40c] sm:$0xf]  ;;  %v4623_v45 = vld [vmem:[%s5723_s15 + $0x42c] sm:$0xf0] }
 0x4ec   : > { %3695 = vmatmul.bf16.vlgmr.msra.gmra.mxu2 %v6749_v3 }
 0x4ed   : > { %3701 = vmatpush.bf16.msra.mxu3 %v4618_v41  ;;  %v4438_v41 = vor.u32 %v5067_v5, %v4435_v34  ;;  %v5171_v5 = vld [vmem:[%s5723_s15 + $0x5d8] sm:$0xf0] }
 0x4ee   : > { %3714 = vmatpush.bf16.msrb.mxu0 %v4906_v57  ;;  %3681 = vmatpush.bf16.msra.mxu1 %v4686_v59  ;;  %v5058_v57 = vld [vmem:[%s5723_s15 + $0x254] sm:$0xf]  ;;  %v4726_v59 = vor.u32 %v5139_v44, %v4723_v11  ;;  %v5023_v34 = vld [vmem:[%s5723_s15 + $0x13c] sm:$0xf]  ;;  %v4626_v44 = vor.u32 %v5113_v32, %v4623_v45  ;;  %v4665_v45 = vld [vmem:[%s5723_s15 + $0x458] sm:$0xf] }
 0x4ef   : > { %3740 = vmatpush.bf16.msrb.mxu2 %v4622_v51  ;;  %v4399_v51 = vld [vmem:[%s5723_s15 + $0x274] sm:$0xf0]  ;;  %v5167_v11 = vld [vmem:[%s5723_s15 + $0x5bc] sm:$0xf] }
 0x4f0   : > { %v5055_v32 = vld [vmem:[%s5723_s15 + $0x238] sm:$0xf0] }
 0x4f1   : > { %3682 = vmatmul.bf16.vlgmr.msra.gmra.mxu1 %v6770_v60  ;;  %3702 = vmatpush.bf16.msra.mxu3 %v4582_v49  ;;  %v4371_v49 = vld [vmem:[%s5723_s15 + $0x234] sm:$0xf0] }
 0x4f2   : > { %3726 = vmatpush.bf16.msrb.mxu1 %v4370_v17  ;;  %3715 = vmatpush.bf16.msrb.mxu0 %v4870_v19  ;;  %v4405_v17 = vld [vmem:[%s5723_s15 + $0x258] sm:$0xf]  ;;  %v5194_v19 = vld [vmem:[%s5723_s15 + $0x694] sm:$0xf]  ;;  %v4374_v21 = vor.u32 %v5050_v25, %v4371_v49 }
 0x4f3   : > { %3741 = vmatpush.bf16.msrb.mxu2 %v4586_v4  ;;  %v4402_v4 = vor.u32 %v5058_v57, %v4399_v51  ;;  %v4406_v9 = vor.u32 %v5063_v28, %v4405_v17  ;;  %v4842_v57 = vor.u32 %v5167_v11, %v4839_v33  ;;  %v4801_v51 = vld [vmem:[%s5723_s15 + $0x570] sm:$0xf]  ;;  %v5158_v17 = vld [vmem:[%s5723_s15 + $0x574] sm:$0xf]  ;;  %v5095_v28 = vld [vmem:[%s5723_s15 + $0x37c] sm:$0xf] }
 0x4f4   : > { %v4341_v11 = vld [vmem:[%s5723_s15 + $0x1d0] sm:$0xf] }
 0x4f5   : > { %3703 = vmatpush.bf16.msra.mxu3 %v4546_v2  ;;  %v4950_v2 = vor.u32 %v5194_v19, %v4947_v18  ;;  %v4765_v19 = vld [vmem:[%s5723_s15 + $0x528] sm:$0xf]  ;;  %v5005_v18 = vld [vmem:[%s5723_s15 + $0xac] sm:$0xf] }
 0x4f6   : > { %3727 = vmatpush.bf16.msrb.mxu1 %v4334_v46  ;;  %3716 = vmatpush.bf16.msrb.mxu0 %v4834_v43  ;;  %v4690_v46 = vor.u32 %v5130_v58, %v4687_v30  ;;  %v4154_v43 = vor.u32 %v5000_v10, %v4153_v27  ;;  %v4590_v58 = vor.u32 %v5104_v61, %v4587_v40  ;;  %v4227_v30 = vld [vmem:[%s5723_s15 + $0x114] sm:$0xf0]  ;;  %v4191_v10 = vld [vmem:[%s5723_s15 + $0xcc] sm:$0xf0]  ;;  %v5046_v61 = vld [vmem:[%s5723_s15 + $0x1f0] sm:$0xf0] }
 0x4f7   : > { %3742 = vmatpush.bf16.msrb.mxu2 %v4550_v62  ;;  %v5041_v62 = vld [vmem:[%s5723_s15 + $0x1cc] sm:$0xf]  ;;  %v4554_v27 = vor.u32 %v5095_v28, %v4551_v26  ;;  %v4194_v53 = vor.u32 %v5005_v18, %v4191_v10  ;;  %v4629_v40 = vld [vmem:[%s5723_s15 + $0x410] sm:$0xf]  ;;  %v4593_v26 = vld [vmem:[%s5723_s15 + $0x3c8] sm:$0xf] }
 0x4f8   : > { %v4338_v47 = vor.u32 %v5041_v62, %v4335_v29  ;;  %v5144_v62 = vld [vmem:[%s5723_s15 + $0x500] sm:$0xf0] }
 0x4f9   : > { %3704 = vmatpush.bf16.msra.mxu3 %v4510_v22  ;;  %v4914_v22 = vor.u32 %v5185_v35, %v4911_v37  ;;  %v4996_v29 = vld [vmem:[%s5723_s15 + $0x64] sm:$0xf]  ;;  %v4155_v37 = vld [vmem:[%s5723_s15 + $0x84] sm:$0xf0] }
 0x4fa   : > { %3728 = vmatpush.bf16.msrb.mxu1 %v4298_v56  ;;  %3717 = vmatpush.bf16.msrb.mxu0 %v4798_v13  ;;  %v4117_v56 = vld [vmem:[%s5723_s15 + $0x18] sm:$0xf]  ;;  %v5028_v10 = vld [vmem:[%s5723_s15 + $0x160] sm:$0xf0] }
 0x4fb   : > { %3743 = vmatpush.bf16.msrb.mxu2 %v4514_v12  ;;  %v4118_v13 = vor.u32 %v4991_v20, %v4117_v56  ;;  %v4873_v12 = vld [vmem:[%s5723_s15 + $0x600] sm:$0xf]  ;;  %v5140_v56 = vld [vmem:[%s5723_s15 + $0x4e4] sm:$0xf]  ;;  %v4731_v20 = vld [vmem:[%s5723_s15 + $0x504] sm:$0xf0] }
 0x4fc   : > { %v4874_v1 = vor.u32 %v5180_v52, %v4873_v12  ;;  %v5135_v12 = vld [vmem:[%s5723_s15 + $0x4b8] sm:$0xf0] }
 0x4fd   : > { %3705 = vmatpush.bf16.msra.mxu3 %v4474_v36  ;;  %v4987_v52 = vld [vmem:[%s5723_s15 + $0x1c] sm:$0xf] }
 0x4fe   : > { %3729 = vmatpush.bf16.msrb.mxu1 %v4262_v0  ;;  %3718 = vmatpush.bf16.msrb.mxu0 %v4762_v48  ;;  %v4299_v0 = vld [vmem:[%s5723_s15 + $0x1a4] sm:$0xf0]  ;;  %v4878_v48 = vor.u32 %v5176_v50, %v4875_v15  ;;  %v4695_v50 = vld [vmem:[%s5723_s15 + $0x4bc] sm:$0xf0]  ;;  %v4377_v15 = vld [vmem:[%s5723_s15 + $0x218] sm:$0xf] }
 0x4ff   : > { %3744 = vmatpush.bf16.msrb.mxu2 %v4478_v6  ;;  %v4302_v36 = vor.u32 %v5032_v14, %v4299_v0  ;;  %v4837_v6 = vld [vmem:[%s5723_s15 + $0x5b8] sm:$0xf]  ;;  %v4119_v14 = vld [vmem:[%s5723_s15 + $0x3c] sm:$0xf0]  ;;  %v5131_v0 = vld [vmem:[%s5723_s15 + $0x49c] sm:$0xf] }
 0x500   : > { %v4838_v7 = vor.u32 %v5171_v5, %v4837_v6  ;;  %v4443_v6 = vld [vmem:[%s5723_s15 + $0x2c4] sm:$0xf0]  ;;  %v4122_v5 = vor.u32 %v4987_v52, %v4119_v14 }
 0x501   : > { %3706 = vmatpush.bf16.msra.mxu3 %v4438_v41 }
 0x502   : > { %3730 = vmatpush.bf16.msrb.mxu1 %v4226_v31  ;;  %3719 = vmatpush.bf16.msrb.mxu0 %v4726_v59  ;;  %v4263_v31 = vld [vmem:[%s5723_s15 + $0x15c] sm:$0xf0]  ;;  %v5162_v59 = vld [vmem:[%s5723_s15 + $0x590] sm:$0xf0] }
 0x503   : > { %3745 = vmatpush.bf16.msrb.mxu2 %v4442_v38  ;;  %v4266_v41 = vor.u32 %v5023_v34, %v4263_v31  ;;  %v5014_v38 = vld [vmem:[%s5723_s15 + $0xf4] sm:$0xf]  ;;  %v4802_v54 = vor.u32 %v5162_v59, %v4801_v51  ;;  %v4698_v34 = vor.u32 %v5131_v0, %v4695_v50  ;;  %v4953_v51 = vld [vmem:[%s5723_s15 + $0x698] sm:$0xf]  ;;  %v5199_v59 = vld [vmem:[%s5723_s15 + $0x6b8] sm:$0xf0] }
 0x504   : > { %v4230_v25 = vor.u32 %v5014_v38, %v4227_v30  ;;  %v4342_v38 = vor.u32 %v5046_v61, %v4341_v11  ;;  %v4954_v28 = vor.u32 %v5199_v59, %v4953_v51  ;;  %v5010_v0 = vld [vmem:[%s5723_s15 + $0xd0] sm:$0xf0]  ;;  %v5073_v61 = vld [vmem:[%s5723_s15 + $0x2c8] sm:$0xf0] }
 0x505   : > { %3707 = vmatpush.bf16.msra.mxu3 %v4402_v4  ;;  %v5153_v4 = vld [vmem:[%s5723_s15 + $0x548] sm:$0xf0] }
 0x506   : > { %3731 = vmatpush.bf16.msrb.mxu1 %v4190_v42  ;;  %3720 = vmatpush.bf16.msrb.mxu0 %v4690_v46  ;;  %v4803_v42 = vld [vmem:[%s5723_s15 + $0x594] sm:$0xf0]  ;;  %v5149_v46 = vld [vmem:[%s5723_s15 + $0x52c] sm:$0xf]  ;;  %v4766_v55 = vor.u32 %v5153_v4, %v4765_v19 }
 0x507   : > { %3746 = vmatpush.bf16.msrb.mxu2 %v4406_v9  ;;  %v4806_v49 = vor.u32 %v5158_v17, %v4803_v42  ;;  %v4767_v9 = vld [vmem:[%s5723_s15 + $0x54c] sm:$0xf0]  ;;  %v4305_v17 = vld [vmem:[%s5723_s15 + $0x188] sm:$0xf]  ;;  %v5037_v42 = vld [vmem:[%s5723_s15 + $0x1a8] sm:$0xf0] }
 0x508   : > { %3708 = vmatmul.bf16.vlgmr.msra.gmra.mxu3 %v6754_v24  ;;  %v4306_v19 = vor.u32 %v5037_v42, %v4305_v17  ;;  %v4413_v17 = vld [vmem:[%s5723_s15 + $0x260] sm:$0xf]  ;;  %v5064_v42 = vld [vmem:[%s5723_s15 + $0x280] sm:$0xf0] }
 0x509   : > { %3752 = vmatpush.bf16.msrb.mxu3 %v4946_v39  ;;  %3721 = vmatmul.bf16.vlgmr.msrb.gmra.mxu0 %v6770_v60  ;;  %v5086_v39 = vld [vmem:[%s5723_s15 + $0x334] sm:$0xf] }
 0x50a   : > { %3765 = vmatpush.bf16.msra.mxu0 %v4374_v21  ;;  %3732 = vmatpush.bf16.msrb.mxu1 %v4154_v43  ;;  %v4515_v21 = vld [vmem:[%s5723_s15 + $0x354] sm:$0xf0]  ;;  %v4729_v43 = vld [vmem:[%s5723_s15 + $0x4e0] sm:$0xf] }
 0x50b   : > { %3791 = vmatpush.bf16.msra.mxu2 %v4950_v2  ;;  %v4770_v2 = vor.u32 %v5149_v46, %v4767_v9  ;;  %v4518_v35 = vor.u32 %v5086_v39, %v4515_v21  ;;  %v4557_v9 = vld [vmem:[%s5723_s15 + $0x380] sm:$0xf]  ;;  %v5100_v39 = vld [vmem:[%s5723_s15 + $0x3a0] sm:$0xf0]  ;;  %v4881_v21 = vld [vmem:[%s5723_s15 + $0x608] sm:$0xf] }
 0x50c   : > { %3747 = vmatmul.bf16.vlgmr.msrb.gmra.mxu2 %v6754_v24 }
 0x50d   : > { %3753 = vmatpush.bf16.msrb.mxu3 %v4910_v8  ;;  %v4730_v8 = vor.u32 %v5144_v62, %v4729_v43  ;;  %v4233_v43 = vld [vmem:[%s5723_s15 + $0xf8] sm:$0xf]  ;;  %v5019_v62 = vld [vmem:[%s5723_s15 + $0x118] sm:$0xf0] }
 0x50e   : > { %3766 = vmatpush.bf16.msra.mxu0 %v4338_v47  ;;  %3733 = vmatpush.bf16.msrb.mxu1 %v4118_v13  ;;  %v4693_v47 = vld [vmem:[%s5723_s15 + $0x498] sm:$0xf]  ;;  %v4734_v13 = vor.u32 %v5140_v56, %v4731_v20  ;;  %v5091_v20 = vld [vmem:[%s5723_s15 + $0x358] sm:$0xf0] }
 0x50f   : > { %3792 = vmatpush.bf16.msra.mxu2 %v4914_v22  ;;  %v4158_v22 = vor.u32 %v4996_v29, %v4155_v37  ;;  %v4521_v56 = vld [vmem:[%s5723_s15 + $0x338] sm:$0xf] }
 0x510   : > { %v4522_v52 = vor.u32 %v5091_v20, %v4521_v56 }
 0x511   : > { %3734 = vmatmul.bf16.vlgmr.msrb.gmra.mxu1 %v6749_v3  ;;  %3754 = vmatpush.bf16.msrb.mxu3 %v4874_v1  ;;  %v5127_v1 = vld [vmem:[%s5723_s15 + $0x478] sm:$0xf0] }
 0x512   : > { %3778 = vmatpush.bf16.msra.mxu1 %v4662_v16  ;;  %3767 = vmatpush.bf16.msra.mxu0 %v4302_v36  ;;  %v4482_v16 = vor.u32 %v5077_v23, %v4479_v63  ;;  %v4694_v36 = vor.u32 %v5135_v12, %v4693_v47  ;;  %v4666_v31 = vor.u32 %v5127_v1, %v4665_v45  ;;  %v5172_v47 = vld [vmem:[%s5723_s15 + $0x5e0] sm:$0xf0]  ;;  %v4809_v1 = vld [vmem:[%s5723_s15 + $0x578] sm:$0xf] }
 0x513   : > { %3793 = vmatpush.bf16.msra.mxu2 %v4878_v48  ;;  %v5068_v48 = vld [vmem:[%s5723_s15 + $0x2a4] sm:$0xf] }
 0x514   : > { %v4446_v33 = vor.u32 %v5068_v48, %v4443_v6 }
 0x515   : > { %3755 = vmatpush.bf16.msrb.mxu3 %v4838_v7  ;;  %v5118_v7 = vld [vmem:[%s5723_s15 + $0x430] sm:$0xf0] }
 0x516   : > { %3779 = vmatpush.bf16.msra.mxu1 %v4626_v44  ;;  %3768 = vmatpush.bf16.msra.mxu0 %v4266_v41  ;;  %v4378_v44 = vor.u32 %v5055_v32, %v4377_v15  ;;  %v5059_v41 = vld [vmem:[%s5723_s15 + $0x25c] sm:$0xf]  ;;  %v4485_v15 = vld [vmem:[%s5723_s15 + $0x2f0] sm:$0xf]  ;;  %v5082_v32 = vld [vmem:[%s5723_s15 + $0x310] sm:$0xf0] }
 0x517   : > { %3794 = vmatpush.bf16.msra.mxu2 %v4842_v57  ;;  %v4407_v57 = vld [vmem:[%s5723_s15 + $0x27c] sm:$0xf0]  ;;  %v4486_v6 = vor.u32 %v5082_v32, %v4485_v15  ;;  %v2140_v32 = vld [vmem:[#allocation12 + $0x20] sm:$0xff] }
 0x518   : > { %v4410_v30 = vor.u32 %v5059_v41, %v4407_v57  ;;  %v5154_v41 = vld [vmem:[%s5723_s15 + $0x550] sm:$0xf0] }
 0x519   : > { %3756 = vmatpush.bf16.msrb.mxu3 %v4802_v54  ;;  %v5109_v54 = vld [vmem:[%s5723_s15 + $0x3e8] sm:$0xf0] }
 0x51a   : > { %3780 = vmatpush.bf16.msra.mxu1 %v4590_v58  ;;  %3769 = vmatpush.bf16.msra.mxu0 %v4230_v25  ;;  %v4630_v58 = vor.u32 %v5118_v7, %v4629_v40  ;;  %v4917_v25 = vld [vmem:[%s5723_s15 + $0x650] sm:$0xf]  ;;  %v4594_v4 = vor.u32 %v5109_v54, %v4593_v26  ;;  %v5145_v26 = vld [vmem:[%s5723_s15 + $0x508] sm:$0xf0] }
 0x51b   : > { %3795 = vmatpush.bf16.msra.mxu2 %v4806_v49  ;;  %v5190_v49 = vld [vmem:[%s5723_s15 + $0x670] sm:$0xf0]  ;;  %v4773_v7 = vld [vmem:[%s5723_s15 + $0x530] sm:$0xf] }
 0x51c   : > { %v4918_v46 = vor.u32 %v5190_v49, %v4917_v25  ;;  %v4414_v25 = vor.u32 %v5064_v42, %v4413_v17 }
 0x51d   : > { %3757 = vmatpush.bf16.msrb.mxu3 %v4766_v55  ;;  %v5181_v55 = vld [vmem:[%s5723_s15 + $0x628] sm:$0xf0] }
 0x51e   : > { %3781 = vmatpush.bf16.msra.mxu1 %v4554_v27  ;;  %3770 = vmatpush.bf16.msra.mxu0 %v4194_v53  ;;  %v4269_v27 = vld [vmem:[%s5723_s15 + $0x140] sm:$0xf]  ;;  %v4882_v29 = vor.u32 %v5181_v55, %v4881_v21 }
 0x51f   : > { %3796 = vmatpush.bf16.msra.mxu2 %v4770_v2  ;;  %v4270_v53 = vor.u32 %v5028_v10, %v4269_v27  ;;  %v4558_v2 = vor.u32 %v5100_v39, %v4557_v9  ;;  %v4701_v10 = vld [vmem:[%s5723_s15 + $0x4a0] sm:$0xf]  ;;  %v2137_v9 = vld [vmem:[#allocation12 + $0x8] sm:$0xff] }
 0x521   : > { %3758 = vmatpush.bf16.msrb.mxu3 %v4730_v8  ;;  %v4845_v8 = vld [vmem:[%s5723_s15 + $0x5c0] sm:$0xf] }
 0x522   : > { %3782 = vmatpush.bf16.msra.mxu1 %v4518_v35  ;;  %3771 = vmatpush.bf16.msra.mxu0 %v4158_v22  ;;  %v2136_v22 = vld [vmem:[#allocation12] sm:$0xff]  ;;  %v4846_v50 = vor.u32 %v5172_v47, %v4845_v8 }
 0x523   : > { %3797 = vmatpush.bf16.msra.mxu2 %v4734_v13  ;;  %v4234_v13 = vor.u32 %v5019_v62, %v4233_v43 }
 0x525   : > { %3759 = vmatpush.bf16.msrb.mxu3 %v4694_v36  ;;  %v5163_v36 = vld [vmem:[%s5723_s15 + $0x598] sm:$0xf0] }
 0x526   : > { %3783 = vmatpush.bf16.msra.mxu1 %v4482_v16  ;;  %3772 = vmatpush.bf16.msra.mxu0 %v4122_v5  ;;  %v3514_v18 = vpop.f32.mrf.mxu0  ;;  %v4197_v16 = vld [vmem:[%s5723_s15 + $0xb0] sm:$0xf]  ;;  %v4161_v5 = vld [vmem:[%s5723_s15 + $0x68] sm:$0xf] }
 0x527   : > { %3798 = vmatpush.bf16.msra.mxu2 %v4698_v34  ;;  %v4198_v48 = vor.u32 %v5010_v0, %v4197_v16  ;;  %v5001_v34 = vld [vmem:[%s5723_s15 + $0x88] sm:$0xf0] }
 0x528   : > { %3760 = vmatmul.bf16.vlgmr.msrb.gmra.mxu3 %v6770_v60  ;;  %v4162_v57 = vor.u32 %v5001_v34, %v4161_v5 }
 0x529   : > { %3804 = vmatpush.bf16.msra.mxu3 %v4378_v44  ;;  %3773 = vmatmul.bf16.vlgmr.msra.gmra.mxu0 %v6749_v3  ;;  %v4810_v44 = vor.u32 %v5163_v36, %v4809_v1 }
 0x52a   : > { %3817 = vmatpush.bf16.msrb.mxu0 %v4666_v31  ;;  %3784 = vmatpush.bf16.msra.mxu1 %v4446_v33  ;;  %v4449_v33 = vld [vmem:[%s5723_s15 + $0x2a8] sm:$0xf] }
 0x52b   : > { %3799 = vmatmul.bf16.vlgmr.msra.gmra.mxu2 %v6770_v60  ;;  %v3501_v35 = vpop.f32.mrf.mxu3  ;;  %v3540_v37 = vpop.f32.mrf.mxu2  ;;  %v4450_v51 = vor.u32 %v5073_v61, %v4449_v33  ;;  %v2141_v61 = vld [vmem:[#allocation12 + $0x28] sm:$0xff] }
 0x52c   : > { %v3515_v23 = vadd.f32 %v3514_v18, %v3501_v35 }
 0x52d   : > { %3805 = vmatpush.bf16.msra.mxu3 %v4342_v38  ;;  %v4125_v38 = vld [vmem:[%s5723_s15 + $0x20] sm:$0xf] }
 0x52e   : > { %3818 = vmatpush.bf16.msrb.mxu0 %v4630_v58  ;;  %3785 = vmatpush.bf16.msra.mxu1 %v4410_v30  ;;  %v3527_v63 = vpop.f32.mrf.mxu1  ;;  %v3516_v14 = vpop.f32.mrf.mxu0  ;;  %v4992_v58 = vld [vmem:[%s5723_s15 + $0x40] sm:$0xf0]  ;;  %v4774_v30 = vor.u32 %v5154_v41, %v4773_v7 }
 0x52f   : > { %v3528_v12 = vadd.f32 %v3527_v63, %v3515_v23  ;;  %v4126_v54 = vor.u32 %v4992_v58, %v4125_v38 }
 0x531   : > { %3786 = vmatmul.bf16.vlgmr.msra.gmra.mxu1 %v6754_v24  ;;  %3806 = vmatpush.bf16.msra.mxu3 %v4306_v19  ;;  %v3843_v45 = vadd.f32 %v3528_v12, %v2136_v22 }
 0x532   : > { %3830 = vmatpush.bf16.msrb.mxu1 %v4954_v28  ;;  %3819 = vmatpush.bf16.msrb.mxu0 %v4594_v4  ;;  %v4737_v28 = vld [vmem:[%s5723_s15 + $0x4e8] sm:$0xf] }
 0x533   : > { %3852 = vst [vmem:[#allocation12] sm:$0xff] %v3843_v45  ;;  %v3503_v31 = vpop.f32.mrf.mxu3  ;;  %v3542_v11 = vpop.f32.mrf.mxu2  ;;  %v4738_v49 = vor.u32 %v5145_v26, %v4737_v28 }
 0x535   : > { %3807 = vmatpush.bf16.msra.mxu3 %v4270_v53 }
 0x536   : > { %3831 = vmatpush.bf16.msrb.mxu1 %v4918_v46  ;;  %3820 = vmatpush.bf16.msrb.mxu0 %v4558_v2  ;;  %v3529_v40 = vpop.f32.mrf.mxu1  ;;  %v3566_v59 = vpop.f32.mrf.mxu0  ;;  %v5136_v46 = vld [vmem:[%s5723_s15 + $0x4c0] sm:$0xf0] }
 0x537   : > { %v4702_v55 = vor.u32 %v5136_v46, %v4701_v10 }
 0x539   : > { %3808 = vmatpush.bf16.msra.mxu3 %v4234_v13 }
 0x53a   : > { %3832 = vmatpush.bf16.msrb.mxu1 %v4882_v29  ;;  %3821 = vmatpush.bf16.msrb.mxu0 %v4522_v52 }
 0x53b   : > { %v3553_v19 = vpop.f32.mrf.mxu3  ;;  %v3592_v27 = vpop.f32.mrf.mxu2 }
 0x53c   : > { %v3554_v4 = vadd.f32 %v3553_v19, %v3540_v37  ;;  %v2138_v37 = vld [vmem:[#allocation12 + $0x10] sm:$0xff] }
 0x53d   : > { %3809 = vmatpush.bf16.msra.mxu3 %v4198_v48 }
 0x53e   : > { %3833 = vmatpush.bf16.msrb.mxu1 %v4846_v50  ;;  %3822 = vmatpush.bf16.msrb.mxu0 %v4486_v6  ;;  %v3579_v18 = vpop.f32.mrf.mxu1  ;;  %v3567_v39 = vadd.f32 %v3566_v59, %v3554_v4  ;;  %v3568_v21 = vpop.f32.mrf.mxu0 }
 0x53f   : > { %v3593_v35 = vadd.f32 %v3592_v27, %v3579_v18 }
 0x540   : > { %v3844_v53 = vadd.f32 %v3567_v39, %v2137_v9 }
 0x541   : > { %3810 = vmatpush.bf16.msra.mxu3 %v4162_v57 }
 0x542   : > { %3834 = vmatpush.bf16.msrb.mxu1 %v4810_v44  ;;  %3823 = vmatpush.bf16.msrb.mxu0 %v4450_v51  ;;  %3853 = vst [vmem:[#allocation12 + $0x8] sm:$0xff] %v3844_v53  ;;  %v2144_v53 = vld [vmem:[#allocation12 + $0x40] sm:$0xff] }
 0x543   : > { %v3555_v2 = vpop.f32.mrf.mxu3  ;;  %v3594_v62 = vpop.f32.mrf.mxu2 }
 0x545   : > { %3811 = vmatpush.bf16.msra.mxu3 %v4126_v54 }
 0x546   : > { %3835 = vmatpush.bf16.msrb.mxu1 %v4774_v30  ;;  %3824 = vmatpush.bf16.msrb.mxu0 %v4414_v25  ;;  %v3581_v43 = vpop.f32.mrf.mxu1  ;;  %v3618_v29 = vpop.f32.mrf.mxu0  ;;  %v2142_v30 = vld [vmem:[#allocation12 + $0x30] sm:$0xff] }
 0x548   : > { %3812 = vmatmul.bf16.vlgmr.msra.gmra.mxu3 %v6749_v3  ;;  %v2139_v3 = vld [vmem:[#allocation12 + $0x18] sm:$0xff] }
 0x549   : > { %3825 = vmatmul.bf16.vlgmr.msrb.gmra.mxu0 %v6754_v24 }
 0x54a   : > { %3836 = vmatpush.bf16.msrb.mxu1 %v4738_v49  ;;  %v2143_v49 = vld [vmem:[#allocation12 + $0x38] sm:$0xff] }
 0x54b   : > { %v3605_v56 = vpop.f32.mrf.mxu3 }
 0x54c   : > { %v3606_v20 = vadd.f32 %v3605_v56, %v3593_v35 }
 0x54e   : > { %3837 = vmatpush.bf16.msrb.mxu1 %v4702_v55  ;;  %v3631_v63 = vpop.f32.mrf.mxu1  ;;  %v3845_v8 = vadd.f32 %v3606_v20, %v2138_v37  ;;  %v3620_v22 = vpop.f32.mrf.mxu0 }
 0x54f   : > { %v3644_v23 = vpop.f32.mrf.mxu2  ;;  %v3632_v47 = vadd.f32 %v3631_v63, %v3618_v29 }
 0x550   : > { %3854 = vst [vmem:[#allocation12 + $0x10] sm:$0xff] %v3845_v8 }
 0x551   : > { %3838 = vmatmul.bf16.vlgmr.msrb.gmra.mxu1 %v6770_v60  ;;  %v3645_v24 = vadd.f32 %v3644_v23, %v3632_v47 }
 0x553   : > { %v3846_v13 = vadd.f32 %v3645_v24, %v2139_v3  ;;  %v3607_v12 = vpop.f32.mrf.mxu3 }
 0x555   : > { %3855 = vst [vmem:[#allocation12 + $0x18] sm:$0xff] %v3846_v13 }
 0x556   : > { %v3633_v14 = vpop.f32.mrf.mxu1 }
 0x557   : > { %v3646_v52 = vpop.f32.mrf.mxu2 }
 0x566   : > { %v3670_v16 = vpop.f32.mrf.mxu0 }
 0x56b   : > { %v3657_v60 = vpop.f32.mrf.mxu3 }
 0x56c   : > { %v3671_v50 = vadd.f32 %v3670_v16, %v3657_v60 }
 0x56e   : > { %v3683_v0 = vpop.f32.mrf.mxu1  ;;  %v3672_v45 = vpop.f32.mrf.mxu0 }
 0x56f   : > { %v3696_v15 = vpop.f32.mrf.mxu2  ;;  %v3684_v1 = vadd.f32 %v3683_v0, %v3671_v50 }
 0x571   : > { %v3847_v36 = vadd.f32 %v3684_v1, %v2140_v32 }
 0x573   : > { %3856 = vst [vmem:[#allocation12 + $0x20] sm:$0xff] %v3847_v36  ;;  %v3659_v48 = vpop.f32.mrf.mxu3 }
 0x576   : > { %v3685_v6 = vpop.f32.mrf.mxu1 }
 0x577   : > { %v3698_v5 = vpop.f32.mrf.mxu2 }
 0x586   : > { %v3722_v34 = vpop.f32.mrf.mxu0 }
 0x58b   : > { %v3709_v44 = vpop.f32.mrf.mxu3 }
 0x58c   : > { %v3710_v11 = vadd.f32 %v3709_v44, %v3696_v15 }
 0x58e   : > { %v3735_v31 = vpop.f32.mrf.mxu1  ;;  %v3724_v40 = vpop.f32.mrf.mxu0  ;;  %v3723_v7 = vadd.f32 %v3722_v34, %v3710_v11 }
 0x58f   : > { %v3748_v33 = vpop.f32.mrf.mxu2 }
 0x590   : > { %v3848_v41 = vadd.f32 %v3723_v7, %v2141_v61  ;;  %v3749_v58 = vadd.f32 %v3748_v33, %v3735_v31 }
 0x592   : > { %3857 = vst [vmem:[#allocation12 + $0x28] sm:$0xff] %v3848_v41 }
 0x593   : > { %v3711_v57 = vpop.f32.mrf.mxu3 }
 0x596   : > { %v3737_v51 = vpop.f32.mrf.mxu1 }
 0x597   : > { %v3750_v59 = vpop.f32.mrf.mxu2 }
 0x5a6   : > { %v3774_v38 = vpop.f32.mrf.mxu0 }
 0x5ab   : > { %v3761_v17 = vpop.f32.mrf.mxu3 }
 0x5ac   : > { %v3762_v42 = vadd.f32 %v3761_v17, %v3749_v58 }
 0x5ae   : > { %v3787_v28 = vpop.f32.mrf.mxu1  ;;  %v3800_v26 = vpop.f32.mrf.mxu2  ;;  %v3849_v25 = vadd.f32 %v3762_v42, %v2142_v30 }
 0x5af   : > { %v3788_v54 = vadd.f32 %v3787_v28, %v3774_v38  ;;  %v3776_v19 = vpop.f32.mrf.mxu0 }
 0x5b0   : > { %3858 = vst [vmem:[#allocation12 + $0x30] sm:$0xff] %v3849_v25 }
 0x5b1   : > { %v3801_v4 = vadd.f32 %v3800_v26, %v3788_v54 }
 0x5b3   : > { %v3850_v18 = vadd.f32 %v3801_v4, %v2143_v49  ;;  %v3763_v27 = vpop.f32.mrf.mxu3 }
 0x5b5   : > { %3859 = vst [vmem:[#allocation12 + $0x38] sm:$0xff] %v3850_v18 }
 0x5b6   : > { %v3789_v10 = vpop.f32.mrf.mxu1  ;;  %v3802_v46 = vpop.f32.mrf.mxu2 }
 0x5c6   : > { %v3826_v9 = vpop.f32.mrf.mxu0 }
 0x5cb   : > { %v3813_v39 = vpop.f32.mrf.mxu3 }
 0x5cc   : > { %v3827_v55 = vadd.f32 %v3826_v9, %v3813_v39 }
 0x5ce   : > { %v3839_v21 = vpop.f32.mrf.mxu1  ;;  %v3828_v43 = vpop.f32.mrf.mxu0 }
 0x5cf   : > { %v3840_v2 = vadd.f32 %v3839_v21, %v3827_v55 }
 0x5d1   : > { %v3851_v62 = vadd.f32 %v3840_v2, %v2144_v53 }
 0x5d3   : > { %3860 = vst [vmem:[#allocation12 + $0x40] sm:$0xff] %v3851_v62  ;;  %v3815_v29 = vpop.f32.mrf.mxu3 }
 0x5d4   : > { %5222 = dma.vmem_to_hbm [thread:$0]  (%p5248_p5), %s3868_s10, 1152, %s3870_s30, [#allocation5]  }
 0x5d6   : > { %v3841_v35 = vpop.f32.mrf.mxu1 }
 0x5d7   : > { %5505 = dma.done.wait (%p5248_p5), [#allocation5], 1152  }
 0x5d8   : > { %5507 = vsyncadd (%p5248_p5), [#allocation5], 4294966144 }
 0x5d9 PF: > { %s7115_s27 = sld [smem:[#allocation18_spill]]  ;;  %p20_p8 = scmp.ge.s32.totalorder %s5587_s23, 5  }
 0x5da   : > { %s7116_s18 = smov %s5514_s19  ;;  %s7117_s19 = smov %s5518_s20 }
 0x5db   : > { %s7119_s21 = smov %s5587_s23  ;;  %22 = sbr.rel (!%p20_p8) target bundleno = 10 (0xa), region = 114 }
 0x5df   : > { %s7118_s20 = smov %s7115_s27 }
 0x5e0   :  { %3883 = vsyncpa [#allocation4], 1 }
 0x5e1   :  { %3885 = vsyncpa [#allocation4 + $0x1], 1 }
 0x5e2   :  { %3886 = vsyncpa [#allocation7], 1 }
 0x5e3   :  { %3888 = vsyncpa [#allocation7 + $0x1], 1 }
 0x5e4   :  { %3889 = vsyncpa [#allocation10], 1 }
 0x5e5   :  { %3891 = vsyncpa [#allocation10 + $0x1], 1 }
 0x5e6   :  { %3892 = vsyncpa [#allocation5], 1 }
 0x5e7   :  { %3894 = vsyncpa [#allocation5 + $0x1], 1 }

</bundles_post_ra>
